<compile_context>
chip_gen: v7x
topology: tpu7x:2x2x1
jax: 0.10.0
libtpu: 0.0.40
codegen_flags: <defaults>
</compile_context>

<pallas_src>
import functools
import re

import jax
import jax.numpy as jnp
from jax.experimental import pallas as pl
from jax.experimental.pallas import tpu as pltpu


def _silu(x):
    return x * jax.nn.sigmoid(x)


@functools.lru_cache(maxsize=1)
def _tpu_config():
    """(pool_dtype, vmem_cap_bytes) chosen per TPU generation.

    v6e / v7x have native bf16 VALU -> pool in bf16 (max is monotone, so
    bf16-pool-then-bf16-matmul matches f32-pool-then-bf16-cast for cv2 inputs).
    v5e (no bf16 VALU) and unknown chips keep the elementwise path in f32.
    v7x has only 64 MiB physical VMEM -> cap the scoped request at 32 MiB.
    """
    try:
        kind = jax.devices()[0].device_kind.lower()
    except Exception:
        kind = ""
    m = re.search(r"(\d+)", kind)
    gen = int(m.group(1)) if m else 0
    pool_dtype = jnp.bfloat16 if gen >= 6 else jnp.float32
    vmem_cap = (64 << 20) if gen in (5, 6) else (32 << 20)
    return pool_dtype, vmem_cap


def _sppf_mcca_kernel(x_ref, w1_ref, b1_ref, w2_ref, b2_ref,
                      aw1_ref, ab1_ref, aw2_ref, ab2_ref,
                      out_ref, pool_scr):
    H, W, c1 = x_ref.shape[1], x_ref.shape[2], x_ref.shape[3]
    c_ = w1_ref.shape[1]
    c2 = w2_ref.shape[1]
    HW = H * W
    pdt = pool_scr.dtype
    neg = jnp.asarray(-jnp.inf, dtype=pdt)

    # ---- cv1: 1x1 conv (BN folded) + SiLU; bf16 MXU, f32 accumulation ----
    x = x_ref[0].reshape(HW, c1)                                   # free view (W % 8 == 0)
    x0 = jnp.dot(x, w1_ref[...], preferred_element_type=jnp.float32) + b1_ref[...]
    x0 = _silu(x0).astype(pdt)                                     # (HW, c_) pool dtype

    # ---- SPPF: three chained separable 5x5 max pools ----
    # -inf border rows of the height-pass scratch (written every step: the
    # scratch is per-core and "parallel" steps may land on either core).
    pad_rows = jnp.full((2, W, c_), -jnp.inf, pdt)
    pool_scr[0:2] = pad_rows
    pool_scr[H + 2:H + 4] = pad_rows

    col = jax.lax.broadcasted_iota(jnp.int32, (W, c_), 0)          # col[w, c] = w
    col_masks = tuple(((col < (W - s)), (col >= s)) for s in (1, 2))

    def pool5(v):                                                  # v: (H, W, c_)
        # width pass: XLU rolls + border masks (lane axis untouched)
        m = v
        for (fwd_ok, bwd_ok), s in zip(col_masks, (1, 2)):
            fwd = pltpu.roll(v, W - s, axis=1)                     # fwd[:, w] = v[:, w + s]
            bwd = pltpu.roll(v, s, axis=1)                         # bwd[:, w] = v[:, w - s]
            m = jnp.maximum(m, jnp.where(fwd_ok, fwd, neg))
            m = jnp.maximum(m, jnp.where(bwd_ok, bwd, neg))
        # height pass: leading-axis slices of the persistent -inf-padded scratch
        pool_scr[2:H + 2] = m
        out = m                                                    # dh == 2 is m itself
        for dh in (0, 1, 3, 4):
            out = jnp.maximum(out, pool_scr[dh:dh + H])
        return out

    x0_hw = x0.reshape(H, W, c_)
    y1 = pool5(x0_hw)
    y2 = pool5(y1)
    y3 = pool5(y2)

    # ---- concat slab (HW, 4c_): feeds both the attention GAP and cv2 ----
    slab = jnp.concatenate(
        [x0, y1.reshape(HW, c_), y2.reshape(HW, c_), y3.reshape(HW, c_)], axis=-1)

    # ---- MCCA stand-in: SE attention (GAP -> FC -> SiLU -> FC -> sigmoid) ----
    pooled = jnp.sum(slab.astype(jnp.float32), axis=0, keepdims=True) * (1.0 / HW)
    h = _silu(jnp.dot(pooled, aw1_ref[...], preferred_element_type=jnp.float32)
              + ab1_ref[...])
    scale = jax.nn.sigmoid(jnp.dot(h, aw2_ref[...], preferred_element_type=jnp.float32)
                           + ab2_ref[...])                          # (1, 4c_)

    # ---- cv2: scale activations, single K = 4c_ matmul with (K, N) weight ----
    slab_s = (slab * scale.astype(pdt)).astype(jnp.bfloat16)
    acc = jnp.dot(slab_s, w2_ref[...], preferred_element_type=jnp.float32)
    out = _silu(acc + b2_ref[...])
    out_ref[0] = out.astype(out_ref.dtype).reshape(H, W, c2)


@jax.jit
def sppf_mcca_nhwc(x_nhwc, w1, b1, w2, b2, aw1, ab1, aw2, ab2):
    """NHWC fast path: no layout transposes, bf16 input/output."""
    N, H, W, c1 = x_nhwc.shape
    c_ = w1.shape[1]
    c2 = w2.shape[1]
    c4 = 4 * c_
    r = aw1.shape[1]
    if w2.shape[0] != c4 or aw1.shape[0] != c4 or aw2.shape[1] != c4 or ab2.shape[-1] != c4:
        raise ValueError("attention / cv2 weight shapes must match 4 * (c1 // 2) channels")
    # TODO(synk): if W % 8 != 0 the in-kernel (H, W, C) <-> (HW, C) reshapes force
    # relayout copies; pad W to a multiple of 8 in the caller for best performance.

    pdt, vmem_cap = _tpu_config()
    pbytes = jnp.dtype(pdt).itemsize

    # Weight repacking: bf16 MXU weights, cv2 kept in (K, N) orientation.
    w1b = w1.astype(jnp.bfloat16)                     # (c1, c_)
    b1f = b1.reshape(1, c_).astype(jnp.float32)
    w2b = w2.astype(jnp.bfloat16)                     # (4c_, c2) untransposed
    b2f = b2.reshape(1, c2).astype(jnp.float32)
    aw1f = aw1.astype(jnp.float32)                    # (4c_, r)
    ab1f = ab1.reshape(1, r).astype(jnp.float32)
    aw2f = aw2.astype(jnp.float32)                    # (r, 4c_)
    ab2f = ab2.reshape(1, c4).astype(jnp.float32)
    weights = (w1b, b1f, w2b, b2f, aw1f, ab1f, aw2f, ab2f)

    x = x_nhwc.astype(jnp.bfloat16)

    # Scoped-VMEM request: per-step footprint (with margin), generation-capped.
    HW = H * W
    weight_bytes = sum(a.size * a.dtype.itemsize for a in weights)
    io_bytes = 2 * (HW * c1 * 2 + HW * c2 * 2)                     # double-buffered blocks
    live = (HW * c_ * 4 + 4 * HW * c_ * pbytes + HW * c4 * pbytes
            + HW * c4 * 2 + HW * c2 * 4)
    need = io_bytes + 2 * weight_bytes + (H + 4) * W * c_ * pbytes + 3 * live + (4 << 20)
    vmem_limit = int(min(vmem_cap, max(need, 32 << 20)))

    def const_spec(arr):
        nd = arr.ndim
        # TODO(synk): single-buffer these constant blocks via
        # pipeline_mode=pl.Buffered(1) once validated on the target jax version.
        return pl.BlockSpec(arr.shape, lambda n, _nd=nd: (0,) * _nd)

    out = pl.pallas_call(
        _sppf_mcca_kernel,
        out_shape=jax.ShapeDtypeStruct((N, H, W, c2), jnp.bfloat16),
        grid=(N,),
        in_specs=[pl.BlockSpec((1, H, W, c1), lambda n: (n, 0, 0, 0))]
        + [const_spec(a) for a in weights],
        out_specs=pl.BlockSpec((1, H, W, c2), lambda n: (n, 0, 0, 0)),
        scratch_shapes=[pltpu.VMEM((H + 4, W, c_), pdt)],
        compiler_params=pltpu.CompilerParams(
            dimension_semantics=("parallel",),
            vmem_limit_bytes=vmem_limit),
    )(x, *weights)
    return out


@jax.jit
def sppf_mcca(x_nchw, w1, b1, w2, b2, aw1, ab1, aw2, ab2):
    """PyTorch-layout wrapper: NCHW in, NCHW out (bf16 output).

    The layout transposes run in bf16 (half the HBM traffic of f32); if the
    surrounding graph is NHWC, call `sppf_mcca_nhwc` directly and drop both.
    """
    x = jnp.transpose(x_nchw.astype(jnp.bfloat16), (0, 2, 3, 1))
    out = sppf_mcca_nhwc(x, w1, b1, w2, b2, aw1, ab1, aw2, ab2)
    return jnp.transpose(out, (0, 3, 1, 2))


# ----------------------------- reference (plain JAX) -----------------------------

def _maxpool5_ref(x):
    H, W, C = x.shape
    xp = jnp.pad(x, ((2, 2), (2, 2), (0, 0)), constant_values=-jnp.inf)
    m = x
    for dh in range(5):
        for dw in range(5):
            m = jnp.maximum(m, xp[dh:dh + H, dw:dw + W, :])
    return m


def _reference(x_nchw, w1, b1, w2, b2, aw1, ab1, aw2, ab2):
    x = jnp.transpose(x_nchw, (0, 2, 3, 1))
    c_ = w1.shape[1]
    c2 = w2.shape[1]

    def one(xs):
        H, W, c1 = xs.shape
        x0 = _silu(jnp.dot(xs.reshape(H * W, c1).astype(jnp.bfloat16),
                           w1.astype(jnp.bfloat16),
                           preferred_element_type=jnp.float32) + b1.reshape(1, c_))
        x0 = x0.reshape(H, W, c_)
        y1 = _maxpool5_ref(x0)
        y2 = _maxpool5_ref(y1)
        y3 = jnp.concatenate([x0, y1, y2, _maxpool5_ref(y2)], axis=-1)
        c4 = y3.shape[-1]
        y3f = y3.reshape(H * W, c4)
        pooled = jnp.mean(y3f, axis=0, keepdims=True)
        h = _silu(jnp.dot(pooled, aw1) + ab1.reshape(1, -1))
        s = jax.nn.sigmoid(jnp.dot(h, aw2) + ab2.reshape(1, -1))
        y4 = y3f * s
        out = _silu(jnp.dot(y4.astype(jnp.bfloat16), w2.astype(jnp.bfloat16),
                            preferred_element_type=jnp.float32) + b2.reshape(1, c2))
        return out.reshape(H, W, c2)

    return jnp.transpose(jax.vmap(one)(x), (0, 3, 1, 2))


if __name__ == "__main__":
    # Small shapes consistent with the module.  c2 == 2*c1 so that MCCA(c2)
    # matches the 4*(c1//2)-channel concatenated tensor; c2 = 128 keeps the
    # output stores lane-dense, W = 16 keeps the in-kernel reshapes free views.
    N, c1, H, W = 2, 64, 16, 16
    c_ = c1 // 2            # 32
    c4 = 4 * c_             # 128
    c2 = 2 * c1             # 128
    r = c4 // 4             # 32

    key = jax.random.PRNGKey(0)
    ks = jax.random.split(key, 9)
    x = jax.random.normal(ks[0], (N, c1, H, W), jnp.float32)

    # Deterministic synthetic parameters; BatchNorm (eval) folded into (w*, b*).
    w1 = 0.10 * jax.random.normal(ks[1], (c1, c_), jnp.float32)
    b1 = 0.02 * jax.random.normal(ks[2], (1, c_), jnp.float32)
    w2 = 0.10 * jax.random.normal(ks[3], (c4, c2), jnp.float32)
    b2 = 0.02 * jax.random.normal(ks[4], (1, c2), jnp.float32)
    aw1 = 0.10 * jax.random.normal(ks[5], (c4, r), jnp.float32)
    ab1 = 0.02 * jax.random.normal(ks[6], (1, r), jnp.float32)
    aw2 = 0.10 * jax.random.normal(ks[7], (r, c4), jnp.float32)
    ab2 = 0.02 * jax.random.normal(ks[8], (1, c4), jnp.float32)

    out = jax.block_until_ready(sppf_mcca(x, w1, b1, w2, b2, aw1, ab1, aw2, ab2))
    assert out.shape == (N, c2, H, W), out.shape

    ref = jax.block_until_ready(_reference(x, w1, b1, w2, b2, aw1, ab1, aw2, ab2))
    out_f32 = out.astype(jnp.float32)
    max_err = float(jnp.max(jnp.abs(out_f32 - ref)))
    assert jnp.allclose(out_f32, ref, rtol=4e-2, atol=4e-2), max_err

    print("KERNEL_OK")
</pallas_src>

<mosaic_0001>
module attributes {stable_mosaic.version = 11 : i64} {
  func.func @_sppf_mcca_kernel(%arg0: i32, %arg1: memref<1x16x16x64xbf16, #tpu.memory_space<vmem>>, %arg2: memref<64x32xbf16, #tpu.memory_space<vmem>>, %arg3: memref<1x32xf32, #tpu.memory_space<vmem>>, %arg4: memref<128x128xbf16, #tpu.memory_space<vmem>>, %arg5: memref<1x128xf32, #tpu.memory_space<vmem>>, %arg6: memref<128x32xf32, #tpu.memory_space<vmem>>, %arg7: memref<1x32xf32, #tpu.memory_space<vmem>>, %arg8: memref<32x128xf32, #tpu.memory_space<vmem>>, %arg9: memref<1x128xf32, #tpu.memory_space<vmem>>, %arg10: memref<1x16x16x128xbf16, #tpu.memory_space<vmem>>, %arg11: memref<20x16x32xf32, #tpu.memory_space<vmem>>) attributes {dimension_semantics = [#tpu.dimension_semantics<parallel>], iteration_bounds = array<i64: 2>, scalar_prefetch = 0 : i64, scratch_operands = 1 : i64, tpu.core_type = #tpu.core_type<tc>, window_params = [{transform_indices = @transform_0, window_bounds = array<i64: 1, 16, 16, 64>}, {pipeline_mode = #tpu.pipeline_mode<synchronous>, transform_indices = @transform_1, window_bounds = array<i64: 64, 32>}, {pipeline_mode = #tpu.pipeline_mode<synchronous>, transform_indices = @transform_2, window_bounds = array<i64: 1, 32>}, {pipeline_mode = #tpu.pipeline_mode<synchronous>, transform_indices = @transform_3, window_bounds = array<i64: 128, 128>}, {pipeline_mode = #tpu.pipeline_mode<synchronous>, transform_indices = @transform_4, window_bounds = array<i64: 1, 128>}, {pipeline_mode = #tpu.pipeline_mode<synchronous>, transform_indices = @transform_5, window_bounds = array<i64: 128, 32>}, {pipeline_mode = #tpu.pipeline_mode<synchronous>, transform_indices = @transform_6, window_bounds = array<i64: 1, 32>}, {pipeline_mode = #tpu.pipeline_mode<synchronous>, transform_indices = @transform_7, window_bounds = array<i64: 32, 128>}, {pipeline_mode = #tpu.pipeline_mode<synchronous>, transform_indices = @transform_8, window_bounds = array<i64: 1, 128>}, {transform_indices = @transform_9, window_bounds = array<i64: 1, 16, 16, 128>}]} {
    %c0 = arith.constant 0 : index
    %c0_0 = arith.constant 0 : index
    %c0_1 = arith.constant 0 : index
    %c0_2 = arith.constant 0 : index
    %0 = vector.load %arg1[%c0, %c0_0, %c0_1, %c0_2] : memref<1x16x16x64xbf16, #tpu.memory_space<vmem>>, vector<1x16x16x64xbf16>
    %1 = vector.shape_cast %0 : vector<1x16x16x64xbf16> to vector<16x16x64xbf16>
    %2 = vector.shape_cast %1 : vector<16x16x64xbf16> to vector<256x64xbf16>
    %c0_3 = arith.constant 0 : index
    %c0_4 = arith.constant 0 : index
    %3 = vector.load %arg2[%c0_3, %c0_4] : memref<64x32xbf16, #tpu.memory_space<vmem>>, vector<64x32xbf16>
    %cst = arith.constant dense<0.000000e+00> : vector<256x32xf32>
    %4 = tpu.matmul %2, %3, %cst {dimension_numbers = #tpu.dot_dimension_numbers<[1], [0], [0], [1], [0, 0, 1, 1], [], []>} : vector<256x64xbf16>, vector<64x32xbf16>, vector<256x32xf32> -> vector<256x32xf32>
    %c0_5 = arith.constant 0 : index
    %c0_6 = arith.constant 0 : index
    %5 = vector.load %arg3[%c0_5, %c0_6] : memref<1x32xf32, #tpu.memory_space<vmem>>, vector<1x32xf32>
    %6 = vector.broadcast %5 : vector<1x32xf32> to vector<256x32xf32>
    %7 = arith.addf %4, %6 : vector<256x32xf32>
    %8 = arith.negf %7 : vector<256x32xf32>
    %9 = math.exp %8 : vector<256x32xf32>
    %cst_7 = arith.constant 1.000000e+00 : f32
    %10 = vector.broadcast %cst_7 : f32 to vector<256x32xf32>
    %11 = arith.addf %10, %9 : vector<256x32xf32>
    %12 = arith.divf %10, %11 : vector<256x32xf32>
    %13 = arith.mulf %7, %12 : vector<256x32xf32>
    %cst_8 = arith.constant 0xFF800000 : f32
    %14 = vector.broadcast %cst_8 : f32 to vector<2x16x32xf32>
    %c0_9 = arith.constant 0 : index
    %c0_10 = arith.constant 0 : index
    %c0_11 = arith.constant 0 : index
    %15 = vector.load %arg11[%c0_9, %c0_10, %c0_11] : memref<20x16x32xf32, #tpu.memory_space<vmem>>, vector<2x16x32xf32>
    tpu.vector_store %arg11[%c0_9, %c0_10, %c0_11], %14 {strides = array<i32>} : memref<20x16x32xf32, #tpu.memory_space<vmem>>, vector<2x16x32xf32>,
    %c18 = arith.constant 18 : index
    %c0_12 = arith.constant 0 : index
    %c0_13 = arith.constant 0 : index
    %16 = vector.load %arg11[%c18, %c0_12, %c0_13] : memref<20x16x32xf32, #tpu.memory_space<vmem>>, vector<2x16x32xf32>
    tpu.vector_store %arg11[%c18, %c0_12, %c0_13], %14 {strides = array<i32>} : memref<20x16x32xf32, #tpu.memory_space<vmem>>, vector<2x16x32xf32>,
    %17 = tpu.iota {dimensions = array<i32: 0>} : vector<16x32xi32>
    %c15_i32 = arith.constant 15 : i32
    %18 = vector.broadcast %c15_i32 : i32 to vector<16x32xi32>
    %19 = arith.cmpi slt, %17, %18 : vector<16x32xi32>
    %c1_i32 = arith.constant 1 : i32
    %20 = vector.broadcast %c1_i32 : i32 to vector<16x32xi32>
    %21 = arith.cmpi sge, %17, %20 : vector<16x32xi32>
    %c14_i32 = arith.constant 14 : i32
    %22 = vector.broadcast %c14_i32 : i32 to vector<16x32xi32>
    %23 = arith.cmpi slt, %17, %22 : vector<16x32xi32>
    %c2_i32 = arith.constant 2 : i32
    %24 = vector.broadcast %c2_i32 : i32 to vector<16x32xi32>
    %25 = arith.cmpi sge, %17, %24 : vector<16x32xi32>
    %26 = vector.shape_cast %13 : vector<256x32xf32> to vector<16x16x32xf32>
    %c15_i32_14 = arith.constant 15 : i32
    %27 = tpu.dynamic_rotate %26 by %c15_i32_14 dim 1 : vector<16x16x32xf32>, i32 -> vector<16x16x32xf32>
    %c1_i32_15 = arith.constant 1 : i32
    %28 = tpu.dynamic_rotate %26 by %c1_i32_15 dim 1 : vector<16x16x32xf32>, i32 -> vector<16x16x32xf32>
    %cst_16 = arith.constant 0xFF800000 : f32
    %29 = vector.shape_cast %19 : vector<16x32xi1> to vector<1x16x32xi1>
    %30 = vector.broadcast %29 : vector<1x16x32xi1> to vector<16x16x32xi1>
    %31 = vector.broadcast %cst_16 : f32 to vector<16x16x32xf32>
    %32 = arith.select %30, %27, %31 : vector<16x16x32xi1>, vector<16x16x32xf32>
    %33 = arith.maximumf %26, %32 : vector<16x16x32xf32>
    %cst_17 = arith.constant 0xFF800000 : f32
    %34 = vector.shape_cast %21 : vector<16x32xi1> to vector<1x16x32xi1>
    %35 = vector.broadcast %34 : vector<1x16x32xi1> to vector<16x16x32xi1>
    %36 = vector.broadcast %cst_17 : f32 to vector<16x16x32xf32>
    %37 = arith.select %35, %28, %36 : vector<16x16x32xi1>, vector<16x16x32xf32>
    %38 = arith.maximumf %33, %37 : vector<16x16x32xf32>
    %c14_i32_18 = arith.constant 14 : i32
    %39 = tpu.dynamic_rotate %26 by %c14_i32_18 dim 1 : vector<16x16x32xf32>, i32 -> vector<16x16x32xf32>
    %c2_i32_19 = arith.constant 2 : i32
    %40 = tpu.dynamic_rotate %26 by %c2_i32_19 dim 1 : vector<16x16x32xf32>, i32 -> vector<16x16x32xf32>
    %cst_20 = arith.constant 0xFF800000 : f32
    %41 = vector.shape_cast %23 : vector<16x32xi1> to vector<1x16x32xi1>
    %42 = vector.broadcast %41 : vector<1x16x32xi1> to vector<16x16x32xi1>
    %43 = vector.broadcast %cst_20 : f32 to vector<16x16x32xf32>
    %44 = arith.select %42, %39, %43 : vector<16x16x32xi1>, vector<16x16x32xf32>
    %45 = arith.maximumf %38, %44 : vector<16x16x32xf32>
    %cst_21 = arith.constant 0xFF800000 : f32
    %46 = vector.shape_cast %25 : vector<16x32xi1> to vector<1x16x32xi1>
    %47 = vector.broadcast %46 : vector<1x16x32xi1> to vector<16x16x32xi1>
    %48 = vector.broadcast %cst_21 : f32 to vector<16x16x32xf32>
    %49 = arith.select %47, %40, %48 : vector<16x16x32xi1>, vector<16x16x32xf32>
    %50 = arith.maximumf %45, %49 : vector<16x16x32xf32>
    %c2 = arith.constant 2 : index
    %c0_22 = arith.constant 0 : index
    %c0_23 = arith.constant 0 : index
    %51 = vector.load %arg11[%c2, %c0_22, %c0_23] : memref<20x16x32xf32, #tpu.memory_space<vmem>>, vector<16x16x32xf32>
    tpu.vector_store %arg11[%c2, %c0_22, %c0_23], %50 {strides = array<i32>} : memref<20x16x32xf32, #tpu.memory_space<vmem>>, vector<16x16x32xf32>,
    %c0_24 = arith.constant 0 : index
    %c0_25 = arith.constant 0 : index
    %c0_26 = arith.constant 0 : index
    %52 = vector.load %arg11[%c0_24, %c0_25, %c0_26] : memref<20x16x32xf32, #tpu.memory_space<vmem>>, vector<16x16x32xf32>
    %53 = arith.maximumf %50, %52 : vector<16x16x32xf32>
    %c1 = arith.constant 1 : index
    %c0_27 = arith.constant 0 : index
    %c0_28 = arith.constant 0 : index
    %54 = vector.load %arg11[%c1, %c0_27, %c0_28] : memref<20x16x32xf32, #tpu.memory_space<vmem>>, vector<16x16x32xf32>
    %55 = arith.maximumf %53, %54 : vector<16x16x32xf32>
    %c3 = arith.constant 3 : index
    %c0_29 = arith.constant 0 : index
    %c0_30 = arith.constant 0 : index
    %56 = vector.load %arg11[%c3, %c0_29, %c0_30] : memref<20x16x32xf32, #tpu.memory_space<vmem>>, vector<16x16x32xf32>
    %57 = arith.maximumf %55, %56 : vector<16x16x32xf32>
    %c4 = arith.constant 4 : index
    %c0_31 = arith.constant 0 : index
    %c0_32 = arith.constant 0 : index
    %58 = vector.load %arg11[%c4, %c0_31, %c0_32] : memref<20x16x32xf32, #tpu.memory_space<vmem>>, vector<16x16x32xf32>
    %59 = arith.maximumf %57, %58 : vector<16x16x32xf32>
    %c15_i32_33 = arith.constant 15 : i32
    %60 = tpu.dynamic_rotate %59 by %c15_i32_33 dim 1 : vector<16x16x32xf32>, i32 -> vector<16x16x32xf32>
    %c1_i32_34 = arith.constant 1 : i32
    %61 = tpu.dynamic_rotate %59 by %c1_i32_34 dim 1 : vector<16x16x32xf32>, i32 -> vector<16x16x32xf32>
    %cst_35 = arith.constant 0xFF800000 : f32
    %62 = vector.shape_cast %19 : vector<16x32xi1> to vector<1x16x32xi1>
    %63 = vector.broadcast %62 : vector<1x16x32xi1> to vector<16x16x32xi1>
    %64 = vector.broadcast %cst_35 : f32 to vector<16x16x32xf32>
    %65 = arith.select %63, %60, %64 : vector<16x16x32xi1>, vector<16x16x32xf32>
    %66 = arith.maximumf %59, %65 : vector<16x16x32xf32>
    %cst_36 = arith.constant 0xFF800000 : f32
    %67 = vector.shape_cast %21 : vector<16x32xi1> to vector<1x16x32xi1>
    %68 = vector.broadcast %67 : vector<1x16x32xi1> to vector<16x16x32xi1>
    %69 = vector.broadcast %cst_36 : f32 to vector<16x16x32xf32>
    %70 = arith.select %68, %61, %69 : vector<16x16x32xi1>, vector<16x16x32xf32>
    %71 = arith.maximumf %66, %70 : vector<16x16x32xf32>
    %c14_i32_37 = arith.constant 14 : i32
    %72 = tpu.dynamic_rotate %59 by %c14_i32_37 dim 1 : vector<16x16x32xf32>, i32 -> vector<16x16x32xf32>
    %c2_i32_38 = arith.constant 2 : i32
    %73 = tpu.dynamic_rotate %59 by %c2_i32_38 dim 1 : vector<16x16x32xf32>, i32 -> vector<16x16x32xf32>
    %cst_39 = arith.constant 0xFF800000 : f32
    %74 = vector.shape_cast %23 : vector<16x32xi1> to vector<1x16x32xi1>
    %75 = vector.broadcast %74 : vector<1x16x32xi1> to vector<16x16x32xi1>
    %76 = vector.broadcast %cst_39 : f32 to vector<16x16x32xf32>
    %77 = arith.select %75, %72, %76 : vector<16x16x32xi1>, vector<16x16x32xf32>
    %78 = arith.maximumf %71, %77 : vector<16x16x32xf32>
    %cst_40 = arith.constant 0xFF800000 : f32
    %79 = vector.shape_cast %25 : vector<16x32xi1> to vector<1x16x32xi1>
    %80 = vector.broadcast %79 : vector<1x16x32xi1> to vector<16x16x32xi1>
    %81 = vector.broadcast %cst_40 : f32 to vector<16x16x32xf32>
    %82 = arith.select %80, %73, %81 : vector<16x16x32xi1>, vector<16x16x32xf32>
    %83 = arith.maximumf %78, %82 : vector<16x16x32xf32>
    %c2_41 = arith.constant 2 : index
    %c0_42 = arith.constant 0 : index
    %c0_43 = arith.constant 0 : index
    %84 = vector.load %arg11[%c2_41, %c0_42, %c0_43] : memref<20x16x32xf32, #tpu.memory_space<vmem>>, vector<16x16x32xf32>
    tpu.vector_store %arg11[%c2_41, %c0_42, %c0_43], %83 {strides = array<i32>} : memref<20x16x32xf32, #tpu.memory_space<vmem>>, vector<16x16x32xf32>,
    %c0_44 = arith.constant 0 : index
    %c0_45 = arith.constant 0 : index
    %c0_46 = arith.constant 0 : index
    %85 = vector.load %arg11[%c0_44, %c0_45, %c0_46] : memref<20x16x32xf32, #tpu.memory_space<vmem>>, vector<16x16x32xf32>
    %86 = arith.maximumf %83, %85 : vector<16x16x32xf32>
    %c1_47 = arith.constant 1 : index
    %c0_48 = arith.constant 0 : index
    %c0_49 = arith.constant 0 : index
    %87 = vector.load %arg11[%c1_47, %c0_48, %c0_49] : memref<20x16x32xf32, #tpu.memory_space<vmem>>, vector<16x16x32xf32>
    %88 = arith.maximumf %86, %87 : vector<16x16x32xf32>
    %c3_50 = arith.constant 3 : index
    %c0_51 = arith.constant 0 : index
    %c0_52 = arith.constant 0 : index
    %89 = vector.load %arg11[%c3_50, %c0_51, %c0_52] : memref<20x16x32xf32, #tpu.memory_space<vmem>>, vector<16x16x32xf32>
    %90 = arith.maximumf %88, %89 : vector<16x16x32xf32>
    %c4_53 = arith.constant 4 : index
    %c0_54 = arith.constant 0 : index
    %c0_55 = arith.constant 0 : index
    %91 = vector.load %arg11[%c4_53, %c0_54, %c0_55] : memref<20x16x32xf32, #tpu.memory_space<vmem>>, vector<16x16x32xf32>
    %92 = arith.maximumf %90, %91 : vector<16x16x32xf32>
    %c15_i32_56 = arith.constant 15 : i32
    %93 = tpu.dynamic_rotate %92 by %c15_i32_56 dim 1 : vector<16x16x32xf32>, i32 -> vector<16x16x32xf32>
    %c1_i32_57 = arith.constant 1 : i32
    %94 = tpu.dynamic_rotate %92 by %c1_i32_57 dim 1 : vector<16x16x32xf32>, i32 -> vector<16x16x32xf32>
    %cst_58 = arith.constant 0xFF800000 : f32
    %95 = vector.shape_cast %19 : vector<16x32xi1> to vector<1x16x32xi1>
    %96 = vector.broadcast %95 : vector<1x16x32xi1> to vector<16x16x32xi1>
    %97 = vector.broadcast %cst_58 : f32 to vector<16x16x32xf32>
    %98 = arith.select %96, %93, %97 : vector<16x16x32xi1>, vector<16x16x32xf32>
    %99 = arith.maximumf %92, %98 : vector<16x16x32xf32>
    %cst_59 = arith.constant 0xFF800000 : f32
    %100 = vector.shape_cast %21 : vector<16x32xi1> to vector<1x16x32xi1>
    %101 = vector.broadcast %100 : vector<1x16x32xi1> to vector<16x16x32xi1>
    %102 = vector.broadcast %cst_59 : f32 to vector<16x16x32xf32>
    %103 = arith.select %101, %94, %102 : vector<16x16x32xi1>, vector<16x16x32xf32>
    %104 = arith.maximumf %99, %103 : vector<16x16x32xf32>
    %c14_i32_60 = arith.constant 14 : i32
    %105 = tpu.dynamic_rotate %92 by %c14_i32_60 dim 1 : vector<16x16x32xf32>, i32 -> vector<16x16x32xf32>
    %c2_i32_61 = arith.constant 2 : i32
    %106 = tpu.dynamic_rotate %92 by %c2_i32_61 dim 1 : vector<16x16x32xf32>, i32 -> vector<16x16x32xf32>
    %cst_62 = arith.constant 0xFF800000 : f32
    %107 = vector.shape_cast %23 : vector<16x32xi1> to vector<1x16x32xi1>
    %108 = vector.broadcast %107 : vector<1x16x32xi1> to vector<16x16x32xi1>
    %109 = vector.broadcast %cst_62 : f32 to vector<16x16x32xf32>
    %110 = arith.select %108, %105, %109 : vector<16x16x32xi1>, vector<16x16x32xf32>
    %111 = arith.maximumf %104, %110 : vector<16x16x32xf32>
    %cst_63 = arith.constant 0xFF800000 : f32
    %112 = vector.shape_cast %25 : vector<16x32xi1> to vector<1x16x32xi1>
    %113 = vector.broadcast %112 : vector<1x16x32xi1> to vector<16x16x32xi1>
    %114 = vector.broadcast %cst_63 : f32 to vector<16x16x32xf32>
    %115 = arith.select %113, %106, %114 : vector<16x16x32xi1>, vector<16x16x32xf32>
    %116 = arith.maximumf %111, %115 : vector<16x16x32xf32>
    %c2_64 = arith.constant 2 : index
    %c0_65 = arith.constant 0 : index
    %c0_66 = arith.constant 0 : index
    %117 = vector.load %arg11[%c2_64, %c0_65, %c0_66] : memref<20x16x32xf32, #tpu.memory_space<vmem>>, vector<16x16x32xf32>
    tpu.vector_store %arg11[%c2_64, %c0_65, %c0_66], %116 {strides = array<i32>} : memref<20x16x32xf32, #tpu.memory_space<vmem>>, vector<16x16x32xf32>,
    %c0_67 = arith.constant 0 : index
    %c0_68 = arith.constant 0 : index
    %c0_69 = arith.constant 0 : index
    %118 = vector.load %arg11[%c0_67, %c0_68, %c0_69] : memref<20x16x32xf32, #tpu.memory_space<vmem>>, vector<16x16x32xf32>
    %119 = arith.maximumf %116, %118 : vector<16x16x32xf32>
    %c1_70 = arith.constant 1 : index
    %c0_71 = arith.constant 0 : index
    %c0_72 = arith.constant 0 : index
    %120 = vector.load %arg11[%c1_70, %c0_71, %c0_72] : memref<20x16x32xf32, #tpu.memory_space<vmem>>, vector<16x16x32xf32>
    %121 = arith.maximumf %119, %120 : vector<16x16x32xf32>
    %c3_73 = arith.constant 3 : index
    %c0_74 = arith.constant 0 : index
    %c0_75 = arith.constant 0 : index
    %122 = vector.load %arg11[%c3_73, %c0_74, %c0_75] : memref<20x16x32xf32, #tpu.memory_space<vmem>>, vector<16x16x32xf32>
    %123 = arith.maximumf %121, %122 : vector<16x16x32xf32>
    %c4_76 = arith.constant 4 : index
    %c0_77 = arith.constant 0 : index
    %c0_78 = arith.constant 0 : index
    %124 = vector.load %arg11[%c4_76, %c0_77, %c0_78] : memref<20x16x32xf32, #tpu.memory_space<vmem>>, vector<16x16x32xf32>
    %125 = arith.maximumf %123, %124 : vector<16x16x32xf32>
    %126 = vector.shape_cast %59 : vector<16x16x32xf32> to vector<256x32xf32>
    %127 = vector.shape_cast %92 : vector<16x16x32xf32> to vector<256x32xf32>
    %128 = vector.shape_cast %125 : vector<16x16x32xf32> to vector<256x32xf32>
    %129 = tpu.concatenate %13, %126, %127, %128 in 1 : vector<256x32xf32>, vector<256x32xf32>, vector<256x32xf32>, vector<256x32xf32> -> vector<256x128xf32>
    %cst_79 = arith.constant dense<0.000000e+00> : vector<128xf32>
    %130 = vector.multi_reduction <add>, %129, %cst_79 [0] : vector<256x128xf32> to vector<128xf32>
    %131 = vector.shape_cast %130 : vector<128xf32> to vector<1x128xf32>
    %cst_80 = arith.constant 3.906250e-03 : f32
    %132 = vector.broadcast %cst_80 : f32 to vector<1x128xf32>
    %133 = arith.mulf %131, %132 : vector<1x128xf32>
    %c0_81 = arith.constant 0 : index
    %c0_82 = arith.constant 0 : index
    %134 = vector.load %arg6[%c0_81, %c0_82] : memref<128x32xf32, #tpu.memory_space<vmem>>, vector<128x32xf32>
    %cst_83 = arith.constant dense<0.000000e+00> : vector<1x32xf32>
    %135 = tpu.matmul %133, %134, %cst_83 {dimension_numbers = #tpu.dot_dimension_numbers<[1], [0], [0], [1], [0, 0, 1, 1], [], []>} : vector<1x128xf32>, vector<128x32xf32>, vector<1x32xf32> -> vector<1x32xf32>
    %c0_84 = arith.constant 0 : index
    %c0_85 = arith.constant 0 : index
    %136 = vector.load %arg7[%c0_84, %c0_85] : memref<1x32xf32, #tpu.memory_space<vmem>>, vector<1x32xf32>
    %137 = arith.addf %135, %136 : vector<1x32xf32>
    %138 = arith.negf %137 : vector<1x32xf32>
    %139 = math.exp %138 : vector<1x32xf32>
    %cst_86 = arith.constant 1.000000e+00 : f32
    %140 = vector.broadcast %cst_86 : f32 to vector<1x32xf32>
    %141 = arith.addf %140, %139 : vector<1x32xf32>
    %142 = arith.divf %140, %141 : vector<1x32xf32>
    %143 = arith.mulf %137, %142 : vector<1x32xf32>
    %c0_87 = arith.constant 0 : index
    %c0_88 = arith.constant 0 : index
    %144 = vector.load %arg8[%c0_87, %c0_88] : memref<32x128xf32, #tpu.memory_space<vmem>>, vector<32x128xf32>
    %cst_89 = arith.constant dense<0.000000e+00> : vector<1x128xf32>
    %145 = tpu.matmul %143, %144, %cst_89 {dimension_numbers = #tpu.dot_dimension_numbers<[1], [0], [0], [1], [0, 0, 1, 1], [], []>} : vector<1x32xf32>, vector<32x128xf32>, vector<1x128xf32> -> vector<1x128xf32>
    %c0_90 = arith.constant 0 : index
    %c0_91 = arith.constant 0 : index
    %146 = vector.load %arg9[%c0_90, %c0_91] : memref<1x128xf32, #tpu.memory_space<vmem>>, vector<1x128xf32>
    %147 = arith.addf %145, %146 : vector<1x128xf32>
    %148 = arith.negf %147 : vector<1x128xf32>
    %149 = math.exp %148 : vector<1x128xf32>
    %cst_92 = arith.constant 1.000000e+00 : f32
    %150 = vector.broadcast %cst_92 : f32 to vector<1x128xf32>
    %151 = arith.addf %150, %149 : vector<1x128xf32>
    %152 = arith.divf %150, %151 : vector<1x128xf32>
    %153 = vector.broadcast %152 : vector<1x128xf32> to vector<256x128xf32>
    %154 = arith.mulf %129, %153 : vector<256x128xf32>
    %155 = arith.truncf %154 : vector<256x128xf32> to vector<256x128xbf16>
    %c0_93 = arith.constant 0 : index
    %c0_94 = arith.constant 0 : index
    %156 = vector.load %arg4[%c0_93, %c0_94] : memref<128x128xbf16, #tpu.memory_space<vmem>>, vector<128x128xbf16>
    %cst_95 = arith.constant dense<0.000000e+00> : vector<256x128xf32>
    %157 = tpu.matmul %155, %156, %cst_95 {dimension_numbers = #tpu.dot_dimension_numbers<[1], [0], [0], [1], [0, 0, 1, 1], [], []>} : vector<256x128xbf16>, vector<128x128xbf16>, vector<256x128xf32> -> vector<256x128xf32>
    %c0_96 = arith.constant 0 : index
    %c0_97 = arith.constant 0 : index
    %158 = vector.load %arg5[%c0_96, %c0_97] : memref<1x128xf32, #tpu.memory_space<vmem>>, vector<1x128xf32>
    %159 = vector.broadcast %158 : vector<1x128xf32> to vector<256x128xf32>
    %160 = arith.addf %157, %159 : vector<256x128xf32>
    %161 = arith.negf %160 : vector<256x128xf32>
    %162 = math.exp %161 : vector<256x128xf32>
    %cst_98 = arith.constant 1.000000e+00 : f32
    %163 = vector.broadcast %cst_98 : f32 to vector<256x128xf32>
    %164 = arith.addf %163, %162 : vector<256x128xf32>
    %165 = arith.divf %163, %164 : vector<256x128xf32>
    %166 = arith.mulf %160, %165 : vector<256x128xf32>
    %167 = arith.truncf %166 : vector<256x128xf32> to vector<256x128xbf16>
    %168 = vector.shape_cast %167 : vector<256x128xbf16> to vector<16x16x128xbf16>
    %c0_99 = arith.constant 0 : index
    %c0_100 = arith.constant 0 : index
    %c0_101 = arith.constant 0 : index
    %c0_102 = arith.constant 0 : index
    %169 = vector.load %arg10[%c0_99, %c0_100, %c0_101, %c0_102] : memref<1x16x16x128xbf16, #tpu.memory_space<vmem>>, vector<1x16x16x128xbf16>
    %170 = vector.shape_cast %169 : vector<1x16x16x128xbf16> to vector<16x16x128xbf16>
    %171 = vector.shape_cast %168 : vector<16x16x128xbf16> to vector<1x16x16x128xbf16>
    tpu.vector_store %arg10[%c0_99, %c0_100, %c0_101, %c0_102], %171 {strides = array<i32>} : memref<1x16x16x128xbf16, #tpu.memory_space<vmem>>, vector<1x16x16x128xbf16>,
    return
  }
  func.func @transform_0(%arg0: i32) -> (i32, i32, i32, i32) {
    %c0_i32 = arith.constant 0 : i32
    %c0_i32_0 = arith.constant 0 : i32
    %c0_i32_1 = arith.constant 0 : i32
    %c0_i32_2 = arith.constant 0 : i32
    return %arg0, %c0_i32, %c0_i32_0, %c0_i32_1 : i32, i32, i32, i32
  }
  func.func @transform_1(%arg0: i32) -> (i32, i32) {
    %c0_i32 = arith.constant 0 : i32
    %c0_i32_0 = arith.constant 0 : i32
    %c0_i32_1 = arith.constant 0 : i32
    return %c0_i32, %c0_i32_0 : i32, i32
  }
  func.func @transform_2(%arg0: i32) -> (i32, i32) {
    %c0_i32 = arith.constant 0 : i32
    %c0_i32_0 = arith.constant 0 : i32
    %c0_i32_1 = arith.constant 0 : i32
    return %c0_i32, %c0_i32_0 : i32, i32
  }
  func.func @transform_3(%arg0: i32) -> (i32, i32) {
    %c0_i32 = arith.constant 0 : i32
    %c0_i32_0 = arith.constant 0 : i32
    %c0_i32_1 = arith.constant 0 : i32
    return %c0_i32, %c0_i32_0 : i32, i32
  }
  func.func @transform_4(%arg0: i32) -> (i32, i32) {
    %c0_i32 = arith.constant 0 : i32
    %c0_i32_0 = arith.constant 0 : i32
    %c0_i32_1 = arith.constant 0 : i32
    return %c0_i32, %c0_i32_0 : i32, i32
  }
  func.func @transform_5(%arg0: i32) -> (i32, i32) {
    %c0_i32 = arith.constant 0 : i32
    %c0_i32_0 = arith.constant 0 : i32
    %c0_i32_1 = arith.constant 0 : i32
    return %c0_i32, %c0_i32_0 : i32, i32
  }
  func.func @transform_6(%arg0: i32) -> (i32, i32) {
    %c0_i32 = arith.constant 0 : i32
    %c0_i32_0 = arith.constant 0 : i32
    %c0_i32_1 = arith.constant 0 : i32
    return %c0_i32, %c0_i32_0 : i32, i32
  }
  func.func @transform_7(%arg0: i32) -> (i32, i32) {
    %c0_i32 = arith.constant 0 : i32
    %c0_i32_0 = arith.constant 0 : i32
    %c0_i32_1 = arith.constant 0 : i32
    return %c0_i32, %c0_i32_0 : i32, i32
  }
  func.func @transform_8(%arg0: i32) -> (i32, i32) {
    %c0_i32 = arith.constant 0 : i32
    %c0_i32_0 = arith.constant 0 : i32
    %c0_i32_1 = arith.constant 0 : i32
    return %c0_i32, %c0_i32_0 : i32, i32
  }
  func.func @transform_9(%arg0: i32) -> (i32, i32, i32, i32) {
    %c0_i32 = arith.constant 0 : i32
    %c0_i32_0 = arith.constant 0 : i32
    %c0_i32_1 = arith.constant 0 : i32
    %c0_i32_2 = arith.constant 0 : i32
    return %arg0, %c0_i32, %c0_i32_0, %c0_i32_1 : i32, i32, i32, i32
  }
}

</mosaic_0001>

<bundles_post_ra>
// kernel: sppf_mcca_nhwc.1
= control target key start
LH: loop header
LB: loop body
LE: loop exit
PB: predicated region body
PF: predicated region fallthrough
CT: control target
= control target key end

     0   :  { %14 = vsyncpa [#allocation4], 0  ;;  %s9943_s0 = inlined_call_operand.vmem [shape: bf16[2,16,16,64], index: 0, kind: input, shape index: {}]   ;;  %s9944_s1 = inlined_call_operand.vmem [shape: bf16[64,32], index: 1, kind: input, shape index: {}]   ;;  %s9945_s2 = inlined_call_operand.vmem [shape: f32[1,32], index: 2, kind: input, shape index: {}]   ;;  %s9946_s3 = inlined_call_operand.vmem [shape: bf16[128,128], index: 3, kind: input, shape index: {}]   ;;  %s9947_s4 = inlined_call_operand.vmem [shape: f32[1,128], index: 4, kind: input, shape index: {}]   ;;  %s9948_s5 = inlined_call_operand.vmem [shape: f32[128,32], index: 5, kind: input, shape index: {}]   ;;  %s9949_s6 = inlined_call_operand.vmem [shape: f32[1,32], index: 6, kind: input, shape index: {}]   ;;  %s9950_s7 = inlined_call_operand.vmem [shape: f32[32,128], index: 7, kind: input, shape index: {}]   ;;  %s9951_s8 = inlined_call_operand.vmem [shape: f32[1,128], index: 8, kind: input, shape index: {}]   ;;  %s9952_s9 = inlined_call_operand.hbm [shape: bf16[2,16,16,128], index: 9, kind: output, shape index: {}]  }
   0x1   :  { %16 = vsyncpa [#allocation4 + $0x1], 0  ;;  %s5785_s30 = smov 0   ;;  %s5787_s10 = smov 0  }
   0x2   :  { %s5789_s11 = smov 0   ;;  %s5791_s12 = smov 0  }
   0x3 LB: > { %s5806_s13 = sadd.s32 4294967295, %s5724_s12   ;;  %s4803_s14 = sadd.s32 4294967294, %s5724_s12   ;;  %s5724_s12 = sphi %s5791_s12, %s10279_s12   ;;  %s5720_s11 = sphi %s5789_s11, %s10278_s11   ;;  %s5716_s10 = sphi %s5787_s10, %s10277_s10   ;;  %s5712_s30 = sphi %s5785_s30, %s10276_s30  }
   0x4   : > { %s5810_s15 = sadd.s32 1, %s5724_s12   ;;  %s223_s16 = sadd.s32 1, %s5720_s11 }
   0x5   : > { %s220_s17 = ssub.s32 %s5724_s12, %s5810_s15  ;;  %p233_p0 = scmp.ne.s32.totalorder %s5720_s11, %s5716_s10 }
   0x6   : > { %p221_p1 = scmp.eq.s32.totalorder %s220_s17, 0  ;;  %p234_p2 = scmp.eq.s32.totalorder %s5806_s13, 1 }
   0x7   : > { %p239_p3 = scmp.ne.s32.totalorder %s5716_s10, %s5712_s30  ;;  %p240_p4 = scmp.eq.s32.totalorder %s4803_s14, 1 }
   0x8   : > { %s5821_s18 = scalar_select %p221_p1, %s5720_s11, %s223_s16  }
   0x9   : > { %p5823_p5 = por %p234_p2, %p233_p0  ;;  %p5827_p6 = por %p240_p4, %p239_p3 }
   0xa   : > { %p4806_p7 = scmp.ge.s32.totalorder %s5724_s12, 1  ;;  %p290_p8 = scmp.lt.s32.totalorder %s5724_s12, 3 }
   0xc   : > { %p291_p9 = pnand %p4806_p7, %p290_p8 }
   0xe   : > { %294 = sbr.rel (%p291_p9) target bundleno = 1736 (0x6c8), region = 56 }
  0x15   : > { %v5366_v0 = vld [vmem:[%s9944_s1] sm:$0xff]   ;;  %p326_p10 = scmp.lt.s32.totalorder %s5806_s13, 1  ;;  %v5367_v1 = vld [vmem:[%s9944_s1 + $0x8] sm:$0xff]   ;;  %vm483_vm0 = vcmask 523264   ;;  %v5368_v2 = vld [vmem:[%s9944_s1 + $0x10] sm:$0xff]   ;;  %vm917_vm1 = vcmask 261120   ;;  %v927_v49 = vlaneseq }
  0x16   : > { %5155 = vmatprep.subr.bf16.mxu0 %v5366_v0  ;;  %v5369_v4 = vld [vmem:[%s9944_s1 + $0x18] sm:$0xff]   ;;  %v5887_v20 = vld [vmem:[%s9945_s2] ss:$0 sm:$0xff]  ;;  %v5726_v36 = vmov -inf   ;;  %s5727_s24 = smov 32   ;;  %s5729_s26 = smov 96  }
  0x17   : > { %s327_s25 = scalar_select %p326_p10, %s5806_s13, 1  ;;  %5156 = vmatpush3.bf16.msra.mxu0 %v5366_v0  ;;  %918 = vst.msk [vmem:[#allocation2] sm:$0xff] %vm917_vm1, %v5726_v36  ;;  %920 = vst.msk [vmem:[#allocation2 + $0x10] sm:$0xff] %vm917_vm1, %v5726_v36  ;;  %v5939_v63 = vshrl.u32 %v927_v49, 7  ;;  %vm5731_vm10 = vmmov 0   ;;  %vm3810_vm11 = vcmask 785408  }
  0x18   : > { %5157 = vmatprep.subr.bf16.mxu0 %v5367_v1  ;;  %919 = vst.msk [vmem:[#allocation2 + $0x8] sm:$0xff] %vm917_vm1, %v5726_v36  ;;  %921 = vst.msk [vmem:[#allocation2 + $0x18] sm:$0xff] %vm917_vm1, %v5726_v36  ;;  %s5733_s22 = smov [#allocation3]  }
  0x19   : > { %s4960_s28 = sshll.u32 %s327_s25, 7  ;;  %923 = vst.msk [vmem:[#allocation2 + $0x120] sm:$0xff] %vm917_vm1, %v5726_v36  ;;  %924 = vst.msk [vmem:[#allocation2 + $0x128] sm:$0xff] %vm917_vm1, %v5726_v36  ;;  %vm970_vm2 = vcmp.lt.s32.totalorder %v5939_v63, 7  ;;  %vm1035_vm3 = vcmp.lt.s32.totalorder %v5939_v63, 1  ;;  %vm932_vm4 = vcmp.ge.s32.totalorder %v5939_v63, 1 }
  0x1a   : > { %s5847_s16 = scalar_lea.vmem %s9943_s0, %s4960_s28  ;;  %925 = vst.msk [vmem:[#allocation2 + $0x130] sm:$0xff] %vm917_vm1, %v5726_v36  ;;  %926 = vst.msk [vmem:[#allocation2 + $0x138] sm:$0xff] %vm917_vm1, %v5726_v36  ;;  %vm1236_vm6 = vcmp.lt.s32.totalorder %v5939_v63, 6  ;;  %vm936_vm8 = vcmp.ge.s32.totalorder %v5939_v63, 2  ;;  %vm1301_vm9 = vcmp.lt.s32.totalorder %v5939_v63, 2  ;;  %s5728_s25 = smov 64  }
  0x1b   : > { %v5370_v3 = vld [vmem:[%s5847_s16] sm:$0xff]   ;;  %5158 = vmatpush3.bf16.msra.mxu0 %v5367_v1  ;;  %v5371_v5 = vld [vmem:[%s5847_s16 + $0x8] sm:$0xff]   ;;  %v5372_v6 = vld [vmem:[%s5847_s16 + $0x10] sm:$0xff]   ;;  %s4993_s28 = sshll.u32 %s5806_s13, 11  ;;  %s5666_s23 = sshll.u32 %s5733_s22, 4  ;;  %s5667_s23 = int_to_ptr.vmem [resolvable:$false] %s5666_s23 }
  0x1c   : > { %5159 = vmatprep.subr.bf16.mxu0 %v5368_v2  ;;  %5163 = vmatprep.mubr.msk.bf16.mxu0 %vm483_vm0, %v5370_v3  ;;  %v5373_v7 = vld [vmem:[%s5847_s16 + $0x18] sm:$0xff]   ;;  %v5374_v8 = vld [vmem:[%s5847_s16 + $0x20] sm:$0xff]   ;;  %v5375_v9 = vld [vmem:[%s5847_s16 + $0x28] sm:$0xff]   ;;  %s9892_s17 = scalar_lea.hbm %s9952_s9, %s4993_s28 }
  0x1d   : > { %v5376_v10 = vld [vmem:[%s5847_s16 + $0x30] sm:$0xff]   ;;  %v5377_v11 = vld [vmem:[%s5847_s16 + $0x38] sm:$0xff]   ;;  %v5378_v12 = vld [vmem:[%s5847_s16 + $0x40] sm:$0xff]  }
  0x1e   : > { %v5379_v13 = vld [vmem:[%s5847_s16 + $0x48] sm:$0xff]   ;;  %v5380_v14 = vld [vmem:[%s5847_s16 + $0x50] sm:$0xff]   ;;  %v5381_v15 = vld [vmem:[%s5847_s16 + $0x58] sm:$0xff]  }
  0x1f   : > { %5160 = vmatpush3.bf16.msra.mxu0 %v5368_v2  ;;  %v5382_v16 = vld [vmem:[%s5847_s16 + $0x60] sm:$0xff]   ;;  %v5383_v17 = vld [vmem:[%s5847_s16 + $0x68] sm:$0xff]   ;;  %v5384_v18 = vld [vmem:[%s5847_s16 + $0x70] sm:$0xff]  }
  0x20   : > { %5161 = vmatprep.subr.bf16.mxu0 %v5369_v4  ;;  %v5385_v19 = vld [vmem:[%s5847_s16 + $0x78] sm:$0xff]  }
  0x23   : > { %5162 = vmatpush3.bf16.msra.mxu0 %v5369_v4 }
  0x26   : > { %5164 = vmatmul.mubr.msk.bf16.vlgmr.msra.gmra.mrb[0].mxu0 %vm483_vm0, %v5371_v5 }
  0x27   : > { %5167 = vmatprep.mubr.msk.bf16.mxu0 %vm483_vm0, %v5372_v6  ;;  %v5948_v6 = vadd.s32 8, %v5939_v63 }
  0x29   : > { %vm931_vm5 = vcmp.lt.s32.totalorder %v5948_v6, 15  ;;  %vm935_vm7 = vcmp.lt.s32.totalorder %v5948_v6, 14 }
  0x2e   : > { %5168 = vmatmul.mubr.msk.bf16.gmra.mrb[4].mxu0 %vm483_vm0, %v5373_v7 }
  0x2f   : > { %5171 = vmatprep.mubr.msk.bf16.mxu0 %vm483_vm0, %v5374_v8 }
  0x36   : > { %5172 = vmatmul.mubr.msk.bf16.gmra.mrb[8].mxu0 %vm483_vm0, %v5375_v9 }
  0x37   : > { %5175 = vmatprep.mubr.msk.bf16.mxu0 %vm483_vm0, %v5376_v10 }
  0x3e   : > { %5176 = vmatmul.mubr.msk.bf16.gmra.mrb[12].mxu0 %vm483_vm0, %v5377_v11 }
  0x3f   : > { %5179 = vmatprep.mubr.msk.bf16.mxu0 %vm483_vm0, %v5378_v12 }
  0x46   : > { %5180 = vmatmul.mubr.msk.bf16.gmra.mrb[16].mxu0 %vm483_vm0, %v5379_v13 }
  0x47   : > { %5183 = vmatprep.mubr.msk.bf16.mxu0 %vm483_vm0, %v5380_v14 }
  0x4e   : > { %5184 = vmatmul.mubr.msk.bf16.gmra.mrb[20].mxu0 %vm483_vm0, %v5381_v15 }
  0x4f   : > { %5187 = vmatprep.mubr.msk.bf16.mxu0 %vm483_vm0, %v5382_v16 }
  0x56   : > { %5188 = vmatmul.mubr.msk.bf16.gmra.mrb[24].mxu0 %vm483_vm0, %v5383_v17 }
  0x57   : > { %5191 = vmatprep.mubr.msk.bf16.mxu0 %vm483_vm0, %v5384_v18 }
  0x5e   : > { %5192 = vmatmul.mubr.msk.bf16.gmra.mrb[28].mxu0 %vm483_vm0, %v5385_v19 }
  0xf9   : > { %v5165_v21 = vpop.f32.mrb[0].mxu0 }
  0xfa   : > { %v5890_v22 = vadd.f32 %v5165_v21, %v5887_v20  ;;  %v566_v23 = vpop.f32.mrb[1].mxu0 }
  0xfb   : > { %v5893_v24 = vadd.f32 %v5887_v20, %v566_v23  ;;  %v5166_v25 = vpop.f32.mrb[2].mxu0 }
  0xfc   : > { %v4849_v26 = vmul.f32 -1.442695, %v5890_v22  ;;  %v5897_v27 = vadd.f32 %v5166_v25, %v5887_v20  ;;  %v569_v28 = vpop.f32.mrb[3].mxu0 }
  0xfd   : > { %v4847_v29 = vmul.f32 -1.442695, %v5893_v24  ;;  %v5901_v30 = vadd.f32 %v5887_v20, %v569_v28 }
  0xfe   : > { %5394 = vpow2.f32 %v4849_v26  ;;  %v4850_v31 = vmul.f32 -1.442695, %v5897_v27 }
  0xff   : > { %5396 = vpow2.f32 %v4847_v29  ;;  %v4848_v32 = vmul.f32 -1.442695, %v5901_v30 }
 0x100   : > { %5398 = vpow2.f32 %v4850_v31 }
 0x101   : > { %5400 = vpow2.f32 %v4848_v32  ;;  %v5169_v33 = vpop.f32.mrb[4].mxu0 }
 0x102   : > { %v5906_v34 = vadd.f32 %v5169_v33, %v5887_v20  ;;  %v582_v35 = vpop.f32.mrb[5].mxu0 }
 0x103   : > { %v5917_v37 = vadd.f32 %v5887_v20, %v582_v35  ;;  %v5170_v38 = vpop.f32.mrb[6].mxu0 }
 0x104   : > { %v4853_v39 = vmul.f32 -1.442695, %v5906_v34  ;;  %v5921_v40 = vadd.f32 %v5170_v38, %v5887_v20  ;;  %v585_v41 = vpop.f32.mrb[7].mxu0 }
 0x105   : > { %v4851_v42 = vmul.f32 -1.442695, %v5917_v37  ;;  %v5925_v43 = vadd.f32 %v5887_v20, %v585_v41 }
 0x106   : > { %5402 = vpow2.f32 %v4853_v39  ;;  %v4854_v44 = vmul.f32 -1.442695, %v5921_v40 }
 0x107   : > { %5404 = vpow2.f32 %v4851_v42  ;;  %v4852_v45 = vmul.f32 -1.442695, %v5925_v43 }
 0x108   : > { %v5395_v46 = vpop.eup %5394  ;;  %5406 = vpow2.f32 %v4854_v44 }
 0x109   : > { %v5397_v47 = vpop.eup %5396  ;;  %v791_v48 = vadd.f32 1.0, %v5395_v46  ;;  %5408 = vpow2.f32 %v4852_v45  ;;  %v5173_v50 = vpop.f32.mrb[8].mxu0 }
 0x10a   : > { %v5399_v51 = vpop.eup %5398  ;;  %v789_v52 = vadd.f32 1.0, %v5397_v47  ;;  %v5930_v53 = vadd.f32 %v5173_v50, %v5887_v20  ;;  %v598_v54 = vpop.f32.mrb[9].mxu0 }
 0x10b   : > { %v5401_v55 = vpop.eup %5400  ;;  %5410 = vrcp.f32 %v791_v48  ;;  %v792_v56 = vadd.f32 1.0, %v5399_v51  ;;  %v5933_v57 = vadd.f32 %v5887_v20, %v598_v54  ;;  %v5174_v58 = vpop.f32.mrb[10].mxu0 }
 0x10c   : > { %5412 = vrcp.f32 %v789_v52  ;;  %v790_v59 = vadd.f32 1.0, %v5401_v55  ;;  %v4857_v60 = vmul.f32 -1.442695, %v5930_v53  ;;  %v5937_v61 = vadd.f32 %v5174_v58, %v5887_v20  ;;  %v601_v62 = vpop.f32.mrb[11].mxu0 }
 0x10d   : > { %5414 = vrcp.f32 %v792_v56  ;;  %v4855_v0 = vmul.f32 -1.442695, %v5933_v57  ;;  %v5943_v1 = vadd.f32 %v5887_v20, %v601_v62 }
 0x10e   : > { %5416 = vrcp.f32 %v790_v59  ;;  %v4858_v2 = vmul.f32 -1.442695, %v5937_v61 }
 0x10f   : > { %5418 = vpow2.f32 %v4857_v60  ;;  %v4856_v3 = vmul.f32 -1.442695, %v5943_v1 }
 0x110   : > { %v5403_v4 = vpop.eup %5402  ;;  %5420 = vpow2.f32 %v4855_v0 }
 0x111   : > { %v5405_v5 = vpop.eup %5404  ;;  %v795_v7 = vadd.f32 1.0, %v5403_v4  ;;  %5422 = vpow2.f32 %v4858_v2  ;;  %v5177_v8 = vpop.f32.mrb[12].mxu0 }
 0x112   : > { %v5407_v9 = vpop.eup %5406  ;;  %v793_v10 = vadd.f32 1.0, %v5405_v5  ;;  %5424 = vpow2.f32 %v4856_v3  ;;  %v5951_v11 = vadd.f32 %v5177_v8, %v5887_v20  ;;  %v614_v12 = vpop.f32.mrb[13].mxu0 }
 0x113   : > { %v5409_v13 = vpop.eup %5408  ;;  %5426 = vrcp.f32 %v795_v7  ;;  %v796_v14 = vadd.f32 1.0, %v5407_v9  ;;  %v5956_v15 = vadd.f32 %v5887_v20, %v614_v12  ;;  %v5178_v16 = vpop.f32.mrb[14].mxu0 }
 0x114   : > { %5428 = vrcp.f32 %v793_v10  ;;  %v794_v17 = vadd.f32 1.0, %v5409_v13  ;;  %v4861_v18 = vmul.f32 -1.442695, %v5951_v11  ;;  %v5961_v19 = vadd.f32 %v5178_v16, %v5887_v20  ;;  %v617_v21 = vpop.f32.mrb[15].mxu0 }
 0x115   : > { %v5411_v23 = vpop.eup %5410  ;;  %5430 = vrcp.f32 %v796_v14  ;;  %v5966_v25 = vadd.f32 %v5887_v20, %v617_v21  ;;  %v4859_v29 = vmul.f32 -1.442695, %v5956_v15 }
 0x116   : > { %v5413_v26 = vpop.eup %5412  ;;  %v5969_v28 = vmul.f32 %v5411_v23, %v5890_v22  ;;  %5432 = vrcp.f32 %v794_v17  ;;  %v4862_v33 = vmul.f32 -1.442695, %v5961_v19 }
 0x117   : > { %10016 = vst [vmem:[#allocation6_spill] sm:$0xff] %v5966_v25  ;;  %v5415_v31 = vpop.eup %5414  ;;  %v5976_v32 = vmul.f32 %v5413_v26, %v5893_v24  ;;  %5434 = vpow2.f32 %v4861_v18  ;;  %v5980_v35 = vmul.f32 -1.442695, %v5966_v25 }
 0x118   : > { %10017 = vst [vmem:[#allocation7_spill] sm:$0xff] %v5969_v28  ;;  %v5417_v22 = vpop.eup %5416  ;;  %v939_v36 = vrot.slane %v5969_v28, 1  ;;  %v1004_v38 = vrot.slane %v5969_v28, 7  ;;  %v1205_v39 = vrot.slane %v5969_v28, 2  ;;  %v1270_v41 = vrot.slane %v5969_v28, 6 }
 0x119   : > { %10018 = vst [vmem:[#allocation8_spill] sm:$0xff] %v5976_v32  ;;  %v5419_v42 = vpop.eup %5418  ;;  %v938_v44 = vrot.slane %v5976_v32, 1  ;;  %v1003_v24 = vrot.slane %v5976_v32, 7  ;;  %v1204_v45 = vrot.slane %v5976_v32, 2  ;;  %v1269_v46 = vrot.slane %v5976_v32, 6  ;;  %v5181_v47 = vpop.f32.mrb[16].mxu0 }
 0x11a   : > { %v5421_v48 = vpop.eup %5420  ;;  %v5991_v49 = vmul.f32 %v5415_v31, %v5897_v27  ;;  %v5994_v50 = vmul.f32 %v5417_v22, %v5901_v30  ;;  %v5996_v51 = vadd.f32 1.0, %v5419_v42  ;;  %5436 = vpow2.f32 %v4859_v29  ;;  %v630_v52 = vpop.f32.mrb[17].mxu0 }
 0x11b   : > { %v5998_v54 = vpop.eup %5422  ;;  %v6000_v55 = vadd.f32 1.0, %v5421_v48  ;;  %5438 = vpow2.f32 %v4862_v33  ;;  %v6003_v56 = vadd.f32 %v5181_v47, %v5887_v20  ;;  %v6006_v58 = vadd.f32 %v5887_v20, %v630_v52  ;;  %v6008_v27 = vpop.f32.mrb[18].mxu0 }
 0x11c   : > { %10019 = vst [vmem:[#allocation9_spill] sm:$0xff] %v5991_v49  ;;  %10020 = vst [vmem:[#allocation10_spill] sm:$0xff] %v5994_v50  ;;  %v6010_v59 = vpop.eup %5424  ;;  %v955_v30 = vrot.slane %v5991_v49, 1  ;;  %v1020_v60 = vrot.slane %v5991_v49, 7  ;;  %v1221_v62 = vrot.slane %v5991_v49, 2  ;;  %v1286_v0 = vrot.slane %v5991_v49, 6 }
 0x11d   : > { %v6016_v2 = vpop.f32.mrb[19].mxu0  ;;  %v5427_v3 = vpop.eup %5426  ;;  %v954_v4 = vrot.slane %v5994_v50, 1  ;;  %v1019_v5 = vrot.slane %v5994_v50, 7  ;;  %v1220_v7 = vrot.slane %v5994_v50, 2  ;;  %v1285_v8 = vrot.slane %v5994_v50, 6 }
 0x11e   : > { %v5429_v9 = vpop.eup %5428  ;;  %v972_v10 = vsel %vm970_vm2, %v939_v36, %v955_v30  ;;  %v988_v12 = vsel %vm970_vm2, %v955_v30, %v939_v36  ;;  %v1037_v13 = vsel %vm1035_vm3, %v1004_v38, %v1020_v60  ;;  %v1053_v14 = vsel %vm1035_vm3, %v1020_v60, %v1004_v38 }
 0x11f   : > { %v5431_v16 = vpop.eup %5430  ;;  %v1075_v17 = vsel %vm931_vm5, %v988_v12, -inf  ;;  %v1106_v18 = vmax.f32 %v5969_v28, %v972_v10  ;;  %v1142_v21 = vsel %vm932_vm4, %v1053_v14, -inf  ;;  %v1238_v23 = vsel %vm1236_vm6, %v1205_v39, %v1221_v62 }
 0x120   : > { %v5433_v26 = vpop.eup %5432  ;;  %v1107_v29 = vmax.f32 %v5991_v49, %v1075_v17  ;;  %v1254_v31 = vsel %vm1236_vm6, %v1221_v62, %v1205_v39  ;;  %v1303_v33 = vsel %vm1301_vm9, %v1270_v41, %v1286_v0  ;;  %v1319_v22 = vsel %vm1301_vm9, %v1286_v0, %v1270_v41 }
 0x121   : > { %v6044_v36 = vpop.eup %5434  ;;  %v1174_v38 = vmax.f32 %v1106_v18, %v1142_v21  ;;  %v1341_v42 = vsel %vm935_vm7, %v1254_v31, -inf  ;;  %v1408_v47 = vsel %vm936_vm8, %v1319_v22, -inf  ;;  %v971_v48 = vsel %vm970_vm2, %v938_v44, %v954_v4  ;;  %v6052_v52 = vpop.f32.mrb[20].mxu0 }
 0x122   : > { %v1175_v39 = vmax.f32 %v1107_v29, %v1037_v13  ;;  %v987_v30 = vsel %vm970_vm2, %v954_v4, %v938_v44  ;;  %v1036_v41 = vsel %vm1035_vm3, %v1003_v24, %v1019_v5  ;;  %v1052_v60 = vsel %vm1035_vm3, %v1019_v5, %v1003_v24  ;;  %v6060_v62 = vpop.f32.mrb[21].mxu0 }
 0x123   : > { %v1372_v0 = vmax.f32 %v1174_v38, %v1238_v23  ;;  %v1073_v10 = vsel %vm931_vm5, %v987_v30, -inf  ;;  %v1104_v12 = vmax.f32 %v5976_v32, %v971_v48  ;;  %v1140_v13 = vsel %vm932_vm4, %v1052_v60, -inf  ;;  %v6067_v14 = vpop.f32.mrb[22].mxu0 }
 0x124   : > { %v6069_v44 = vpop.eup %5436  ;;  %v1373_v4 = vmax.f32 %v1175_v39, %v1341_v42  ;;  %v1105_v17 = vmax.f32 %v5994_v50, %v1073_v10  ;;  %v6074_v24 = vsel %vm1236_vm6, %v1204_v45, %v1220_v7  ;;  %v1253_v5 = vsel %vm1236_vm6, %v1220_v7, %v1204_v45  ;;  %v6078_v18 = vpop.f32.mrb[23].mxu0 }
 0x125   : > { %v6080_v21 = vpop.eup %5438  ;;  %v6082_v23 = vmax.f32 %v1372_v0, %v1408_v47  ;;  %v6084_v29 = vmax.f32 %v1104_v12, %v1140_v13  ;;  %v6090_v31 = vsel %vm1301_vm9, %v1269_v46, %v1285_v8  ;;  %v1318_v22 = vsel %vm1301_vm9, %v1285_v8, %v1269_v46 }
 0x126   : > { %v6096_v45 = vmax.f32 %v1373_v4, %v1303_v33  ;;  %v6098_v7 = vmax.f32 %v1105_v17, %v1036_v41  ;;  %v6102_v38 = vsel %vm935_vm7, %v1253_v5, -inf  ;;  %v6106_v42 = vsel %vm936_vm8, %v1318_v22, -inf }
 0x127   : > { %10021 = vst [vmem:[#allocation11_spill] sm:$0xff] %v6082_v23  ;;  %1473 = vst.msk [vmem:[#allocation2 + $0x30] sm:$0xff] %vm917_vm1, %v6082_v23  ;;  %v6113_v46 = vmul.f32 %v5427_v3, %v5906_v34  ;;  %v6116_v8 = vmul.f32 %v5429_v9, %v5917_v37  ;;  %v6119_v33 = vmul.f32 %v5431_v16, %v5921_v40  ;;  %5440 = vrcp.f32 %v5996_v51 }
 0x128   : > { %10022 = vst [vmem:[#allocation12_spill] sm:$0xff] %v6096_v45  ;;  %1474 = vst.msk [vmem:[#allocation2 + $0x38] sm:$0xff] %vm917_vm1, %v6096_v45  ;;  %v6126_v39 = vmul.f32 %v5433_v26, %v5925_v43  ;;  %v6130_v34 = vadd.f32 1.0, %v5998_v54  ;;  %5442 = vrcp.f32 %v6000_v55 }
 0x129   : > { %10023 = vst [vmem:[#allocation13_spill] sm:$0xff] %v6113_v46  ;;  %10024 = vst [vmem:[#allocation14_spill] sm:$0xff] %v6116_v8  ;;  %v941_v37 = vrot.slane %v6113_v46, 1  ;;  %v1006_v3 = vrot.slane %v6113_v46, 7  ;;  %v1207_v40 = vrot.slane %v6113_v46, 2  ;;  %v1272_v9 = vrot.slane %v6113_v46, 6 }
 0x12a   : > { %10025 = vst [vmem:[#allocation15_spill] sm:$0xff] %v6119_v33  ;;  %10026 = vst [vmem:[#allocation16_spill] sm:$0xff] %v6126_v39  ;;  %v6136_v16 = vpop.f32.mrb[24].mxu0  ;;  %v940_v30 = vrot.slane %v6116_v8, 1  ;;  %v1005_v43 = vrot.slane %v6116_v8, 7  ;;  %v1206_v26 = vrot.slane %v6116_v8, 2  ;;  %5444 = vrcp.f32 %v6130_v34 }
 0x12b   : > { %v1271_v51 = vrot.slane %v6116_v8, 6  ;;  %v6142_v54 = vpop.f32.mrb[25].mxu0  ;;  %v957_v41 = vrot.slane %v6119_v33, 1  ;;  %v1022_v60 = vrot.slane %v6119_v33, 7  ;;  %v1223_v0 = vrot.slane %v6119_v33, 2 }
 0x12c   : > { %v1288_v10 = vrot.slane %v6119_v33, 6  ;;  %v6148_v12 = vpop.f32.mrb[26].mxu0  ;;  %v956_v13 = vrot.slane %v6126_v39, 1  ;;  %v1021_v4 = vrot.slane %v6126_v39, 7  ;;  %v1222_v17 = vrot.slane %v6126_v39, 2 }
 0x12d   : > { %v1287_v5 = vrot.slane %v6126_v39, 6  ;;  %v6154_v22 = vpop.f32.mrb[27].mxu0  ;;  %v974_v48 = vsel %vm970_vm2, %v941_v37, %v957_v41  ;;  %v990_v47 = vsel %vm970_vm2, %v957_v41, %v941_v37  ;;  %v1039_v49 = vsel %vm1035_vm3, %v1006_v3, %v1022_v60 }
 0x12e   : > { %v1055_v28 = vsel %vm1035_vm3, %v1022_v60, %v1006_v3  ;;  %v1079_v50 = vsel %vm931_vm5, %v990_v47, -inf  ;;  %v1110_v32 = vmax.f32 %v6113_v46, %v974_v48  ;;  %v1240_v45 = vsel %vm1236_vm6, %v1207_v40, %v1223_v0 }
 0x12f   : > { %v1146_v25 = vsel %vm932_vm4, %v1055_v28, -inf  ;;  %v1111_v23 = vmax.f32 %v6119_v33, %v1079_v50  ;;  %v1256_v37 = vsel %vm1236_vm6, %v1223_v0, %v1207_v40  ;;  %v1305_v41 = vsel %vm1301_vm9, %v1272_v9, %v1288_v10 }
 0x130   : > { %v1321_v3 = vsel %vm1301_vm9, %v1288_v10, %v1272_v9  ;;  %v1178_v47 = vmax.f32 %v1110_v32, %v1146_v25  ;;  %v1345_v48 = vsel %vm935_vm7, %v1256_v37, -inf  ;;  %v973_v60 = vsel %vm970_vm2, %v940_v30, %v956_v13 }
 0x131   : > { %v1412_v28 = vsel %vm936_vm8, %v1321_v3, -inf  ;;  %v1179_v50 = vmax.f32 %v1111_v23, %v1039_v49  ;;  %v989_v40 = vsel %vm970_vm2, %v956_v13, %v940_v30  ;;  %v1038_v0 = vsel %vm1035_vm3, %v1005_v43, %v1021_v4  ;;  %v6190_v25 = vpop.f32.mrb[28].mxu0  ;;  %v5441_v32 = vpop.eup %5440 }
 0x132   : > { %v1054_v9 = vsel %vm1035_vm3, %v1021_v4, %v1005_v43  ;;  %v1376_v10 = vmax.f32 %v1178_v47, %v1240_v45  ;;  %v1077_v37 = vsel %vm931_vm5, %v989_v40, -inf  ;;  %v1108_v3 = vmax.f32 %v6116_v8, %v973_v60  ;;  %v6197_v23 = vpop.f32.mrb[29].mxu0 }
 0x133   : > { %v1144_v49 = vsel %vm932_vm4, %v1054_v9, -inf  ;;  %v1377_v30 = vmax.f32 %v1179_v50, %v1345_v48  ;;  %v1109_v13 = vmax.f32 %v6126_v39, %v1077_v37  ;;  %v1239_v43 = vsel %vm1236_vm6, %v1206_v26, %v1222_v17  ;;  %v6204_v45 = vpop.f32.mrb[30].mxu0 }
 0x134   : > { %v1255_v4 = vsel %vm1236_vm6, %v1222_v17, %v1206_v26  ;;  %v6206_v47 = vmax.f32 %v1376_v10, %v1412_v28  ;;  %v1176_v40 = vmax.f32 %v1108_v3, %v1144_v49  ;;  %v1304_v60 = vsel %vm1301_vm9, %v1271_v51, %v1287_v5  ;;  %v6212_v48 = vpop.f32.mrb[31].mxu0 }
 0x135   : > { %v1320_v9 = vsel %vm1301_vm9, %v1287_v5, %v1271_v51  ;;  %v6214_v50 = vmax.f32 %v1377_v30, %v1305_v41  ;;  %v1177_v37 = vmax.f32 %v1109_v13, %v1038_v0  ;;  %v1343_v33 = vsel %vm935_vm7, %v1255_v4, -inf }
 0x136   : > { %v1410_v26 = vsel %vm936_vm8, %v1320_v9, -inf  ;;  %1477 = vst.msk [vmem:[#allocation2 + $0x50] sm:$0xff] %vm917_vm1, %v6206_v47  ;;  %v1374_v17 = vmax.f32 %v1176_v40, %v1239_v43  ;;  %v6223_v28 = vmul.f32 %v5441_v32, %v5930_v53  ;;  %v798_v51 = vadd.f32 1.0, %v6010_v59  ;;  %v5443_v9 = vpop.eup %5442 }
 0x137   : > { %1478 = vst.msk [vmem:[#allocation2 + $0x58] sm:$0xff] %vm917_vm1, %v6214_v50  ;;  %v1375_v5 = vmax.f32 %v1177_v37, %v1343_v33  ;;  %v803_v41 = vadd.f32 1.0, %v6044_v36  ;;  %v801_v0 = vadd.f32 1.0, %v6069_v44  ;;  %v804_v33 = vadd.f32 1.0, %v6080_v21 }
 0x138   : > { %10027 = vst [vmem:[#allocation17_spill] sm:$0xff] %v6223_v28  ;;  %v6232_v10 = vmax.f32 %v1374_v17, %v1410_v26  ;;  %v943_v3 = vrot.slane %v6223_v28, 1  ;;  %5446 = vrcp.f32 %v798_v51  ;;  %v4865_v36 = vmul.f32 -1.442695, %v6003_v56  ;;  %v5445_v26 = vpop.eup %5444 }
 0x139   : > { %v6237_v32 = vmax.f32 %v1375_v5, %v1304_v60  ;;  %5448 = vrcp.f32 %v803_v41  ;;  %v4863_v44 = vmul.f32 -1.442695, %v6006_v58  ;;  %v6247_v34 = vadd.f32 %v6008_v27, %v5887_v20 }
 0x13a   : > { %1475 = vst.msk [vmem:[#allocation2 + $0x40] sm:$0xff] %vm917_vm1, %v6232_v10  ;;  %5450 = vrcp.f32 %v801_v0  ;;  %v6253_v49 = vadd.f32 %v5887_v20, %v6016_v2  ;;  %v6257_v21 = vadd.f32 %v6052_v52, %v5887_v20  ;;  %v6261_v30 = vadd.f32 %v5887_v20, %v6060_v62 }
 0x13b   : > { %1476 = vst.msk [vmem:[#allocation2 + $0x48] sm:$0xff] %vm917_vm1, %v6237_v32  ;;  %5452 = vrcp.f32 %v804_v33  ;;  %v4866_v27 = vmul.f32 -1.442695, %v6247_v34  ;;  %v6266_v13 = vadd.f32 %v6067_v14, %v5887_v20  ;;  %v6270_v43 = vadd.f32 %v5887_v20, %v6078_v18 }
 0x13c   : > { %5454 = vpow2.f32 %v5980_v35  ;;  %v4864_v2 = vmul.f32 -1.442695, %v6253_v49  ;;  %v4869_v52 = vmul.f32 -1.442695, %v6257_v21  ;;  %v4867_v62 = vmul.f32 -1.442695, %v6261_v30 }
 0x13d   : > { %10028 = vst [vmem:[#allocation18_spill] sm:$0xff] %v6266_v13  ;;  %10029 = vst [vmem:[#allocation19_spill] sm:$0xff] %v6270_v43  ;;  %5456 = vpow2.f32 %v4865_v36  ;;  %v6277_v4 = vmul.f32 -1.442695, %v6266_v13  ;;  %v6280_v40 = vmul.f32 -1.442695, %v6270_v43  ;;  %v6284_v14 = vadd.f32 %v6136_v16, %v5887_v20 }
 0x13e   : > { %5458 = vpow2.f32 %v4863_v44  ;;  %v6288_v35 = vadd.f32 %v5887_v20, %v6142_v54  ;;  %v6292_v18 = vadd.f32 %v6148_v12, %v5887_v20  ;;  %v6296_v60 = vadd.f32 %v5887_v20, %v6154_v22 }
 0x13f   : > { %10030 = vst [vmem:[#allocation20_spill] sm:$0xff] %v6284_v14  ;;  %5460 = vpow2.f32 %v4866_v27  ;;  %v6299_v37 = vmul.f32 -1.442695, %v6284_v14  ;;  %v6303_v16 = vadd.f32 %v6190_v25, %v5887_v20  ;;  %v6307_v54 = vadd.f32 %v5887_v20, %v6197_v23 }
 0x140   : > { %10031 = vst [vmem:[#allocation21_spill] sm:$0xff] %v6288_v35  ;;  %10032 = vst [vmem:[#allocation22_spill] sm:$0xff] %v6292_v18  ;;  %v6310_v12 = vmul.f32 %v5443_v9, %v5933_v57  ;;  %5462 = vpow2.f32 %v4864_v2  ;;  %v6313_v22 = vmul.f32 -1.442695, %v6288_v35  ;;  %v6316_v17 = vmul.f32 -1.442695, %v6292_v18 }
 0x141   : > { %10033 = vst [vmem:[#allocation23_spill] sm:$0xff] %v6296_v60  ;;  %10034 = vst [vmem:[#allocation24_spill] sm:$0xff] %v6303_v16  ;;  %v6319_v51 = vmul.f32 %v5445_v26, %v5937_v61  ;;  %5464 = vpow2.f32 %v4869_v52  ;;  %v6322_v25 = vmul.f32 -1.442695, %v6296_v60  ;;  %v6325_v23 = vmul.f32 -1.442695, %v6303_v16 }
 0x142   : > { %10035 = vst [vmem:[#allocation25_spill] sm:$0xff] %v6307_v54  ;;  %10036 = vst [vmem:[#allocation26_spill] sm:$0xff] %v6310_v12  ;;  %v5447_v5 = vpop.eup %5446  ;;  %v942_v57 = vrot.slane %v6310_v12, 1  ;;  %v1007_v41 = vrot.slane %v6310_v12, 7  ;;  %v1208_v0 = vrot.slane %v6310_v12, 2  ;;  %v1273_v33 = vrot.slane %v6310_v12, 6 }
 0x143   : > { %10037 = vst [vmem:[#allocation27_spill] sm:$0xff] %v6319_v51  ;;  %v5449_v36 = vpop.eup %5448  ;;  %v959_v61 = vrot.slane %v6319_v51, 1  ;;  %v1024_v44 = vrot.slane %v6319_v51, 7  ;;  %v1225_v27 = vrot.slane %v6319_v51, 2  ;;  %v1290_v2 = vrot.slane %v6319_v51, 6 }
 0x144   : > { %v5451_v52 = vpop.eup %5450  ;;  %v6336_v9 = vmul.f32 %v5447_v5, %v5943_v1  ;;  %v6339_v26 = vmul.f32 %v5449_v36, %v5951_v11  ;;  %5466 = vpow2.f32 %v4867_v62  ;;  %v6342_v59 = vmul.f32 -1.442695, %v6307_v54 }
 0x145   : > { %v5453_v55 = vpop.eup %5452  ;;  %v976_v53 = vsel %vm970_vm2, %v943_v3, %v959_v61  ;;  %v992_v46 = vsel %vm970_vm2, %v959_v61, %v943_v3  ;;  %v10041_v1 = vrot.slane %v6223_v28, 7  ;;  %v10043_v3 = vrot.slane %v6223_v28, 2 }
 0x146   : > { %10038 = vst [vmem:[#allocation28_spill] sm:$0xff] %v6336_v9  ;;  %10039 = vst [vmem:[#allocation29_spill] sm:$0xff] %v6339_v26  ;;  %v5455_v36 = vpop.eup %5454  ;;  %v1083_v39 = vsel %vm931_vm5, %v992_v46, -inf  ;;  %v1114_v8 = vmax.f32 %v6223_v28, %v976_v53  ;;  %v10045_v46 = vrot.slane %v6223_v28, 6  ;;  %v1023_v14 = vrot.slane %v6336_v9, 7 }
 0x147   : > { %10040 = vst [vmem:[#allocation30_spill] sm:$0xff] %v6342_v59  ;;  %v1041_v11 = vsel %vm1035_vm3, %v10041_v1, %v1024_v44  ;;  %v10042_v62 = vmov %v10041_v1  ;;  %v1242_v61 = vsel %vm1236_vm6, %v10043_v3, %v1225_v27  ;;  %v5457_v1 = vpop.eup %5456  ;;  %v1115_v16 = vmax.f32 %v6319_v51, %v1083_v39 }
 0x148   : > { %v1057_v5 = vsel %vm1035_vm3, %v1024_v44, %v10042_v62  ;;  %v10044_v60 = vmov %v10043_v3  ;;  %v1307_v53 = vsel %vm1301_vm9, %v10045_v46, %v1290_v2  ;;  %v10046_v62 = vmov %v10045_v46  ;;  %v5459_v18 = vpop.eup %5458 }
 0x149   : > { %v1150_v54 = vsel %vm932_vm4, %v1057_v5, -inf  ;;  %v1258_v44 = vsel %vm1236_vm6, %v1225_v27, %v10044_v60  ;;  %v1323_v5 = vsel %vm1301_vm9, %v1290_v2, %v10046_v62  ;;  %v958_v60 = vrot.slane %v6336_v9, 1  ;;  %v5461_v27 = vpop.eup %5460 }
 0x14a   : > { %v1182_v3 = vmax.f32 %v1114_v8, %v1150_v54  ;;  %v1349_v39 = vsel %vm935_vm7, %v1258_v44, -inf  ;;  %v1416_v51 = vsel %vm936_vm8, %v1323_v5, -inf  ;;  %v1183_v35 = vmax.f32 %v1115_v16, %v1041_v11  ;;  %v5463_v43 = vpop.eup %5462 }
 0x14b   : > { %v1224_v46 = vrot.slane %v6336_v9, 2  ;;  %v1289_v28 = vrot.slane %v6336_v9, 6  ;;  %v975_v8 = vsel %vm970_vm2, %v942_v57, %v958_v60  ;;  %v991_v54 = vsel %vm970_vm2, %v958_v60, %v942_v57  ;;  %v6395_v62 = vpop.eup %5464 }
 0x14c   : > { %v1380_v2 = vmax.f32 %v1182_v3, %v1242_v61  ;;  %v945_v44 = vrot.slane %v6339_v26, 1  ;;  %v1381_v5 = vmax.f32 %v1183_v35, %v1349_v39  ;;  %v1040_v16 = vsel %vm1035_vm3, %v1007_v41, %v1023_v14 }
 0x14d   : > { %v1056_v11 = vsel %vm1035_vm3, %v1023_v14, %v1007_v41  ;;  %v1081_v61 = vsel %vm931_vm5, %v991_v54, -inf  ;;  %v1112_v13 = vmax.f32 %v6310_v12, %v975_v8  ;;  %v1241_v35 = vsel %vm1236_vm6, %v1208_v0, %v1224_v46 }
 0x14e   : > { %v6403_v3 = vmax.f32 %v1380_v2, %v1416_v51  ;;  %v1113_v57 = vmax.f32 %v6336_v9, %v1081_v61  ;;  %v1148_v60 = vsel %vm932_vm4, %v1056_v11, -inf  ;;  %v6409_v59 = vmax.f32 %v1381_v5, %v1307_v53  ;;  %v5467_v51 = vpop.eup %5466 }
 0x14f   : > { %v1257_v14 = vsel %vm1236_vm6, %v1224_v46, %v1208_v0  ;;  %v1306_v41 = vsel %vm1301_vm9, %v1273_v33, %v1289_v28  ;;  %v1180_v39 = vmax.f32 %v1112_v13, %v1148_v60  ;;  %v1322_v8 = vsel %vm1301_vm9, %v1289_v28, %v1273_v33 }
 0x150   : > { %1481 = vst.msk [vmem:[#allocation2 + $0x70] sm:$0xff] %vm917_vm1, %v6403_v3  ;;  %v1181_v2 = vmax.f32 %v1113_v57, %v1040_v16  ;;  %v1347_v53 = vsel %vm935_vm7, %v1257_v14, -inf  ;;  %1482 = vst.msk [vmem:[#allocation2 + $0x78] sm:$0xff] %vm917_vm1, %v6409_v59  ;;  %v1414_v0 = vsel %vm936_vm8, %v1322_v8, -inf  ;;  %v1010_v46 = vrot.slane %v6339_v26, 7 }
 0x151   : > { %v1211_v54 = vrot.slane %v6339_v26, 2  ;;  %v1276_v5 = vrot.slane %v6339_v26, 6  ;;  %v1378_v13 = vmax.f32 %v1180_v39, %v1241_v35  ;;  %v6431_v11 = vmul.f32 %v5451_v52, %v5956_v15 }
 0x152   : > { %v1379_v16 = vmax.f32 %v1181_v2, %v1347_v53  ;;  %v6434_v28 = vmul.f32 %v5453_v55, %v5961_v19  ;;  %v802_v33 = vadd.f32 1.0, %v5455_v36  ;;  %v807_v61 = vadd.f32 1.0, %v5457_v1 }
 0x153   : > { %10047 = vst [vmem:[#allocation31_spill] sm:$0xff] %v6431_v11  ;;  %v805_v57 = vadd.f32 1.0, %v5459_v18  ;;  %v808_v60 = vadd.f32 1.0, %v5461_v27  ;;  %v6436_v14 = vmax.f32 %v1378_v13, %v1414_v0  ;;  %v944_v9 = vrot.slane %v6431_v11, 1 }
 0x154   : > { %10048 = vst [vmem:[#allocation32_spill] sm:$0xff] %v6434_v28  ;;  %v6438_v8 = vmax.f32 %v1379_v16, %v1306_v41  ;;  %v1009_v12 = vrot.slane %v6431_v11, 7  ;;  %v1210_v35 = vrot.slane %v6431_v11, 2  ;;  %v1275_v15 = vrot.slane %v6431_v11, 6 }
 0x155   : > { %v961_v52 = vrot.slane %v6434_v28, 1  ;;  %v1026_v19 = vrot.slane %v6434_v28, 7  ;;  %1479 = vst.msk [vmem:[#allocation2 + $0x60] sm:$0xff] %vm917_vm1, %v6436_v14  ;;  %v1227_v55 = vrot.slane %v6434_v28, 2  ;;  %v1292_v18 = vrot.slane %v6434_v28, 6 }
 0x156   : > { %1480 = vst.msk [vmem:[#allocation2 + $0x68] sm:$0xff] %vm917_vm1, %v6438_v8  ;;  %5468 = vrcp.f32 %v802_v33  ;;  %v806_v36 = vadd.f32 1.0, %v5463_v43 }
 0x157   : > { %v978_v1 = vsel %vm970_vm2, %v945_v44, %v961_v52  ;;  %v994_v27 = vsel %vm970_vm2, %v961_v52, %v945_v44  ;;  %v1043_v41 = vsel %vm1035_vm3, %v1010_v46, %v1026_v19  ;;  %v1059_v39 = vsel %vm1035_vm3, %v1026_v19, %v1010_v46 }
 0x158   : > { %v1087_v2 = vsel %vm931_vm5, %v994_v27, -inf  ;;  %v1118_v53 = vmax.f32 %v6339_v26, %v978_v1  ;;  %v1154_v43 = vsel %vm932_vm4, %v1059_v39, -inf  ;;  %v1244_v0 = vsel %vm1236_vm6, %v1211_v54, %v1227_v55 }
 0x159   : > { %v1119_v13 = vmax.f32 %v6434_v28, %v1087_v2  ;;  %v1260_v44 = vsel %vm1236_vm6, %v1227_v55, %v1211_v54  ;;  %v1309_v16 = vsel %vm1301_vm9, %v1276_v5, %v1292_v18  ;;  %v1325_v46 = vsel %vm1301_vm9, %v1292_v18, %v1276_v5  ;;  %v1503_v18 = vld [vmem:[#allocation2] sm:$0xff]  ;;  %v1504_v2 = vld [vmem:[#allocation2 + $0x8] sm:$0xff] }
 0x15a   : > { %v1186_v33 = vmax.f32 %v1118_v53, %v1154_v43  ;;  %v1353_v52 = vsel %vm935_vm7, %v1260_v44, -inf  ;;  %v1420_v19 = vsel %vm936_vm8, %v1325_v46, -inf  ;;  %5470 = vrcp.f32 %v807_v61  ;;  %v10052_v43 = vld [vmem:[#allocation11_spill] sm:$0xff]  ;;  %v10054_v46 = vld [vmem:[#allocation6_spill] sm:$0xff] }
 0x15b   : > { %v1187_v1 = vmax.f32 %v1119_v13, %v1043_v41  ;;  %5472 = vrcp.f32 %v805_v57  ;;  %v811_v27 = vadd.f32 1.0, %v6395_v62  ;;  %v809_v39 = vadd.f32 1.0, %v5467_v51  ;;  %v6491_v51 = vld [vmem:[#allocation2 + $0x10] sm:$0xff]  ;;  %v6511_v41 = vld [vmem:[#allocation2 + $0x40] sm:$0xff] }
 0x15c   : > { %v1384_v54 = vmax.f32 %v1186_v33, %v1244_v0  ;;  %5474 = vrcp.f32 %v808_v60  ;;  %v6481_v55 = vadd.f32 %v6204_v45, %v5887_v20  ;;  %v6485_v5 = vadd.f32 %v5887_v20, %v6212_v48  ;;  %v6493_v57 = vld [vmem:[#allocation2 + $0x30] sm:$0xff]  ;;  %v6499_v20 = vld [vmem:[#allocation2 + $0x18] sm:$0xff] }
 0x15d   : > { %v1385_v53 = vmax.f32 %v1187_v1, %v1353_v52  ;;  %5476 = vrcp.f32 %v806_v36  ;;  %v10049_v61 = vmax.f32 %v6084_v29, %v6074_v24  ;;  %v10050_v45 = vmax.f32 %v6098_v7, %v6102_v38  ;;  %v6515_v7 = vld [vmem:[#allocation2 + $0x38] sm:$0xff]  ;;  %v10053_v13 = vld [vmem:[#allocation12_spill] sm:$0xff] }
 0x15e   : > { %v6501_v48 = vmax.f32 %v1384_v54, %v1420_v19  ;;  %5478 = vrcp.f32 %v811_v27  ;;  %v6504_v36 = vmul.f32 -1.442695, %v6481_v55  ;;  %v6507_v24 = vmul.f32 -1.442695, %v6485_v5  ;;  %v6538_v19 = vld [vmem:[#allocation2 + $0x60] sm:$0xff] }
 0x15f   : > { %v1438_v62 = vmax.f32 %v10049_v61, %v6106_v42  ;;  %v1439_v60 = vmax.f32 %v10050_v45, %v6090_v31  ;;  %v6509_v29 = vmax.f32 %v1385_v53, %v1309_v16  ;;  %5480 = vrcp.f32 %v809_v39 }
 0x160   : > { %v5469_v38 = vpop.eup %5468  ;;  %1485 = vst.msk [vmem:[#allocation2 + $0x90] sm:$0xff] %vm917_vm1, %v6501_v48  ;;  %5482 = vpow2.f32 %v6277_v4  ;;  %v1541_v16 = vmax.f32 %v6206_v47, %v6493_v57 }
 0x161   : > { %10051 = vst [vmem:[#allocation33_spill] sm:$0xff] %v6509_v29  ;;  %v1535_v42 = vmax.f32 %v1438_v62, %v1503_v18  ;;  %1471 = vst.msk [vmem:[#allocation2 + $0x20] sm:$0xff] %vm917_vm1, %v1438_v62  ;;  %v1536_v31 = vmax.f32 %v1439_v60, %v1504_v2  ;;  %v6529_v33 = vmul.f32 %v5469_v38, %v10054_v46  ;;  %5484 = vpow2.f32 %v6280_v40 }
 0x162   : > { %1472 = vst.msk [vmem:[#allocation2 + $0x28] sm:$0xff] %vm917_vm1, %v1439_v60  ;;  %1486 = vst.msk [vmem:[#allocation2 + $0x98] sm:$0xff] %vm917_vm1, %v6509_v29  ;;  %5486 = vpow2.f32 %v6299_v37  ;;  %v6542_v47 = vmax.f32 %v1541_v16, %v6511_v41 }
 0x163   : > { %10055 = vst [vmem:[#allocation11_spill] sm:$0xff] %v6529_v33  ;;  %v6533_v52 = vmax.f32 %v1535_v42, %v6491_v51  ;;  %v6536_v4 = vmax.f32 %v1536_v31, %v6499_v20  ;;  %v960_v40 = vrot.slane %v6529_v33, 1  ;;  %v1025_v39 = vrot.slane %v6529_v33, 7 }
 0x164   : > { %v1226_v54 = vrot.slane %v6529_v33, 2  ;;  %v1291_v18 = vrot.slane %v6529_v33, 6  ;;  %v5471_v2 = vpop.eup %5470  ;;  %5488 = vpow2.f32 %v6313_v22 }
 0x165   : > { %v5473_v62 = vpop.eup %5472  ;;  %v977_v45 = vsel %vm970_vm2, %v944_v9, %v960_v40  ;;  %v993_v22 = vsel %vm970_vm2, %v960_v40, %v944_v9  ;;  %v1042_v60 = vsel %vm1035_vm3, %v1009_v12, %v1025_v39  ;;  %v1058_v42 = vsel %vm1035_vm3, %v1025_v39, %v1009_v12 }
 0x166   : > { %v5475_v31 = vpop.eup %5474  ;;  %v1085_v38 = vsel %vm931_vm5, %v993_v22, -inf  ;;  %v1116_v16 = vmax.f32 %v6431_v11, %v977_v45  ;;  %v1152_v46 = vsel %vm932_vm4, %v1058_v42, -inf  ;;  %v1243_v9 = vsel %vm1236_vm6, %v1210_v35, %v1226_v54 }
 0x167   : > { %v5477_v40 = vpop.eup %5476  ;;  %v1117_v27 = vmax.f32 %v6529_v33, %v1085_v38  ;;  %v1259_v12 = vsel %vm1236_vm6, %v1226_v54, %v1210_v35  ;;  %v1308_v39 = vsel %vm1301_vm9, %v1275_v15, %v1291_v18  ;;  %v1324_v45 = vsel %vm1301_vm9, %v1291_v18, %v1275_v15 }
 0x168   : > { %v6597_v22 = vpop.eup %5478  ;;  %v1184_v42 = vmax.f32 %v1116_v16, %v1152_v46  ;;  %v1351_v38 = vsel %vm935_vm7, %v1259_v12, -inf  ;;  %v1418_v1 = vsel %vm936_vm8, %v1324_v45, -inf  ;;  %v6604_v35 = vmul.f32 %v5471_v2, %v6003_v56 }
 0x169   : > { %v5481_v54 = vpop.eup %5480  ;;  %v1185_v61 = vmax.f32 %v1117_v27, %v1042_v60  ;;  %v6607_v44 = vmul.f32 %v5473_v62, %v6006_v58  ;;  %v6610_v0 = vmul.f32 %v5475_v31, %v6247_v34  ;;  %v6613_v15 = vmul.f32 %v5477_v40, %v6253_v49 }
 0x16a   : > { %10056 = vst [vmem:[#allocation12_spill] sm:$0xff] %v6604_v35  ;;  %v6615_v18 = vpop.eup %5482  ;;  %v1382_v16 = vmax.f32 %v1184_v42, %v1243_v9  ;;  %v947_v46 = vrot.slane %v6604_v35, 1  ;;  %v1012_v12 = vrot.slane %v6604_v35, 7  ;;  %v1213_v56 = vrot.slane %v6604_v35, 2 }
 0x16b   : > { %10057 = vst [vmem:[#allocation6_spill] sm:$0xff] %v6607_v44  ;;  %10058 = vst [vmem:[#allocation34_spill] sm:$0xff] %v6610_v0  ;;  %v6620_v2 = vpop.eup %5484  ;;  %v1383_v27 = vmax.f32 %v1185_v61, %v1351_v38  ;;  %v1278_v58 = vrot.slane %v6604_v35, 6  ;;  %v946_v34 = vrot.slane %v6607_v44, 1  ;;  %v1011_v62 = vrot.slane %v6607_v44, 7 }
 0x16c   : > { %10059 = vst [vmem:[#allocation35_spill] sm:$0xff] %v6613_v15  ;;  %v6625_v49 = vpop.eup %5486  ;;  %v6627_v60 = vmax.f32 %v1382_v16, %v1418_v1  ;;  %v1212_v31 = vrot.slane %v6607_v44, 2  ;;  %v1277_v9 = vrot.slane %v6607_v44, 6  ;;  %v963_v40 = vrot.slane %v6610_v0, 1 }
 0x16d   : > { %v6632_v45 = vmax.f32 %v1383_v27, %v1308_v39  ;;  %v1028_v61 = vrot.slane %v6610_v0, 7  ;;  %v1229_v42 = vrot.slane %v6610_v0, 2  ;;  %v1294_v38 = vrot.slane %v6610_v0, 6 }
 0x16e   : > { %v6637_v53 = vpop.eup %5488  ;;  %1483 = vst.msk [vmem:[#allocation2 + $0x80] sm:$0xff] %vm917_vm1, %v6627_v60  ;;  %v980_v1 = vsel %vm970_vm2, %v947_v46, %v963_v40  ;;  %v996_v16 = vsel %vm970_vm2, %v963_v40, %v947_v46  ;;  %v962_v39 = vrot.slane %v6613_v15, 1  ;;  %v1027_v27 = vrot.slane %v6613_v15, 7 }
 0x16f   : > { %10060 = vst [vmem:[#allocation36_spill] sm:$0xff] %v6632_v45  ;;  %1484 = vst.msk [vmem:[#allocation2 + $0x88] sm:$0xff] %vm917_vm1, %v6632_v45  ;;  %v1045_v37 = vsel %vm1035_vm3, %v1012_v12, %v1028_v61  ;;  %v1061_v28 = vsel %vm1035_vm3, %v1028_v61, %v1012_v12  ;;  %v1091_v26 = vsel %vm931_vm5, %v996_v16, -inf  ;;  %v1122_v33 = vmax.f32 %v6604_v35, %v980_v1 }
 0x170   : > { %v1123_v46 = vmax.f32 %v6610_v0, %v1091_v26  ;;  %v1158_v40 = vsel %vm932_vm4, %v1061_v28, -inf  ;;  %v1246_v11 = vsel %vm1236_vm6, %v1213_v56, %v1229_v42  ;;  %v1262_v29 = vsel %vm1236_vm6, %v1229_v42, %v1213_v56 }
 0x171   : > { %v1190_v45 = vmax.f32 %v1122_v33, %v1158_v40  ;;  %v1311_v12 = vsel %vm1301_vm9, %v1278_v58, %v1294_v38  ;;  %v1327_v61 = vsel %vm1301_vm9, %v1294_v38, %v1278_v58  ;;  %v1357_v1 = vsel %vm935_vm7, %v1262_v29, -inf }
 0x172   : > { %v1191_v26 = vmax.f32 %v1123_v46, %v1045_v37  ;;  %v1424_v28 = vsel %vm936_vm8, %v1327_v61, -inf  ;;  %v979_v16 = vsel %vm970_vm2, %v946_v34, %v962_v39  ;;  %v995_v56 = vsel %vm970_vm2, %v962_v39, %v946_v34 }
 0x173   : > { %v1388_v33 = vmax.f32 %v1190_v45, %v1246_v11  ;;  %v1044_v42 = vsel %vm1035_vm3, %v1011_v62, %v1027_v27  ;;  %v1060_v58 = vsel %vm1035_vm3, %v1027_v27, %v1011_v62  ;;  %v1089_v29 = vsel %vm931_vm5, %v995_v56, -inf }
 0x174   : > { %v1389_v37 = vmax.f32 %v1191_v26, %v1357_v1  ;;  %v1120_v38 = vmax.f32 %v6607_v44, %v979_v16  ;;  %v1121_v46 = vmax.f32 %v6613_v15, %v1089_v29  ;;  %v1156_v40 = vsel %vm932_vm4, %v1060_v58, -inf }
 0x175   : > { %v6685_v61 = vmax.f32 %v1388_v33, %v1424_v28  ;;  %v1228_v11 = vrot.slane %v6613_v15, 2  ;;  %v1293_v34 = vrot.slane %v6613_v15, 6  ;;  %v6691_v62 = vmul.f32 %v6597_v22, %v6257_v21 }
 0x176   : > { %v6693_v45 = vmax.f32 %v1389_v37, %v1311_v12  ;;  %v1188_v39 = vmax.f32 %v1120_v38, %v1156_v40  ;;  %v1189_v27 = vmax.f32 %v1121_v46, %v1044_v42  ;;  %v6696_v1 = vmul.f32 %v5481_v54, %v6261_v30  ;;  %v6723_v38 = vld [vmem:[#allocation2 + $0x48] sm:$0xff]  ;;  %v1570_v46 = vld [vmem:[#allocation2 + $0x20] sm:$0xff] }
 0x177   : > { %10061 = vst [vmem:[#allocation37_spill] sm:$0xff] %v6685_v61  ;;  %10062 = vst [vmem:[#allocation38_spill] sm:$0xff] %v6691_v62  ;;  %v1245_v26 = vsel %vm1236_vm6, %v1212_v31, %v1228_v11  ;;  %v1261_v28 = vsel %vm1236_vm6, %v1228_v11, %v1212_v31  ;;  %v1310_v21 = vsel %vm1301_vm9, %v1277_v9, %v1293_v34  ;;  %v949_v16 = vrot.slane %v6691_v62, 1 }
 0x178   : > { %10063 = vst [vmem:[#allocation39_spill] sm:$0xff] %v6696_v1  ;;  %1489 = vst.msk [vmem:[#allocation2 + $0xb0] sm:$0xff] %vm917_vm1, %v6685_v61  ;;  %v1326_v22 = vsel %vm1301_vm9, %v1293_v34, %v1277_v9  ;;  %v1355_v30 = vsel %vm935_vm7, %v1261_v28, -inf  ;;  %v1386_v54 = vmax.f32 %v1188_v39, %v1245_v26  ;;  %v1014_v31 = vrot.slane %v6691_v62, 7 }
 0x179   : > { %1490 = vst.msk [vmem:[#allocation2 + $0xb8] sm:$0xff] %vm917_vm1, %v6693_v45  ;;  %v1422_v12 = vsel %vm936_vm8, %v1326_v22, -inf  ;;  %v1387_v56 = vmax.f32 %v1189_v27, %v1355_v30  ;;  %v1215_v33 = vrot.slane %v6691_v62, 2  ;;  %v812_v34 = vadd.f32 1.0, %v6615_v18  ;;  %v6730_v27 = vld [vmem:[#allocation2 + $0x28] sm:$0xff] }
 0x17a   : > { %v6718_v9 = vmax.f32 %v1386_v54, %v1422_v12  ;;  %v810_v39 = vadd.f32 1.0, %v6620_v2  ;;  %v815_v26 = vadd.f32 1.0, %v6625_v49  ;;  %v813_v28 = vadd.f32 1.0, %v6637_v53  ;;  %v6766_v12 = vld [vmem:[#allocation2 + $0x50] sm:$0xff] }
 0x17b   : > { %v6725_v40 = vmax.f32 %v1387_v56, %v1310_v21  ;;  %5490 = vpow2.f32 %v6316_v17  ;;  %v10064_v21 = vmax.f32 %v6533_v52, %v6493_v57  ;;  %v10065_v18 = vmax.f32 %v6536_v4, %v6515_v7  ;;  %v6768_v56 = vld [vmem:[#allocation2 + $0x70] sm:$0xff] }
 0x17c   : > { %1487 = vst.msk [vmem:[#allocation2 + $0xa0] sm:$0xff] %vm917_vm1, %v6718_v9  ;;  %5492 = vrcp.f32 %v812_v34  ;;  %v10066_v53 = vmax.f32 %v10052_v43, %v6491_v51  ;;  %v1539_v49 = vmax.f32 %v6232_v10, %v1570_v46  ;;  %v10067_v4 = vmax.f32 %v10053_v13, %v6499_v20 }
 0x17d   : > { %v6741_v22 = vmax.f32 %v10064_v21, %v6511_v41  ;;  %1488 = vst.msk [vmem:[#allocation2 + $0xa8] sm:$0xff] %vm917_vm1, %v6725_v40  ;;  %v6749_v2 = vmax.f32 %v10065_v18, %v6723_v38  ;;  %5494 = vrcp.f32 %v810_v39  ;;  %v10068_v20 = vmax.f32 %v6542_v47, %v6538_v19  ;;  %v10071_v18 = vld [vmem:[#allocation18_spill] sm:$0xff] }
 0x17e   : > { %v1602_v17 = vmax.f32 %v10066_v53, %v1570_v46  ;;  %v1603_v54 = vmax.f32 %v10067_v4, %v6730_v27  ;;  %5496 = vrcp.f32 %v815_v26  ;;  %v1604_v46 = vmax.f32 %v1539_v49, %v6493_v57  ;;  %v6782_v26 = vld [vmem:[#allocation2 + $0x58] sm:$0xff]  ;;  %v10070_v53 = vld [vmem:[#allocation30_spill] sm:$0xff] }
 0x17f   : > { %3394 = vrot.lane.b32.xlu0 %v6741_v22, %s5727_s24  ;;  %5498 = vrcp.f32 %v813_v28  ;;  %v6776_v13 = vmax.f32 %v10068_v20, %v6768_v56  ;;  %v10069_v57 = vmax.f32 %v6436_v14, %v6511_v41  ;;  %v10081_v44 = vrot.slane %v6696_v1, 2 }
 0x180   : > { %v1667_v10 = vmax.f32 %v1602_v17, %v6511_v41  ;;  %v1668_v34 = vmax.f32 %v1603_v54, %v6723_v38  ;;  %5500 = vpow2.f32 %v6322_v25  ;;  %v1669_v25 = vmax.f32 %v1604_v46, %v6766_v12 }
 0x181   : > { %v6790_v21 = vmax.f32 %v10069_v57, %v6766_v12  ;;  %5502 = vpow2.f32 %v6325_v23  ;;  %v10082_v61 = vmov %v10081_v44 }
 0x182   : > { %v6780_v39 = vmax.f32 %v1667_v10, %v6766_v12  ;;  %v6797_v47 = vmax.f32 %v1668_v34, %v6782_v26  ;;  %5504 = vpow2.f32 %v10070_v53  ;;  %v6807_v49 = vmax.f32 %v1669_v25, %v6538_v19 }
 0x183   : > { %3396 = vrot.lane.b32.xlu0 %v6749_v2, %s5727_s24  ;;  %5506 = vpow2.f32 %v6504_v36 }
 0x184   : > { %v1763_v17 = vrot.slane %v6780_v39, 1  ;;  %v1827_v14 = vrot.slane %v6780_v39, 7  ;;  %v1779_v4 = vrot.slane %v6797_v47, 1  ;;  %5508 = vpow2.f32 %v6507_v24  ;;  %3402 = vrot.lane.b32.xlu1 %v6807_v49, %s5727_s24 }
 0x185   : > { %v1843_v54 = vrot.slane %v6797_v47, 7  ;;  %v5491_v34 = vpop.eup %5490 }
 0x186   : > { %v5493_v25 = vpop.eup %5492  ;;  %v816_v53 = vadd.f32 1.0, %v5491_v34  ;;  %v6824_v43 = vsel %vm970_vm2, %v1763_v17, %v1779_v4  ;;  %v1811_v30 = vsel %vm970_vm2, %v1779_v4, %v1763_v17  ;;  %v10073_v17 = vld [vmem:[#allocation19_spill] sm:$0xff] }
 0x187   : > { %3398 = vrot.lane.b32.xlu0 %v6780_v39, %s5727_s24  ;;  %v6830_v52 = vsel %vm1035_vm3, %v1827_v14, %v1843_v54  ;;  %v5495_v51 = vpop.eup %5494  ;;  %v6833_v20 = vmul.f32 %v5493_v25, %v10071_v18  ;;  %v1875_v24 = vsel %vm1035_vm3, %v1843_v54, %v1827_v14  ;;  %v6839_v34 = vsel %vm931_vm5, %v1811_v30, -inf }
 0x188   : > { %v5497_v36 = vpop.eup %5496  ;;  %v6844_v4 = vmul.f32 %v5495_v51, %v10073_v17  ;;  %5510 = vrcp.f32 %v816_v53  ;;  %v6850_v18 = vsel %vm932_vm4, %v1875_v24, -inf  ;;  %3406 = vrot.lane.b32.xlu1 %v6776_v13, %s5727_s24 }
 0x189   : > { %10072 = vst [vmem:[#allocation30_spill] sm:$0xff] %v6833_v20  ;;  %v5499_v14 = vpop.eup %5498  ;;  %v965_v54 = vrot.slane %v6833_v20, 1  ;;  %v1030_v30 = vrot.slane %v6833_v20, 7  ;;  %v1231_v25 = vrot.slane %v6833_v20, 2  ;;  %v1296_v23 = vrot.slane %v6833_v20, 6 }
 0x18a   : > { %10074 = vst [vmem:[#allocation18_spill] sm:$0xff] %v6844_v4  ;;  %v5501_v51 = vpop.eup %5500  ;;  %v964_v53 = vrot.slane %v6844_v4, 1  ;;  %v1029_v24 = vrot.slane %v6844_v4, 7  ;;  %v1230_v17 = vrot.slane %v6844_v4, 2  ;;  %v1295_v46 = vrot.slane %v6844_v4, 6 }
 0x18b   : > { %3400 = vrot.lane.b32.xlu0 %v6797_v47, %s5727_s24  ;;  %v5503_v41 = vpop.eup %5502  ;;  %v982_v10 = vsel %vm970_vm2, %v949_v16, %v965_v54  ;;  %v998_v28 = vsel %vm970_vm2, %v965_v54, %v949_v16  ;;  %v1047_v57 = vsel %vm1035_vm3, %v1014_v31, %v1030_v30  ;;  %v1063_v11 = vsel %vm1035_vm3, %v1030_v30, %v1014_v31 }
 0x18c   : > { %v5505_v37 = vpop.eup %5504  ;;  %v1095_v29 = vsel %vm931_vm5, %v998_v28, -inf  ;;  %v1126_v58 = vmax.f32 %v6691_v62, %v982_v10  ;;  %v1162_v42 = vsel %vm932_vm4, %v1063_v11, -inf  ;;  %v1248_v16 = vsel %vm1236_vm6, %v1215_v33, %v1231_v25 }
 0x18d   : > { %v5507_v54 = vpop.eup %5506  ;;  %v1127_v0 = vmax.f32 %v6833_v20, %v1095_v29  ;;  %v1264_v31 = vsel %vm1236_vm6, %v1231_v25, %v1215_v33  ;;  %v10075_v28 = vrot.slane %v6691_v62, 6  ;;  %v10077_v33 = vrot.slane %v6696_v1, 1 }
 0x18e   : > { %v6902_v35 = vpop.eup %5508  ;;  %v1194_v15 = vmax.f32 %v1126_v58, %v1162_v42  ;;  %v1361_v29 = vsel %vm935_vm7, %v1264_v31, -inf }
 0x18f   : > { %v1313_v10 = vsel %vm1301_vm9, %v10075_v28, %v1296_v23  ;;  %v10076_v11 = vmov %v10075_v28  ;;  %v981_v25 = vsel %vm970_vm2, %v10077_v33, %v964_v53  ;;  %v1195_v28 = vmax.f32 %v1127_v0, %v1047_v57 }
 0x190   : > { %v1329_v30 = vsel %vm1301_vm9, %v1296_v23, %v10076_v11  ;;  %v10078_v62 = vmov %v10077_v33  ;;  %v10079_v11 = vrot.slane %v6696_v1, 7  ;;  %v1124_v0 = vmax.f32 %v6696_v1, %v981_v25 }
 0x191   : > { %v1428_v20 = vsel %vm936_vm8, %v1329_v30, -inf  ;;  %v997_v23 = vsel %vm970_vm2, %v964_v53, %v10078_v62  ;;  %v1392_v30 = vmax.f32 %v1194_v15, %v1248_v16  ;;  %v1393_v62 = vmax.f32 %v1195_v28, %v1361_v29 }
 0x192   : > { %v1046_v42 = vsel %vm1035_vm3, %v10079_v11, %v1029_v24  ;;  %v10080_v58 = vmov %v10079_v11  ;;  %v1093_v33 = vsel %vm931_vm5, %v997_v23, -inf  ;;  %v1247_v11 = vsel %vm1236_vm6, %v10081_v44, %v1230_v17 }
 0x193   : > { %v1062_v31 = vsel %vm1035_vm3, %v1029_v24, %v10080_v58  ;;  %v1125_v53 = vmax.f32 %v6844_v4, %v1093_v33  ;;  %v1263_v15 = vsel %vm1236_vm6, %v1230_v17, %v10082_v61  ;;  %v5511_v24 = vpop.eup %5510  ;;  %v6938_v16 = vmax.f32 %v1392_v30, %v1428_v20  ;;  %v10085_v30 = vld [vmem:[#allocation20_spill] sm:$0xff] }
 0x194   : > { %v1160_v57 = vsel %vm932_vm4, %v1062_v31, -inf  ;;  %v10083_v23 = vrot.slane %v6696_v1, 6  ;;  %v6948_v44 = vmax.f32 %v1393_v62, %v1313_v10  ;;  %v1359_v61 = vsel %vm935_vm7, %v1263_v15, -inf }
 0x195   : > { %v1192_v25 = vmax.f32 %v1124_v0, %v1160_v57  ;;  %v1193_v31 = vmax.f32 %v1125_v53, %v1046_v42  ;;  %1493 = vst.msk [vmem:[#allocation2 + $0xd0] sm:$0xff] %vm917_vm1, %v6938_v16  ;;  %v6957_v33 = vmul.f32 %v5497_v36, %v10085_v30  ;;  %v10087_v0 = vld [vmem:[#allocation21_spill] sm:$0xff]  ;;  %v814_v62 = vadd.f32 1.0, %v5501_v51 }
 0x196   : > { %v1312_v29 = vsel %vm1301_vm9, %v10083_v23, %v1295_v46  ;;  %v10084_v28 = vmov %v10083_v23  ;;  %v6960_v57 = vmul.f32 %v5499_v14, %v10087_v0  ;;  %1494 = vst.msk [vmem:[#allocation2 + $0xd8] sm:$0xff] %vm917_vm1, %v6948_v44  ;;  %v819_v53 = vadd.f32 1.0, %v5503_v41 }
 0x197   : > { %v1328_v58 = vsel %vm1301_vm9, %v1295_v46, %v10084_v28  ;;  %v1390_v17 = vmax.f32 %v1192_v25, %v1247_v11  ;;  %10086 = vst [vmem:[#allocation19_spill] sm:$0xff] %v6957_v33  ;;  %v10089_v46 = vld [vmem:[#allocation22_spill] sm:$0xff]  ;;  %v1391_v42 = vmax.f32 %v1193_v31, %v1359_v61  ;;  %v817_v15 = vadd.f32 1.0, %v5505_v37 }
 0x198   : > { %v1426_v20 = vsel %vm936_vm8, %v1328_v58, -inf  ;;  %10088 = vst [vmem:[#allocation20_spill] sm:$0xff] %v6960_v57  ;;  %v6963_v10 = vmul.f32 %v5511_v24, %v10089_v46  ;;  %v951_v11 = vrot.slane %v6957_v33, 1  ;;  %v1016_v36 = vrot.slane %v6957_v33, 7 }
 0x199   : > { %v6967_v23 = vmax.f32 %v1390_v17, %v1426_v20  ;;  %v1217_v25 = vrot.slane %v6957_v33, 2  ;;  %v6972_v14 = vmax.f32 %v1391_v42, %v1312_v29  ;;  %v1282_v24 = vrot.slane %v6957_v33, 6 }
 0x19a   : > { %10090 = vst [vmem:[#allocation21_spill] sm:$0xff] %v6963_v10  ;;  %v950_v28 = vrot.slane %v6960_v57, 1  ;;  %v967_v51 = vrot.slane %v6963_v10, 1  ;;  %v1032_v31 = vrot.slane %v6963_v10, 7  ;;  %v1233_v29 = vrot.slane %v6963_v10, 2 }
 0x19b   : > { %1491 = vst.msk [vmem:[#allocation2 + $0xc0] sm:$0xff] %vm917_vm1, %v6967_v23  ;;  %1492 = vst.msk [vmem:[#allocation2 + $0xc8] sm:$0xff] %vm917_vm1, %v6972_v14  ;;  %v1298_v61 = vrot.slane %v6963_v10, 6  ;;  %5512 = vrcp.f32 %v814_v62  ;;  %v820_v20 = vadd.f32 1.0, %v5507_v54  ;;  %v10163_v1 = vrot.slane %v6749_v2, 1 }
 0x19c   : > { %v984_v17 = vsel %vm970_vm2, %v951_v11, %v967_v51  ;;  %v1000_v30 = vsel %vm970_vm2, %v967_v51, %v951_v11  ;;  %v1049_v0 = vsel %vm1035_vm3, %v1016_v36, %v1032_v31  ;;  %v1065_v46 = vsel %vm1035_vm3, %v1032_v31, %v1016_v36 }
 0x19d   : > { %v1099_v42 = vsel %vm931_vm5, %v1000_v30, -inf  ;;  %v1130_v41 = vmax.f32 %v6957_v33, %v984_v17  ;;  %v1166_v54 = vsel %vm932_vm4, %v1065_v46, -inf  ;;  %v1250_v62 = vsel %vm1236_vm6, %v1217_v25, %v1233_v29 }
 0x19e   : > { %v1131_v37 = vmax.f32 %v6963_v10, %v1099_v42  ;;  %v1266_v11 = vsel %vm1236_vm6, %v1233_v29, %v1217_v25  ;;  %v1315_v51 = vsel %vm1301_vm9, %v1282_v24, %v1298_v61  ;;  %v1331_v36 = vsel %vm1301_vm9, %v1298_v61, %v1282_v24 }
 0x19f   : > { %v1198_v31 = vmax.f32 %v1130_v41, %v1166_v54  ;;  %v1365_v17 = vsel %vm935_vm7, %v1266_v11, -inf  ;;  %v1432_v30 = vsel %vm936_vm8, %v1331_v36, -inf  ;;  %5514 = vrcp.f32 %v819_v53 }
 0x1a0   : > { %v1199_v46 = vmax.f32 %v1131_v37, %v1049_v0  ;;  %5516 = vrcp.f32 %v817_v15  ;;  %v818_v42 = vadd.f32 1.0, %v6902_v35  ;;  %v10091_v25 = vmax.f32 %v6780_v39, %v6824_v43 }
 0x1a1   : > { %v1396_v58 = vmax.f32 %v1198_v31, %v1250_v62  ;;  %5518 = vrcp.f32 %v820_v20  ;;  %v10092_v24 = vmax.f32 %v6797_v47, %v6839_v34  ;;  %v10093_v61 = vrot.slane %v6797_v47, 2 }
 0x1a2   : > { %v1988_v29 = vmax.f32 %v10091_v25, %v6850_v18  ;;  %v10094_v53 = vrot.slane %v6780_v39, 2  ;;  %v1397_v35 = vmax.f32 %v1199_v46, %v1365_v17  ;;  %5520 = vrcp.f32 %v818_v42 }
 0x1a3   : > { %v1989_v41 = vmax.f32 %v10092_v24, %v6830_v52  ;;  %v10096_v43 = vmov %v10093_v61  ;;  %v10097_v20 = vrot.slane %v6797_v47, 6  ;;  %v10098_v52 = vrot.slane %v6780_v39, 6  ;;  %v10102_v24 = vld [vmem:[#allocation23_spill] sm:$0xff]  ;;  %v10111_v47 = vld [vmem:[#allocation24_spill] sm:$0xff] }
 0x1a4   : > { %v2051_v15 = vsel %vm1236_vm6, %v10094_v53, %v10093_v61  ;;  %v10095_v37 = vmov %v10094_v53  ;;  %v7040_v0 = vmax.f32 %v1396_v58, %v1432_v30  ;;  %v7050_v17 = vmax.f32 %v1397_v35, %v1315_v51  ;;  %v7072_v53 = vld [vmem:[#allocation2 + $0x68] sm:$0xff]  ;;  %v7076_v35 = vld [vmem:[#allocation2 + $0x80] sm:$0xff] }
 0x1a5   : > { %v2067_v18 = vsel %vm1236_vm6, %v10096_v43, %v10095_v37  ;;  %v2115_v34 = vsel %vm1301_vm9, %v10098_v52, %v10097_v20  ;;  %v10099_v54 = vmov %v10098_v52  ;;  %v10100_v62 = vmov %v10097_v20  ;;  %v5513_v30 = vpop.eup %5512 }
 0x1a6   : > { %v2131_v11 = vsel %vm1301_vm9, %v10100_v62, %v10099_v54  ;;  %v2149_v36 = vsel %vm935_vm7, %v2067_v18, -inf  ;;  %v2180_v31 = vmax.f32 %v1988_v29, %v2051_v15  ;;  %1497 = vst.msk [vmem:[#allocation2 + $0xf0] sm:$0xff] %vm917_vm1, %v7040_v0  ;;  %v10101_v51 = vmax.f32 %v6237_v32, %v6730_v27  ;;  %1498 = vst.msk [vmem:[#allocation2 + $0xf8] sm:$0xff] %vm917_vm1, %v7050_v17 }
 0x1a7   : > { %v2181_v46 = vmax.f32 %v1989_v41, %v2149_v36  ;;  %v2212_v42 = vsel %vm936_vm8, %v2131_v11, -inf  ;;  %v7068_v41 = vmul.f32 %v5513_v30, %v10102_v24  ;;  %v1673_v15 = vmax.f32 %v6790_v21, %v6768_v56 }
 0x1a8   : > { %v7057_v39 = vmax.f32 %v2180_v31, %v2212_v42  ;;  %v1605_v29 = vmax.f32 %v10101_v51, %v6515_v7  ;;  %v10104_v32 = vmax.f32 %v6214_v50, %v6515_v7  ;;  %v1545_v43 = vmax.f32 %v6403_v3, %v6766_v12 }
 0x1a9   : > { %10103 = vst [vmem:[#allocation22_spill] sm:$0xff] %v7068_v41  ;;  %v7070_v61 = vmax.f32 %v2181_v46, %v2115_v34  ;;  %v966_v20 = vrot.slane %v7068_v41, 1  ;;  %v1031_v50 = vrot.slane %v7068_v41, 7  ;;  %v1232_v7 = vrot.slane %v7068_v41, 2  ;;  %v5515_v34 = vpop.eup %5514 }
 0x1aa   : > { %v7082_v27 = vmax.f32 %v10104_v32, %v6723_v38  ;;  %2276 = vst.msk [vmem:[#allocation2 + $0x30] sm:$0xff] %vm917_vm1, %v7057_v39  ;;  %v1670_v37 = vmax.f32 %v1605_v29, %v6782_v26  ;;  %v1297_v52 = vrot.slane %v7068_v41, 6  ;;  %v7103_v12 = vmax.f32 %v1673_v15, %v7076_v35  ;;  %v5517_v11 = vpop.eup %5516 }
 0x1ab   : > { %2277 = vst.msk [vmem:[#allocation2 + $0x38] sm:$0xff] %vm917_vm1, %v7070_v61  ;;  %v7108_v62 = vmax.f32 %v1545_v43, %v6538_v19  ;;  %v983_v36 = vsel %vm970_vm2, %v950_v28, %v966_v20  ;;  %v999_v31 = vsel %vm970_vm2, %v966_v20, %v950_v28  ;;  %v10105_v46 = vrot.slane %v6960_v57, 7  ;;  %v5519_v29 = vpop.eup %5518 }
 0x1ac   : > { %v7100_v3 = vmax.f32 %v1670_v37, %v7072_v53  ;;  %v1097_v24 = vsel %vm931_vm5, %v999_v31, -inf  ;;  %v1128_v15 = vmax.f32 %v6960_v57, %v983_v36  ;;  %v10107_v28 = vrot.slane %v6960_v57, 2  ;;  %3410 = vrot.lane.b32.xlu1 %v7103_v12, %s5727_s24  ;;  %v5521_v43 = vpop.eup %5520 }
 0x1ad   : > { %v1048_v42 = vsel %vm1035_vm3, %v10105_v46, %v1031_v50  ;;  %v10106_v30 = vmov %v10105_v46  ;;  %v1129_v20 = vmax.f32 %v7068_v41, %v1097_v24  ;;  %v10109_v31 = vrot.slane %v6960_v57, 6 }
 0x1ae   : > { %v1064_v51 = vsel %vm1035_vm3, %v1031_v50, %v10106_v30  ;;  %v1249_v37 = vsel %vm1236_vm6, %v10107_v28, %v1232_v7  ;;  %3404 = vrot.lane.b32.xlu0 %v7100_v3, %s5727_s24  ;;  %v10108_v50 = vmov %v10107_v28  ;;  %v7157_v58 = vmul.f32 %v5515_v34, %v10111_v47 }
 0x1af   : > { %v1164_v32 = vsel %vm932_vm4, %v1064_v51, -inf  ;;  %v1265_v36 = vsel %vm1236_vm6, %v1232_v7, %v10108_v50  ;;  %v1314_v46 = vsel %vm1301_vm9, %v10109_v31, %v1297_v52  ;;  %v10110_v30 = vmov %v10109_v31  ;;  %v10113_v50 = vld [vmem:[#allocation25_spill] sm:$0xff] }
 0x1b0   : > { %v1330_v51 = vsel %vm1301_vm9, %v1297_v52, %v10110_v30  ;;  %v1196_v28 = vmax.f32 %v1128_v15, %v1164_v32  ;;  %v1363_v25 = vsel %vm935_vm7, %v1265_v36, -inf  ;;  %10112 = vst [vmem:[#allocation23_spill] sm:$0xff] %v7157_v58  ;;  %v1197_v7 = vmax.f32 %v1129_v20, %v1048_v42 }
 0x1b1   : > { %v1430_v24 = vsel %vm936_vm8, %v1330_v51, -inf  ;;  %v7160_v21 = vmul.f32 %v5517_v11, %v10113_v50  ;;  %v7163_v31 = vmul.f32 %v5519_v29, %v6481_v55  ;;  %v7166_v18 = vmul.f32 %v5521_v43, %v6485_v5 }
 0x1b2   : > { %v1394_v52 = vmax.f32 %v1196_v28, %v1249_v37  ;;  %v953_v15 = vrot.slane %v7157_v58, 1  ;;  %v1018_v32 = vrot.slane %v7157_v58, 7  ;;  %v1219_v36 = vrot.slane %v7157_v58, 2 }
 0x1b3   : > { %10114 = vst [vmem:[#allocation24_spill] sm:$0xff] %v7160_v21  ;;  %10115 = vst [vmem:[#allocation25_spill] sm:$0xff] %v7163_v31  ;;  %v1395_v30 = vmax.f32 %v1197_v7, %v1363_v25  ;;  %v1284_v47 = vrot.slane %v7157_v58, 6  ;;  %v952_v34 = vrot.slane %v7160_v21, 1  ;;  %v1017_v11 = vrot.slane %v7160_v21, 7 }
 0x1b4   : > { %10116 = vst [vmem:[#allocation40_spill] sm:$0xff] %v7166_v18  ;;  %v7174_v42 = vmax.f32 %v1394_v52, %v1430_v24  ;;  %v1218_v55 = vrot.slane %v7160_v21, 2  ;;  %v1283_v5 = vrot.slane %v7160_v21, 6  ;;  %v969_v29 = vrot.slane %v7163_v31, 1 }
 0x1b5   : > { %v7179_v37 = vmax.f32 %v1395_v30, %v1314_v46  ;;  %v1034_v43 = vrot.slane %v7163_v31, 7  ;;  %v1235_v25 = vrot.slane %v7163_v31, 2  ;;  %v1300_v20 = vrot.slane %v7163_v31, 6 }
 0x1b6   : > { %1495 = vst.msk [vmem:[#allocation2 + $0xe0] sm:$0xff] %vm917_vm1, %v7174_v42  ;;  %v986_v51 = vsel %vm970_vm2, %v953_v15, %v969_v29  ;;  %v1002_v28 = vsel %vm970_vm2, %v969_v29, %v953_v15  ;;  %v968_v24 = vrot.slane %v7166_v18, 1  ;;  %v1033_v46 = vrot.slane %v7166_v18, 7 }
 0x1b7   : > { %1496 = vst.msk [vmem:[#allocation2 + $0xe8] sm:$0xff] %vm917_vm1, %v7179_v37  ;;  %v1051_v7 = vsel %vm1035_vm3, %v1018_v32, %v1034_v43  ;;  %v1067_v50 = vsel %vm1035_vm3, %v1034_v43, %v1018_v32  ;;  %v1103_v52 = vsel %vm931_vm5, %v1002_v28, -inf  ;;  %v1134_v30 = vmax.f32 %v7157_v58, %v986_v51 }
 0x1b8   : > { %v1135_v15 = vmax.f32 %v7163_v31, %v1103_v52  ;;  %v1170_v29 = vsel %vm932_vm4, %v1067_v50, -inf  ;;  %v1252_v54 = vsel %vm1236_vm6, %v1219_v36, %v1235_v25  ;;  %v1268_v10 = vsel %vm1236_vm6, %v1235_v25, %v1219_v36 }
 0x1b9   : > { %v1202_v33 = vmax.f32 %v1134_v30, %v1170_v29  ;;  %v1317_v32 = vsel %vm1301_vm9, %v1284_v47, %v1300_v20  ;;  %v1333_v43 = vsel %vm1301_vm9, %v1300_v20, %v1284_v47  ;;  %v1369_v51 = vsel %vm935_vm7, %v1268_v10, -inf }
 0x1ba   : > { %v1203_v28 = vmax.f32 %v1135_v15, %v1051_v7  ;;  %v1436_v50 = vsel %vm936_vm8, %v1333_v43, -inf  ;;  %v985_v52 = vsel %vm970_vm2, %v952_v34, %v968_v24  ;;  %v1001_v36 = vsel %vm970_vm2, %v968_v24, %v952_v34 }
 0x1bb   : > { %v1400_v25 = vmax.f32 %v1202_v33, %v1252_v54  ;;  %v1050_v30 = vsel %vm1035_vm3, %v1017_v11, %v1033_v46  ;;  %v1066_v47 = vsel %vm1035_vm3, %v1033_v46, %v1017_v11  ;;  %v1101_v10 = vsel %vm931_vm5, %v1001_v36, -inf }
 0x1bc   : > { %v1401_v20 = vmax.f32 %v1203_v28, %v1369_v51  ;;  %v1132_v7 = vmax.f32 %v7160_v21, %v985_v52  ;;  %v1133_v15 = vmax.f32 %v7166_v18, %v1101_v10  ;;  %v1168_v29 = vsel %vm932_vm4, %v1066_v47, -inf }
 0x1bd   : > { %v7230_v43 = vmax.f32 %v1400_v25, %v1436_v50  ;;  %v1234_v33 = vrot.slane %v7166_v18, 2  ;;  %v1299_v54 = vrot.slane %v7166_v18, 6  ;;  %v1780_v34 = vrot.slane %v7100_v3, 1 }
 0x1be   : > { %v7235_v11 = vmax.f32 %v1401_v20, %v1317_v32  ;;  %v1200_v24 = vmax.f32 %v1132_v7, %v1168_v29  ;;  %v1201_v46 = vmax.f32 %v1133_v15, %v1050_v30  ;;  %v1844_v51 = vrot.slane %v7100_v3, 7 }
 0x1bf   : > { %10117 = vst [vmem:[#allocation41_spill] sm:$0xff] %v7230_v43  ;;  %1501 = vst.msk [vmem:[#allocation2 + $0x110] sm:$0xff] %vm917_vm1, %v7230_v43  ;;  %v1251_v28 = vsel %vm1236_vm6, %v1218_v55, %v1234_v33  ;;  %v1267_v50 = vsel %vm1236_vm6, %v1234_v33, %v1218_v55  ;;  %v1316_v52 = vsel %vm1301_vm9, %v1283_v5, %v1299_v54  ;;  %v2036_v47 = vrot.slane %v7100_v3, 2 }
 0x1c0   : > { %v1332_v32 = vsel %vm1301_vm9, %v1299_v54, %v1283_v5  ;;  %1502 = vst.msk [vmem:[#allocation2 + $0x118] sm:$0xff] %vm917_vm1, %v7235_v11  ;;  %v1367_v36 = vsel %vm935_vm7, %v1267_v50, -inf  ;;  %v1398_v25 = vmax.f32 %v1200_v24, %v1251_v28  ;;  %v2100_v55 = vrot.slane %v7100_v3, 6 }
 0x1c1   : > { %v1434_v30 = vsel %vm936_vm8, %v1332_v32, -inf  ;;  %v1399_v10 = vmax.f32 %v1201_v46, %v1367_v36  ;;  %v10118_v20 = vrot.slane %v6807_v49, 1  ;;  %v10120_v33 = vrot.slane %v6807_v49, 7 }
 0x1c2   : > { %v7264_v29 = vmax.f32 %v1398_v25, %v1434_v30  ;;  %v10122_v25 = vrot.slane %v6807_v49, 2 }
 0x1c3   : > { %v1796_v5 = vsel %vm970_vm2, %v10118_v20, %v1780_v34  ;;  %v10119_v7 = vmov %v10118_v20  ;;  %v1860_v54 = vsel %vm1035_vm3, %v10120_v33, %v1844_v51  ;;  %v10121_v24 = vmov %v10120_v33 }
 0x1c4   : > { %v1812_v15 = vsel %vm970_vm2, %v1780_v34, %v10119_v7  ;;  %v1876_v46 = vsel %vm1035_vm3, %v1844_v51, %v10121_v24  ;;  %v7276_v50 = vmax.f32 %v1399_v10, %v1316_v52  ;;  %v1926_v32 = vmax.f32 %v6807_v49, %v1796_v5  ;;  %1499 = vst.msk [vmem:[#allocation2 + $0x100] sm:$0xff] %vm917_vm1, %v7264_v29 }
 0x1c5   : > { %v1895_v28 = vsel %vm931_vm5, %v1812_v15, -inf  ;;  %v1958_v36 = vsel %vm932_vm4, %v1876_v46, -inf  ;;  %v2052_v51 = vsel %vm1236_vm6, %v10122_v25, %v2036_v47  ;;  %v10123_v30 = vmov %v10122_v25 }
 0x1c6   : > { %v1927_v34 = vmax.f32 %v7100_v3, %v1895_v28  ;;  %v2068_v52 = vsel %vm1236_vm6, %v2036_v47, %v10123_v30  ;;  %v10124_v10 = vrot.slane %v6807_v49, 6  ;;  %1500 = vst.msk [vmem:[#allocation2 + $0x108] sm:$0xff] %vm917_vm1, %v7276_v50  ;;  %v1990_v7 = vmax.f32 %v1926_v32, %v1958_v36 }
 0x1c7   : > { %v2151_v33 = vsel %vm935_vm7, %v2068_v52, -inf  ;;  %v1766_v24 = vrot.slane %v7103_v12, 1  ;;  %v1830_v46 = vrot.slane %v7103_v12, 7  ;;  %v2022_v49 = vrot.slane %v7103_v12, 2 }
 0x1c8   : > { %v2116_v3 = vsel %vm1301_vm9, %v10124_v10, %v2100_v55  ;;  %v10125_v20 = vmov %v10124_v10  ;;  %v1991_v15 = vmax.f32 %v1927_v34, %v1860_v54  ;;  %v2182_v25 = vmax.f32 %v1990_v7, %v2052_v51 }
 0x1c9   : > { %v2132_v5 = vsel %vm1301_vm9, %v2100_v55, %v10125_v20  ;;  %v7310_v55 = vld [vmem:[#allocation2 + $0x78] sm:$0xff]  ;;  %v10126_v54 = vmax.f32 %v7082_v27, %v7072_v53  ;;  %v1675_v34 = vmax.f32 %v7108_v62, %v7076_v35  ;;  %v10127_v36 = vmax.f32 %v6438_v8, %v6723_v38  ;;  %v7335_v8 = vld [vmem:[#allocation2 + $0x90] sm:$0xff] }
 0x1ca   : > { %v2214_v47 = vsel %vm936_vm8, %v2132_v5, -inf  ;;  %v2183_v30 = vmax.f32 %v1991_v15, %v2151_v33  ;;  %v10128_v10 = vmax.f32 %v6627_v60, %v6538_v19  ;;  %v1546_v51 = vmax.f32 %v6409_v59, %v6782_v26 }
 0x1cb   : > { %v1737_v32 = vmax.f32 %v10126_v54, %v7310_v55  ;;  %v1609_v52 = vmax.f32 %v10127_v36, %v6782_v26  ;;  %v1549_v27 = vmax.f32 %v6501_v48, %v6768_v56  ;;  %v7330_v5 = vmax.f32 %v2182_v25, %v2214_v47 }
 0x1cc   : > { %v1612_v20 = vmax.f32 %v10128_v10, %v6768_v56  ;;  %v7332_v7 = vmax.f32 %v2183_v30, %v2116_v3  ;;  %v7338_v19 = vmax.f32 %v1675_v34, %v7335_v8  ;;  %v10129_v48 = vrot.slane %v6776_v13, 1 }
 0x1cd   : > { %v1781_v62 = vrot.slane %v1737_v32, 1  ;;  %v1845_v15 = vrot.slane %v1737_v32, 7  ;;  %3408 = vrot.lane.b32.xlu0 %v1737_v32, %s5727_s24  ;;  %v2037_v38 = vrot.slane %v1737_v32, 2  ;;  %v2101_v33 = vrot.slane %v1737_v32, 6  ;;  %2278 = vst.msk [vmem:[#allocation2 + $0x40] sm:$0xff] %vm917_vm1, %v7330_v5 }
 0x1ce   : > { %v1674_v59 = vmax.f32 %v1609_v52, %v7310_v55  ;;  %v10130_v56 = vmov %v10129_v48  ;;  %v10131_v3 = vrot.slane %v6776_v13, 7  ;;  %2279 = vst.msk [vmem:[#allocation2 + $0x48] sm:$0xff] %vm917_vm1, %v7332_v7  ;;  %v10133_v52 = vrot.slane %v6776_v13, 2  ;;  %3414 = vrot.lane.b32.xlu1 %v7338_v19, %s5727_s24 }
 0x1cf   : > { %v1797_v60 = vsel %vm970_vm2, %v10129_v48, %v1781_v62  ;;  %v1813_v26 = vsel %vm970_vm2, %v1781_v62, %v10130_v56  ;;  %v10135_v56 = vrot.slane %v6776_v13, 6 }
 0x1d0   : > { %v1861_v47 = vsel %vm1035_vm3, %v10131_v3, %v1845_v15  ;;  %v10132_v25 = vmov %v10131_v3  ;;  %v1897_v54 = vsel %vm931_vm5, %v1813_v26, -inf  ;;  %v1928_v34 = vmax.f32 %v6776_v13, %v1797_v60 }
 0x1d1   : > { %v1877_v30 = vsel %vm1035_vm3, %v1845_v15, %v10132_v25  ;;  %v2053_v10 = vsel %vm1236_vm6, %v10133_v52, %v2037_v38  ;;  %v1929_v62 = vmax.f32 %v1737_v32, %v1897_v54  ;;  %v10134_v15 = vmov %v10133_v52  ;;  %v7384_v25 = vld [vmem:[#allocation2 + $0x88] sm:$0xff] }
 0x1d2   : > { %v1960_v36 = vsel %vm932_vm4, %v1877_v30, -inf  ;;  %v2069_v48 = vsel %vm1236_vm6, %v2037_v38, %v10134_v15  ;;  %v2117_v60 = vsel %vm1301_vm9, %v10135_v56, %v2101_v33  ;;  %v10136_v26 = vmov %v10135_v56 }
 0x1d3   : > { %v2133_v3 = vsel %vm1301_vm9, %v2101_v33, %v10136_v26  ;;  %v1992_v30 = vmax.f32 %v1928_v34, %v1960_v36  ;;  %v2153_v32 = vsel %vm935_vm7, %v2069_v48, -inf  ;;  %v1993_v52 = vmax.f32 %v1929_v62, %v1861_v47  ;;  %v7396_v36 = vld [vmem:[#allocation2 + $0xa0] sm:$0xff]  ;;  %v10137_v47 = vld [vmem:[#allocation36_spill] sm:$0xff] }
 0x1d4   : > { %v2216_v54 = vsel %vm936_vm8, %v2133_v3, -inf  ;;  %v1739_v33 = vmax.f32 %v1674_v59, %v7384_v25  ;;  %v1677_v34 = vmax.f32 %v1612_v20, %v7335_v8  ;;  %v1611_v48 = vmax.f32 %v1546_v51, %v7072_v53 }
 0x1d5   : > { %v2184_v28 = vmax.f32 %v1992_v30, %v2053_v10  ;;  %v2185_v26 = vmax.f32 %v1993_v52, %v2153_v32  ;;  %v1614_v3 = vmax.f32 %v1549_v27, %v7076_v35  ;;  %v1548_v62 = vmax.f32 %v10137_v47, %v7072_v53 }
 0x1d6   : > { %v10138_v15 = vrot.slane %v6749_v2, 1  ;;  %v10139_v56 = vrot.slane %v6741_v22, 1  ;;  %v1782_v20 = vrot.slane %v1739_v33, 1  ;;  %v1846_v30 = vrot.slane %v1739_v33, 7  ;;  %3412 = vrot.lane.b32.xlu0 %v1739_v33, %s5727_s24 }
 0x1d7   : > { %v7410_v59 = vmax.f32 %v2184_v28, %v2216_v54  ;;  %v2038_v13 = vrot.slane %v1739_v33, 2  ;;  %v7413_v51 = vmax.f32 %v2185_v26, %v2117_v60  ;;  %v2102_v27 = vrot.slane %v1739_v33, 6 }
 0x1d8   : > { %v7408_v10 = vsel %vm970_vm2, %v10139_v56, %v10138_v15  ;;  %v7416_v53 = vmax.f32 %v1677_v34, %v7396_v36  ;;  %v1676_v32 = vmax.f32 %v1611_v48, %v7384_v25  ;;  %v1798_v28 = vsel %vm970_vm2, %v1766_v24, %v1782_v20 }
 0x1d9   : > { %2280 = vst.msk [vmem:[#allocation2 + $0x50] sm:$0xff] %vm917_vm1, %v7410_v59  ;;  %v1814_v60 = vsel %vm970_vm2, %v1782_v20, %v1766_v24  ;;  %v1862_v54 = vsel %vm1035_vm3, %v1830_v46, %v1846_v30  ;;  %v1878_v52 = vsel %vm1035_vm3, %v1846_v30, %v1830_v46  ;;  %v1930_v56 = vmax.f32 %v7103_v12, %v1798_v28 }
 0x1da   : > { %v1899_v15 = vsel %vm931_vm5, %v1814_v60, -inf  ;;  %v1962_v34 = vsel %vm932_vm4, %v1878_v52, -inf  ;;  %v2054_v24 = vsel %vm1236_vm6, %v2022_v49, %v2038_v13  ;;  %3418 = vrot.lane.b32.xlu1 %v7416_v53, %s5727_s24  ;;  %2281 = vst.msk [vmem:[#allocation2 + $0x58] sm:$0xff] %vm917_vm1, %v7413_v51  ;;  %v2070_v48 = vsel %vm1236_vm6, %v2038_v13, %v2022_v49 }
 0x1db   : > { %v1931_v46 = vmax.f32 %v1739_v33, %v1899_v15  ;;  %v10140_v26 = vrot.slane %v7103_v12, 6  ;;  %v1994_v28 = vmax.f32 %v1930_v56, %v1962_v34  ;;  %v2155_v60 = vsel %vm935_vm7, %v2070_v48, -inf  ;;  %v7470_v12 = vld [vmem:[#allocation2 + $0x98] sm:$0xff] }
 0x1dc   : > { %v1679_v56 = vmax.f32 %v1614_v3, %v7396_v36  ;;  %v1613_v34 = vmax.f32 %v1548_v62, %v7310_v55  ;;  %v7487_v62 = vld [vmem:[#allocation2 + $0xb0] sm:$0xff] }
 0x1dd   : > { %v2118_v47 = vsel %vm1301_vm9, %v10140_v26, %v2102_v27  ;;  %v10141_v20 = vmov %v10140_v26  ;;  %v1995_v49 = vmax.f32 %v1931_v46, %v1862_v54  ;;  %v2186_v38 = vmax.f32 %v1994_v28, %v2054_v24  ;;  %v7538_v26 = vld [vmem:[#allocation2 + $0xa8] sm:$0xff] }
 0x1de   : > { %v2134_v30 = vsel %vm1301_vm9, %v2102_v27, %v10141_v20  ;;  %v1741_v27 = vmax.f32 %v1676_v32, %v7470_v12  ;;  %v10142_v20 = vrot.slane %v6741_v22, 7  ;;  %v10143_v54 = vrot.slane %v6749_v2, 7 }
 0x1df   : > { %v2218_v33 = vsel %vm936_vm8, %v2134_v30, -inf  ;;  %v2187_v48 = vmax.f32 %v1995_v49, %v2155_v60  ;;  %v1922_v30 = vmax.f32 %v6741_v22, %v7408_v10  ;;  %v7492_v15 = vmax.f32 %v1679_v56, %v7487_v62 }
 0x1e0   : > { %v1874_v46 = vsel %vm1035_vm3, %v10143_v54, %v10142_v20  ;;  %v7484_v24 = vmax.f32 %v2186_v38, %v2218_v33  ;;  %v1783_v32 = vrot.slane %v1741_v27, 1  ;;  %v1847_v28 = vrot.slane %v1741_v27, 7  ;;  %3416 = vrot.lane.b32.xlu0 %v1741_v27, %s5727_s24 }
 0x1e1   : > { %v2039_v3 = vrot.slane %v1741_v27, 2  ;;  %v7489_v60 = vmax.f32 %v2187_v48, %v2118_v47  ;;  %v2103_v49 = vrot.slane %v1741_v27, 6  ;;  %v1678_v20 = vmax.f32 %v1613_v34, %v7470_v12  ;;  %3422 = vrot.lane.b32.xlu1 %v7492_v15, %s5727_s24 }
 0x1e2   : > { %2282 = vst.msk [vmem:[#allocation2 + $0x60] sm:$0xff] %vm917_vm1, %v7484_v24  ;;  %v10144_v38 = vrot.slane %v7338_v19, 1  ;;  %v10146_v48 = vrot.slane %v7338_v19, 7 }
 0x1e3   : > { %2283 = vst.msk [vmem:[#allocation2 + $0x68] sm:$0xff] %vm917_vm1, %v7489_v60 }
 0x1e4   : > { %v1799_v10 = vsel %vm970_vm2, %v10144_v38, %v1783_v32  ;;  %v10145_v33 = vmov %v10144_v38  ;;  %v1863_v56 = vsel %vm1035_vm3, %v10146_v48, %v1847_v28  ;;  %v10147_v34 = vmov %v10146_v48 }
 0x1e5   : > { %v1815_v47 = vsel %vm970_vm2, %v1783_v32, %v10145_v33  ;;  %v1879_v54 = vsel %vm1035_vm3, %v1847_v28, %v10147_v34  ;;  %v1932_v38 = vmax.f32 %v7338_v19, %v1799_v10  ;;  %v10148_v32 = vrot.slane %v7338_v19, 2 }
 0x1e6   : > { %v1901_v13 = vsel %vm931_vm5, %v1815_v47, -inf  ;;  %v1964_v52 = vsel %vm932_vm4, %v1879_v54, -inf  ;;  %v10150_v47 = vrot.slane %v7338_v19, 6 }
 0x1e7   : > { %v2055_v33 = vsel %vm1236_vm6, %v10148_v32, %v2039_v3  ;;  %v1933_v28 = vmax.f32 %v1741_v27, %v1901_v13  ;;  %v10149_v48 = vmov %v10148_v32  ;;  %v1996_v31 = vmax.f32 %v1932_v38, %v1964_v52 }
 0x1e8   : > { %v2071_v10 = vsel %vm1236_vm6, %v2039_v3, %v10149_v48  ;;  %v2119_v34 = vsel %vm1301_vm9, %v10150_v47, %v2103_v49  ;;  %v10151_v54 = vmov %v10150_v47  ;;  %v1954_v52 = vsel %vm932_vm4, %v1874_v46, -inf }
 0x1e9   : > { %v2135_v32 = vsel %vm1301_vm9, %v2103_v49, %v10151_v54  ;;  %v2157_v13 = vsel %vm935_vm7, %v2071_v10, -inf  ;;  %v1997_v48 = vmax.f32 %v1933_v28, %v1863_v56  ;;  %v2188_v18 = vmax.f32 %v1996_v31, %v2055_v33 }
 0x1ea   : > { %v2220_v27 = vsel %vm936_vm8, %v2135_v32, -inf  ;;  %v1743_v49 = vmax.f32 %v1678_v20, %v7538_v26  ;;  %v2034_v38 = vrot.slane %v6749_v2, 2  ;;  %v1986_v54 = vmax.f32 %v1922_v30, %v1954_v52 }
 0x1eb   : > { %v2189_v10 = vmax.f32 %v1997_v48, %v2157_v13  ;;  %v2082_v32 = vrot.slane %v6741_v22, 6  ;;  %v2098_v56 = vrot.slane %v6749_v2, 6  ;;  %v7554_v28 = vmax.f32 %v2188_v18, %v2220_v27 }
 0x1ec   : > { %v1784_v58 = vrot.slane %v1743_v49, 1  ;;  %v1848_v47 = vrot.slane %v1743_v49, 7  ;;  %v2040_v3 = vrot.slane %v1743_v49, 2  ;;  %3420 = vrot.lane.b32.xlu0 %v1743_v49, %s5727_s24  ;;  %v2104_v20 = vrot.slane %v1743_v49, 6 }
 0x1ed   : > { %v7557_v31 = vmax.f32 %v2189_v10, %v2119_v34  ;;  %v10152_v46 = vrot.slane %v6741_v22, 2  ;;  %v2130_v30 = vsel %vm1301_vm9, %v2098_v56, %v2082_v32  ;;  %2284 = vst.msk [vmem:[#allocation2 + $0x70] sm:$0xff] %vm917_vm1, %v7554_v28  ;;  %v10153_v18 = vrot.slane %v7416_v53, 1 }
 0x1ee   : > { %v10155_v48 = vrot.slane %v7416_v53, 7 }
 0x1ef   : > { %v2050_v33 = vsel %vm1236_vm6, %v10152_v46, %v2034_v38  ;;  %v1800_v13 = vsel %vm970_vm2, %v10153_v18, %v1784_v58  ;;  %v10154_v34 = vmov %v10153_v18  ;;  %2285 = vst.msk [vmem:[#allocation2 + $0x78] sm:$0xff] %vm917_vm1, %v7557_v31 }
 0x1f0   : > { %v1816_v27 = vsel %vm970_vm2, %v1784_v58, %v10154_v34  ;;  %v1864_v52 = vsel %vm1035_vm3, %v10155_v48, %v1848_v47  ;;  %v10156_v10 = vmov %v10155_v48  ;;  %v1934_v18 = vmax.f32 %v7416_v53, %v1800_v13 }
 0x1f1   : > { %v1880_v46 = vsel %vm1035_vm3, %v1848_v47, %v10156_v10  ;;  %v1903_v19 = vsel %vm931_vm5, %v1816_v27, -inf  ;;  %v10157_v58 = vrot.slane %v7416_v53, 2  ;;  %v10159_v27 = vrot.slane %v7416_v53, 6 }
 0x1f2   : > { %v1966_v21 = vsel %vm932_vm4, %v1880_v46, -inf  ;;  %v1935_v48 = vmax.f32 %v1743_v49, %v1903_v19  ;;  %v2178_v49 = vmax.f32 %v1986_v54, %v2050_v33  ;;  %v10162_v53 = vrot.slane %v6741_v22, 1 }
 0x1f3   : > { %v2056_v34 = vsel %vm1236_vm6, %v10157_v58, %v2040_v3  ;;  %v10158_v41 = vmov %v10157_v58  ;;  %v2120_v13 = vsel %vm1301_vm9, %v10159_v27, %v2104_v20  ;;  %v10160_v10 = vmov %v10159_v27 }
 0x1f4   : > { %v2072_v47 = vsel %vm1236_vm6, %v2040_v3, %v10158_v41  ;;  %v2136_v46 = vsel %vm1301_vm9, %v2104_v20, %v10160_v10  ;;  %v1998_v58 = vmax.f32 %v1934_v18, %v1966_v21  ;;  %v1999_v4 = vmax.f32 %v1935_v48, %v1864_v52  ;;  %v10161_v3 = vld [vmem:[#allocation33_spill] sm:$0xff] }
 0x1f5   : > { %v2159_v57 = vsel %vm935_vm7, %v2072_v47, -inf  ;;  %v2222_v19 = vsel %vm936_vm8, %v2136_v46, -inf  ;;  %v2210_v41 = vsel %vm936_vm8, %v2130_v30, -inf  ;;  %v1550_v27 = vmax.f32 %v10161_v3, %v7310_v55  ;;  %v5658_v46 = vld [vmem:[#allocation2] sm:$0xff] }
 0x1f6   : > { %v1810_v21 = vsel %vm970_vm2, %v10163_v1, %v10162_v53  ;;  %v2190_v20 = vmax.f32 %v1998_v58, %v2056_v34  ;;  %v2242_v18 = vmax.f32 %v2178_v49, %v2210_v41  ;;  %v10164_v47 = vrot.slane %v6749_v2, 7 }
 0x1f7   : > { %v10165_v54 = vrot.slane %v6741_v22, 7  ;;  %v1891_v30 = vsel %vm931_vm5, %v1810_v21, -inf  ;;  %v2191_v55 = vmax.f32 %v1999_v4, %v2159_v57  ;;  %v1615_v52 = vmax.f32 %v1550_v27, %v7384_v25  ;;  %v5660_v27 = vld [vmem:[#allocation2 + $0x10] sm:$0xff] }
 0x1f8   : > { %v1923_v48 = vmax.f32 %v6749_v2, %v1891_v30  ;;  %v10166_v10 = vrot.slane %v6741_v22, 2  ;;  %v7634_v34 = vmax.f32 %v2190_v20, %v2222_v19  ;;  %2274 = vst.msk [vmem:[#allocation2 + $0x20] sm:$0xff] %vm917_vm1, %v2242_v18  ;;  %v2338_v58 = vmax.f32 %v2242_v18, %v5658_v46  ;;  %v7643_v2 = vld [vmem:[#allocation2 + $0x30] sm:$0xff]  ;;  %v7648_v19 = vld [vmem:[#allocation2 + $0x18] sm:$0xff]  ;;  %v7661_v20 = vld [vmem:[#allocation2 + $0x40] sm:$0xff] }
 0x1f9   : > { %v1858_v33 = vsel %vm1035_vm3, %v10165_v54, %v10164_v47  ;;  %v2114_v49 = vsel %vm1301_vm9, %v2082_v32, %v2098_v56  ;;  %v7641_v57 = vmax.f32 %v2191_v55, %v2120_v13  ;;  %v1680_v22 = vmax.f32 %v1615_v52, %v7538_v26  ;;  %v7652_v32 = vld [vmem:[#allocation2 + $0xb8] sm:$0xff] }
 0x1fa   : > { %v2066_v1 = vsel %vm1236_vm6, %v2034_v38, %v10166_v10  ;;  %10167 = vst [vmem:[#allocation36_spill] sm:$0xff] %v7634_v34  ;;  %v1987_v41 = vmax.f32 %v1923_v48, %v1858_v33  ;;  %v7646_v38 = vld [vmem:[#allocation2 + $0x38] sm:$0xff]  ;;  %v2341_v3 = vmax.f32 %v7070_v61, %v7648_v19  ;;  %v2402_v53 = vmax.f32 %v2338_v58, %v5660_v27 }
 0x1fb   : > { %v2147_v4 = vsel %vm935_vm7, %v2066_v1, -inf  ;;  %10168 = vst [vmem:[#allocation33_spill] sm:$0xff] %v7641_v57  ;;  %v2340_v56 = vmax.f32 %v7057_v39, %v5660_v27  ;;  %v1552_v13 = vmax.f32 %v6725_v40, %v7384_v25  ;;  %v1551_v21 = vmax.f32 %v6718_v9, %v7076_v35  ;;  %2286 = vst.msk [vmem:[#allocation2 + $0x80] sm:$0xff] %vm917_vm1, %v7634_v34  ;;  %v10169_v54 = vld [vmem:[#allocation37_spill] sm:$0xff] }
 0x1fc   : > { %v1745_v18 = vmax.f32 %v1680_v22, %v7652_v32  ;;  %v2179_v47 = vmax.f32 %v1987_v41, %v2147_v4  ;;  %2287 = vst.msk [vmem:[#allocation2 + $0x88] sm:$0xff] %vm917_vm1, %v7641_v57  ;;  %v1554_v39 = vmax.f32 %v6693_v45, %v7470_v12  ;;  %v1553_v40 = vmax.f32 %v10169_v54, %v7335_v8 }
 0x1fd   : > { %v2466_v25 = vmax.f32 %v2402_v53, %v7643_v2  ;;  %v1617_v9 = vmax.f32 %v1552_v13, %v7470_v12  ;;  %v1616_v35 = vmax.f32 %v1551_v21, %v7335_v8  ;;  %v10171_v12 = vrot.slane %v7492_v15, 1 }
 0x1fe   : > { %v1785_v30 = vrot.slane %v1745_v18, 1  ;;  %v1849_v55 = vrot.slane %v1745_v18, 7  ;;  %v2041_v52 = vrot.slane %v1745_v18, 2  ;;  %v2105_v48 = vrot.slane %v1745_v18, 6  ;;  %3424 = vrot.lane.b32.xlu0 %v1745_v18, %s5727_s24 }
 0x1ff   : > { %v7677_v45 = vmax.f32 %v2466_v25, %v7661_v20  ;;  %v2243_v10 = vmax.f32 %v2179_v47, %v2114_v49  ;;  %v1682_v1 = vmax.f32 %v1617_v9, %v7652_v32  ;;  %v1681_v46 = vmax.f32 %v1616_v35, %v7487_v62  ;;  %v7709_v25 = vld [vmem:[#allocation2 + $0x20] sm:$0xff]  ;;  %v7711_v9 = vld [vmem:[#allocation2 + $0xc8] sm:$0xff] }
 0x200   : > { %v1801_v8 = vsel %vm970_vm2, %v10171_v12, %v1785_v30  ;;  %v10172_v58 = vmov %v10171_v12  ;;  %v10173_v22 = vrot.slane %v7492_v15, 7  ;;  %v10175_v47 = vrot.slane %v7492_v15, 2  ;;  %v7713_v35 = vld [vmem:[#allocation2 + $0xc0] sm:$0xff] }
 0x201   : > { %10170 = vst [vmem:[#allocation37_spill] sm:$0xff] %v7677_v45  ;;  %v1817_v4 = vsel %vm970_vm2, %v1785_v30, %v10172_v58  ;;  %3522 = vrot.lane.b32.xlu1 %v7677_v45, %s5728_s25  ;;  %v1936_v13 = vmax.f32 %v7492_v15, %v1801_v8  ;;  %2275 = vst.msk [vmem:[#allocation2 + $0x28] sm:$0xff] %vm917_vm1, %v2243_v10  ;;  %v10177_v8 = vrot.slane %v7492_v15, 6 }
 0x202   : > { %v1865_v41 = vsel %vm1035_vm3, %v10173_v22, %v1849_v55  ;;  %v10174_v49 = vmov %v10173_v22  ;;  %v1905_v53 = vsel %vm931_vm5, %v1817_v4, -inf  ;;  %v2057_v54 = vsel %vm1236_vm6, %v10175_v47, %v2041_v52 }
 0x203   : > { %v1881_v27 = vsel %vm1035_vm3, %v1849_v55, %v10174_v49  ;;  %v1937_v30 = vmax.f32 %v1745_v18, %v1905_v53  ;;  %v10176_v55 = vmov %v10175_v47  ;;  %v2121_v58 = vsel %vm1301_vm9, %v10177_v8, %v2105_v48  ;;  %v5661_v53 = vld [vmem:[#allocation2 + $0x8] sm:$0xff] }
 0x204   : > { %v1968_v21 = vsel %vm932_vm4, %v1881_v27, -inf  ;;  %v2073_v12 = vsel %vm1236_vm6, %v2041_v52, %v10176_v55  ;;  %v10178_v4 = vmov %v10177_v8  ;;  %v2339_v47 = vmax.f32 %v2243_v10, %v5661_v53 }
 0x205   : > { %v2137_v22 = vsel %vm1301_vm9, %v2105_v48, %v10178_v4  ;;  %v2000_v49 = vmax.f32 %v1936_v13, %v1968_v21  ;;  %v2161_v27 = vsel %vm935_vm7, %v2073_v12, -inf  ;;  %v2001_v52 = vmax.f32 %v1937_v30, %v1865_v41  ;;  %v7739_v13 = vld [vmem:[#allocation2 + $0x50] sm:$0xff]  ;;  %v7747_v41 = vld [vmem:[#allocation2 + $0x48] sm:$0xff] }
 0x206   : > { %v2224_v18 = vsel %vm936_vm8, %v2137_v22, -inf  ;;  %v2404_v55 = vmax.f32 %v2340_v56, %v7709_v25  ;;  %v7733_v33 = vmax.f32 %v1682_v1, %v7711_v9  ;;  %v7736_v15 = vmax.f32 %v1681_v46, %v7713_v35 }
 0x207   : > { %v2192_v8 = vmax.f32 %v2000_v49, %v2057_v54  ;;  %v2403_v48 = vmax.f32 %v2339_v47, %v7648_v19  ;;  %v7742_v21 = vmax.f32 %v1554_v39, %v7538_v26  ;;  %v7745_v12 = vmax.f32 %v1553_v40, %v7396_v36 }
 0x208   : > { %v2193_v10 = vmax.f32 %v2001_v52, %v2161_v27  ;;  %v2468_v56 = vmax.f32 %v2404_v55, %v7661_v20  ;;  %v1786_v1 = vrot.slane %v7733_v33, 1  ;;  %v1850_v46 = vrot.slane %v7733_v33, 7  ;;  %v7759_v40 = vld [vmem:[#allocation2 + $0x28] sm:$0xff]  ;;  %v7775_v55 = vld [vmem:[#allocation2 + $0x58] sm:$0xff] }
 0x209   : > { %v7752_v54 = vmax.f32 %v2192_v8, %v2224_v18  ;;  %v2467_v30 = vmax.f32 %v2403_v48, %v7646_v38  ;;  %v2042_v4 = vrot.slane %v7733_v33, 2  ;;  %v2106_v39 = vrot.slane %v7733_v33, 6 }
 0x20a   : > { %v7757_v22 = vmax.f32 %v2193_v10, %v2121_v58  ;;  %v2532_v49 = vmax.f32 %v2468_v56, %v7739_v13  ;;  %v1770_v27 = vrot.slane %v7736_v15, 1  ;;  %v1834_v53 = vrot.slane %v7736_v15, 7 }
 0x20b   : > { %10179 = vst [vmem:[#allocation42_spill] sm:$0xff] %v7752_v54  ;;  %v7765_v47 = vmax.f32 %v2467_v30, %v7747_v41  ;;  %v2405_v18 = vmax.f32 %v2341_v3, %v7759_v40  ;;  %v2026_v52 = vrot.slane %v7736_v15, 2  ;;  %v2090_v58 = vrot.slane %v7736_v15, 6  ;;  %2288 = vst.msk [vmem:[#allocation2 + $0x90] sm:$0xff] %vm917_vm1, %v7752_v54 }
 0x20c   : > { %10180 = vst [vmem:[#allocation43_spill] sm:$0xff] %v7757_v22  ;;  %v2563_v8 = vrot.slane %v2532_v49, 1  ;;  %v2627_v48 = vrot.slane %v2532_v49, 7  ;;  %v2819_v10 = vrot.slane %v2532_v49, 2  ;;  %v2883_v56 = vrot.slane %v2532_v49, 6  ;;  %2289 = vst.msk [vmem:[#allocation2 + $0x98] sm:$0xff] %vm917_vm1, %v7757_v22 }
 0x20d   : > { %10181 = vst [vmem:[#allocation44_spill] sm:$0xff] %v7765_v47  ;;  %3524 = vrot.lane.b32.xlu1 %v7765_v47, %s5728_s25  ;;  %v2469_v61 = vmax.f32 %v2405_v18, %v7747_v41  ;;  %v1802_v19 = vsel %vm970_vm2, %v1770_v27, %v1786_v1  ;;  %v1818_v3 = vsel %vm970_vm2, %v1786_v1, %v1770_v27 }
 0x20e   : > { %v1866_v30 = vsel %vm1035_vm3, %v1834_v53, %v1850_v46  ;;  %v1882_v45 = vsel %vm1035_vm3, %v1850_v46, %v1834_v53  ;;  %v1907_v54 = vsel %vm931_vm5, %v1818_v3, -inf  ;;  %v1938_v22 = vmax.f32 %v7736_v15, %v1802_v19 }
 0x20f   : > { %v2058_v18 = vsel %vm1236_vm6, %v2026_v52, %v2042_v4  ;;  %v2533_v47 = vmax.f32 %v2469_v61, %v7775_v55  ;;  %v1939_v34 = vmax.f32 %v7733_v33, %v1907_v54  ;;  %v1970_v1 = vsel %vm932_vm4, %v1882_v45, -inf }
 0x210   : > { %v2074_v27 = vsel %vm1236_vm6, %v2042_v4, %v2026_v52  ;;  %v2002_v57 = vmax.f32 %v1938_v22, %v1970_v1  ;;  %v2122_v46 = vsel %vm1301_vm9, %v2090_v58, %v2106_v39  ;;  %v2138_v53 = vsel %vm1301_vm9, %v2106_v39, %v2090_v58 }
 0x211   : > { %v2163_v19 = vsel %vm935_vm7, %v2074_v27, -inf  ;;  %3528 = vrot.lane.b32.xlu0 %v2533_v47, %s5728_s25  ;;  %v2579_v61 = vrot.slane %v2533_v47, 1  ;;  %v2643_v54 = vrot.slane %v2533_v47, 7  ;;  %v2835_v3 = vrot.slane %v2533_v47, 2  ;;  %3526 = vrot.lane.b32.xlu1 %v2532_v49, %s5728_s25 }
 0x212   : > { %v2899_v43 = vrot.slane %v2533_v47, 6  ;;  %v2003_v45 = vmax.f32 %v1939_v34, %v1866_v30  ;;  %v2194_v4 = vmax.f32 %v2002_v57, %v2058_v18  ;;  %v2226_v22 = vsel %vm936_vm8, %v2138_v53, -inf }
 0x213   : > { %v1684_v52 = vmax.f32 %v7742_v21, %v7711_v9  ;;  %v2595_v39 = vsel %vm970_vm2, %v2563_v8, %v2579_v61  ;;  %v2611_v58 = vsel %vm970_vm2, %v2579_v61, %v2563_v8  ;;  %v2659_v1 = vsel %vm1035_vm3, %v2627_v48, %v2643_v54 }
 0x214   : > { %v2675_v27 = vsel %vm1035_vm3, %v2643_v54, %v2627_v48  ;;  %v2693_v34 = vsel %vm931_vm5, %v2611_v58, -inf  ;;  %v2724_v57 = vmax.f32 %v2532_v49, %v2595_v39  ;;  %v2851_v21 = vsel %vm1236_vm6, %v2819_v10, %v2835_v3 }
 0x215   : > { %v2756_v30 = vsel %vm932_vm4, %v2675_v27, -inf  ;;  %v2725_v18 = vmax.f32 %v2533_v47, %v2693_v34  ;;  %v2867_v8 = vsel %vm1236_vm6, %v2835_v3, %v2819_v10  ;;  %v2915_v53 = vsel %vm1301_vm9, %v2883_v56, %v2899_v43  ;;  %3428 = vrot.lane.b32.xlu0 %v7733_v33, %s5727_s24  ;;  %3426 = vrot.lane.b32.xlu1 %v7736_v15, %s5727_s24  ;;  %v7841_v10 = vld [vmem:[#allocation2 + $0xd8] sm:$0xff] }
 0x216   : > { %v2931_v48 = vsel %vm1301_vm9, %v2899_v43, %v2883_v56  ;;  %v2788_v49 = vmax.f32 %v2724_v57, %v2756_v30  ;;  %v2949_v61 = vsel %vm935_vm7, %v2867_v8, -inf  ;;  %v2195_v47 = vmax.f32 %v2003_v45, %v2163_v19 }
 0x217   : > { %v3012_v54 = vsel %vm936_vm8, %v2931_v48, -inf  ;;  %v2789_v3 = vmax.f32 %v2725_v18, %v2659_v1  ;;  %v7843_v39 = vmax.f32 %v2194_v4, %v2226_v22  ;;  %v1749_v43 = vmax.f32 %v1684_v52, %v7841_v10  ;;  %v7855_v4 = vld [vmem:[#allocation2 + $0xd0] sm:$0xff] }
 0x218   : > { %v1683_v33 = vmax.f32 %v7745_v12, %v7713_v35  ;;  %v2980_v56 = vmax.f32 %v2788_v49, %v2851_v21  ;;  %v7848_v58 = vmax.f32 %v2195_v47, %v2122_v46  ;;  %v2343_v27 = vmax.f32 %v7332_v7, %v7759_v40  ;;  %v7863_v40 = vld [vmem:[#allocation2 + $0x68] sm:$0xff] }
 0x219   : > { %v2342_v19 = vmax.f32 %v7330_v5, %v7709_v25  ;;  %v2981_v15 = vmax.f32 %v2789_v3, %v2949_v61  ;;  %v1787_v45 = vrot.slane %v1749_v43, 1  ;;  %v1851_v34 = vrot.slane %v1749_v43, 7  ;;  %3432 = vrot.lane.b32.xlu0 %v1749_v43, %s5727_s24  ;;  %2290 = vst.msk [vmem:[#allocation2 + $0xa0] sm:$0xff] %vm917_vm1, %v7843_v39 }
 0x21a   : > { %v2043_v1 = vrot.slane %v1749_v43, 2  ;;  %v7859_v12 = vmax.f32 %v2980_v56, %v3012_v54  ;;  %v2107_v46 = vrot.slane %v1749_v43, 6  ;;  %v1748_v22 = vmax.f32 %v1683_v33, %v7855_v4  ;;  %2291 = vst.msk [vmem:[#allocation2 + $0xa8] sm:$0xff] %vm917_vm1, %v7848_v58 }
 0x21b   : > { %v2407_v7 = vmax.f32 %v2343_v27, %v7646_v38  ;;  %v7867_v5 = vmax.f32 %v2981_v15, %v2915_v53  ;;  %v2406_v25 = vmax.f32 %v2342_v19, %v7643_v2  ;;  %v10182_v52 = vmax.f32 %v7413_v51, %v7646_v38  ;;  %v7901_v27 = vld [vmem:[#allocation2 + $0x60] sm:$0xff]  ;;  %v7903_v19 = vld [vmem:[#allocation2 + $0x78] sm:$0xff] }
 0x21c   : > { %v2344_v30 = vmax.f32 %v7410_v59, %v7643_v2  ;;  %v1771_v21 = vrot.slane %v1748_v22, 1  ;;  %v1835_v18 = vrot.slane %v1748_v22, 7  ;;  %v2027_v8 = vrot.slane %v1748_v22, 2  ;;  %3430 = vrot.lane.b32.xlu1 %v1748_v22, %s5727_s24  ;;  %3076 = vst.msk [vmem:[#allocation2 + $0x30] sm:$0xff] %vm917_vm1, %v7859_v12 }
 0x21d   : > { %v2409_v57 = vmax.f32 %v10182_v52, %v7747_v41  ;;  %v2091_v48 = vrot.slane %v1748_v22, 6  ;;  %v2471_v53 = vmax.f32 %v2407_v7, %v7775_v55  ;;  %v2470_v49 = vmax.f32 %v2406_v25, %v7739_v13  ;;  %3077 = vst.msk [vmem:[#allocation2 + $0x38] sm:$0xff] %vm917_vm1, %v7867_v5 }
 0x21e   : > { %v7885_v59 = vmax.f32 %v2344_v30, %v7661_v20  ;;  %v1803_v51 = vsel %vm970_vm2, %v1771_v21, %v1787_v45  ;;  %v1819_v2 = vsel %vm970_vm2, %v1787_v45, %v1771_v21  ;;  %v1867_v38 = vsel %vm1035_vm3, %v1835_v18, %v1851_v34 }
 0x21f   : > { %v2473_v61 = vmax.f32 %v2409_v57, %v7863_v40  ;;  %v1883_v54 = vsel %vm1035_vm3, %v1851_v34, %v1835_v18  ;;  %v1909_v47 = vsel %vm931_vm5, %v1819_v2, -inf  ;;  %v1940_v3 = vmax.f32 %v1748_v22, %v1803_v51 }
 0x220   : > { %v1972_v33 = vsel %vm932_vm4, %v1883_v54, -inf  ;;  %v2059_v56 = vsel %vm1236_vm6, %v2027_v8, %v2043_v1  ;;  %v1941_v15 = vmax.f32 %v1749_v43, %v1909_v47  ;;  %v2075_v45 = vsel %vm1236_vm6, %v2043_v1, %v2027_v8 }
 0x221   : > { %v2123_v34 = vsel %vm1301_vm9, %v2091_v48, %v2107_v46  ;;  %v2139_v22 = vsel %vm1301_vm9, %v2107_v46, %v2091_v48  ;;  %v2004_v7 = vmax.f32 %v1940_v3, %v1972_v33  ;;  %v2165_v25 = vsel %vm935_vm7, %v2075_v45, -inf }
 0x222   : > { %v2228_v52 = vsel %vm936_vm8, %v2139_v22, -inf  ;;  %v2535_v57 = vmax.f32 %v2471_v53, %v7863_v40  ;;  %v2005_v30 = vmax.f32 %v1941_v15, %v1867_v38  ;;  %v2534_v43 = vmax.f32 %v2470_v49, %v7901_v27 }
 0x223   : > { %v7918_v1 = vmax.f32 %v2473_v61, %v7903_v19  ;;  %v2472_v21 = vmax.f32 %v7885_v59, %v7901_v27  ;;  %v2196_v18 = vmax.f32 %v2004_v7, %v2059_v56 }
 0x224   : > { %v2580_v46 = vrot.slane %v2535_v57, 1  ;;  %v2644_v8 = vrot.slane %v2535_v57, 7  ;;  %v2836_v48 = vrot.slane %v2535_v57, 2  ;;  %3532 = vrot.lane.b32.xlu0 %v2535_v57, %s5728_s25  ;;  %v2197_v51 = vmax.f32 %v2005_v30, %v2165_v25  ;;  %3530 = vrot.lane.b32.xlu1 %v2534_v43, %s5728_s25 }
 0x225   : > { %v2900_v2 = vrot.slane %v2535_v57, 6  ;;  %v2564_v54 = vrot.slane %v2534_v43, 1  ;;  %v2628_v47 = vrot.slane %v2534_v43, 7  ;;  %v7924_v53 = vmax.f32 %v2196_v18, %v2228_v52 }
 0x226   : > { %v2820_v49 = vrot.slane %v2534_v43, 2  ;;  %v2884_v61 = vrot.slane %v2534_v43, 6  ;;  %v2581_v38 = vrot.slane %v7918_v1, 1  ;;  %v7927_v3 = vmax.f32 %v2197_v51, %v2123_v34 }
 0x227   : > { %v2596_v59 = vsel %vm970_vm2, %v2564_v54, %v2580_v46  ;;  %v2612_v33 = vsel %vm970_vm2, %v2580_v46, %v2564_v54  ;;  %v2660_v56 = vsel %vm1035_vm3, %v2628_v47, %v2644_v8  ;;  %v2676_v15 = vsel %vm1035_vm3, %v2644_v8, %v2628_v47  ;;  %2292 = vst.msk [vmem:[#allocation2 + $0xb0] sm:$0xff] %vm917_vm1, %v7924_v53 }
 0x228   : > { %v2695_v45 = vsel %vm931_vm5, %v2612_v33, -inf  ;;  %v2726_v22 = vmax.f32 %v2534_v43, %v2596_v59  ;;  %v2852_v34 = vsel %vm1236_vm6, %v2820_v49, %v2836_v48  ;;  %3536 = vrot.lane.b32.xlu0 %v7918_v1, %s5728_s25  ;;  %v2758_v25 = vsel %vm932_vm4, %v2676_v15, -inf  ;;  %v7951_v43 = vld [vmem:[#allocation2 + $0x70] sm:$0xff]  ;;  %2293 = vst.msk [vmem:[#allocation2 + $0xb8] sm:$0xff] %vm917_vm1, %v7927_v3 }
 0x229   : > { %v2727_v7 = vmax.f32 %v2535_v57, %v2695_v45  ;;  %v2868_v52 = vsel %vm1236_vm6, %v2836_v48, %v2820_v49  ;;  %v2916_v30 = vsel %vm1301_vm9, %v2884_v61, %v2900_v2  ;;  %v2932_v46 = vsel %vm1301_vm9, %v2900_v2, %v2884_v61 }
 0x22a   : > { %v2790_v18 = vmax.f32 %v2726_v22, %v2758_v25  ;;  %v2951_v57 = vsel %vm935_vm7, %v2868_v52, -inf  ;;  %v2645_v8 = vrot.slane %v7918_v1, 7  ;;  %v3014_v48 = vsel %vm936_vm8, %v2932_v46, -inf }
 0x22b   : > { %v2791_v51 = vmax.f32 %v2727_v7, %v2660_v56  ;;  %v2837_v54 = vrot.slane %v7918_v1, 2  ;;  %v2901_v47 = vrot.slane %v7918_v1, 6  ;;  %v2536_v59 = vmax.f32 %v2472_v21, %v7951_v43 }
 0x22c   : > { %v2982_v49 = vmax.f32 %v2790_v18, %v2852_v34  ;;  %v1556_v33 = vmax.f32 %v6972_v14, %v7538_v26  ;;  %v1555_v2 = vmax.f32 %v6967_v23, %v7396_v36  ;;  %v1558_v56 = vmax.f32 %v6948_v44, %v7652_v32 }
 0x22d   : > { %v2983_v61 = vmax.f32 %v2791_v51, %v2951_v57  ;;  %v1557_v15 = vmax.f32 %v6938_v16, %v7487_v62  ;;  %v2347_v45 = vmax.f32 %v7489_v60, %v7747_v41  ;;  %3534 = vrot.lane.b32.xlu1 %v2536_v59, %s5728_s25  ;;  %v2565_v21 = vrot.slane %v2536_v59, 1  ;;  %v8007_v57 = vld [vmem:[#allocation2 + $0xe8] sm:$0xff] }
 0x22e   : > { %v7975_v22 = vmax.f32 %v2982_v49, %v3014_v48  ;;  %v2629_v34 = vrot.slane %v2536_v59, 7  ;;  %v2821_v14 = vrot.slane %v2536_v59, 2  ;;  %v2885_v23 = vrot.slane %v2536_v59, 6  ;;  %v8014_v49 = vld [vmem:[#allocation2 + $0xe0] sm:$0xff] }
 0x22f   : > { %v7978_v26 = vmax.f32 %v2983_v61, %v2916_v30  ;;  %v1621_v36 = vmax.f32 %v1556_v33, %v7652_v32  ;;  %v1620_v44 = vmax.f32 %v1555_v2, %v7487_v62  ;;  %v2597_v16 = vsel %vm970_vm2, %v2565_v21, %v2581_v38 }
 0x230   : > { %v2613_v60 = vsel %vm970_vm2, %v2581_v38, %v2565_v21  ;;  %v2661_v41 = vsel %vm1035_vm3, %v2629_v34, %v2645_v8  ;;  %v2677_v7 = vsel %vm1035_vm3, %v2645_v8, %v2629_v34  ;;  %3078 = vst.msk [vmem:[#allocation2 + $0x40] sm:$0xff] %vm917_vm1, %v7975_v22  ;;  %v2728_v25 = vmax.f32 %v2536_v59, %v2597_v16 }
 0x231   : > { %v2697_v32 = vsel %vm931_vm5, %v2613_v60, -inf  ;;  %v2760_v62 = vsel %vm932_vm4, %v2677_v7, -inf  ;;  %v2853_v52 = vsel %vm1236_vm6, %v2821_v14, %v2837_v54  ;;  %3079 = vst.msk [vmem:[#allocation2 + $0x48] sm:$0xff] %vm917_vm1, %v7978_v26  ;;  %v2869_v30 = vsel %vm1236_vm6, %v2837_v54, %v2821_v14 }
 0x232   : > { %v2729_v38 = vmax.f32 %v7918_v1, %v2697_v32  ;;  %v2917_v18 = vsel %vm1301_vm9, %v2885_v23, %v2901_v47  ;;  %v2933_v46 = vsel %vm1301_vm9, %v2901_v47, %v2885_v23  ;;  %v2792_v8 = vmax.f32 %v2728_v25, %v2760_v62 }
 0x233   : > { %v2953_v51 = vsel %vm935_vm7, %v2869_v30, -inf  ;;  %v3016_v48 = vsel %vm936_vm8, %v2933_v46, -inf  ;;  %v1686_v1 = vmax.f32 %v1621_v36, %v7841_v10  ;;  %v1685_v59 = vmax.f32 %v1620_v44, %v7855_v4 }
 0x234   : > { %v2793_v54 = vmax.f32 %v2729_v38, %v2661_v41  ;;  %v1623_v33 = vmax.f32 %v1558_v56, %v7711_v9  ;;  %v1622_v47 = vmax.f32 %v1557_v15, %v7713_v35  ;;  %v2984_v2 = vmax.f32 %v2792_v8, %v2853_v52 }
 0x235   : > { %v1751_v61 = vmax.f32 %v1686_v1, %v8007_v57  ;;  %v8021_v21 = vmax.f32 %v2347_v45, %v7775_v55  ;;  %v2346_v34 = vmax.f32 %v7484_v24, %v7661_v20  ;;  %v1750_v23 = vmax.f32 %v1685_v59, %v8014_v49  ;;  %v8034_v24 = vld [vmem:[#allocation2 + $0xf8] sm:$0xff]  ;;  %v8036_v20 = vld [vmem:[#allocation2 + $0xf0] sm:$0xff] }
 0x236   : > { %v2985_v14 = vmax.f32 %v2793_v54, %v2953_v51  ;;  %v1688_v36 = vmax.f32 %v1623_v33, %v8007_v57  ;;  %v1687_v44 = vmax.f32 %v1622_v47, %v8014_v49  ;;  %v8028_v16 = vmax.f32 %v2984_v2, %v3016_v48 }
 0x237   : > { %v1788_v56 = vrot.slane %v1751_v61, 1  ;;  %v1852_v15 = vrot.slane %v1751_v61, 7  ;;  %v2044_v60 = vrot.slane %v1751_v61, 2  ;;  %3436 = vrot.lane.b32.xlu0 %v1751_v61, %s5727_s24  ;;  %v2108_v45 = vrot.slane %v1751_v61, 6  ;;  %3434 = vrot.lane.b32.xlu1 %v1750_v23, %s5727_s24 }
 0x238   : > { %v8031_v41 = vmax.f32 %v2985_v14, %v2917_v18  ;;  %v1772_v7 = vrot.slane %v1750_v23, 1  ;;  %v1836_v32 = vrot.slane %v1750_v23, 7  ;;  %v2028_v25 = vrot.slane %v1750_v23, 2  ;;  %3080 = vst.msk [vmem:[#allocation2 + $0x50] sm:$0xff] %vm917_vm1, %v8028_v16 }
 0x239   : > { %v2092_v62 = vrot.slane %v1750_v23, 6  ;;  %v1753_v52 = vmax.f32 %v1688_v36, %v8034_v24  ;;  %v1752_v38 = vmax.f32 %v1687_v44, %v8036_v20 }
 0x23a   : > { %v1804_v30 = vsel %vm970_vm2, %v1772_v7, %v1788_v56  ;;  %v1820_v18 = vsel %vm970_vm2, %v1788_v56, %v1772_v7  ;;  %v1868_v46 = vsel %vm1035_vm3, %v1836_v32, %v1852_v15  ;;  %v1884_v8 = vsel %vm1035_vm3, %v1852_v15, %v1836_v32  ;;  %3081 = vst.msk [vmem:[#allocation2 + $0x58] sm:$0xff] %vm917_vm1, %v8031_v41 }
 0x23b   : > { %v1911_v51 = vsel %vm931_vm5, %v1820_v18, -inf  ;;  %v1942_v48 = vmax.f32 %v1750_v23, %v1804_v30  ;;  %v1974_v1 = vsel %vm932_vm4, %v1884_v8, -inf  ;;  %v2060_v54 = vsel %vm1236_vm6, %v2028_v25, %v2044_v60  ;;  %3440 = vrot.lane.b32.xlu0 %v1753_v52, %s5727_s24  ;;  %3438 = vrot.lane.b32.xlu1 %v1752_v38, %s5727_s24 }
 0x23c   : > { %v1943_v59 = vmax.f32 %v1751_v61, %v1911_v51  ;;  %v2076_v33 = vsel %vm1236_vm6, %v2044_v60, %v2028_v25  ;;  %v2124_v47 = vsel %vm1301_vm9, %v2092_v62, %v2108_v45  ;;  %v2140_v2 = vsel %vm1301_vm9, %v2108_v45, %v2092_v62 }
 0x23d   : > { %v2006_v14 = vmax.f32 %v1942_v48, %v1974_v1  ;;  %v2167_v23 = vsel %vm935_vm7, %v2076_v33, -inf  ;;  %v2230_v36 = vsel %vm936_vm8, %v2140_v2, -inf  ;;  %v1789_v44 = vrot.slane %v1753_v52, 1  ;;  %v8087_v33 = vld [vmem:[#allocation2 + $0x88] sm:$0xff] }
 0x23e   : > { %v2007_v61 = vmax.f32 %v1943_v59, %v1868_v46  ;;  %v1853_v56 = vrot.slane %v1753_v52, 7  ;;  %v2045_v15 = vrot.slane %v1753_v52, 2  ;;  %v2109_v60 = vrot.slane %v1753_v52, 6 }
 0x23f   : > { %v2198_v7 = vmax.f32 %v2006_v14, %v2060_v54  ;;  %v1773_v32 = vrot.slane %v1752_v38, 1  ;;  %v1837_v25 = vrot.slane %v1752_v38, 7  ;;  %v2029_v30 = vrot.slane %v1752_v38, 2 }
 0x240   : > { %v2199_v18 = vmax.f32 %v2007_v61, %v2167_v23  ;;  %v2093_v45 = vrot.slane %v1752_v38, 6  ;;  %v2475_v62 = vmax.f32 %v8021_v21, %v7903_v19  ;;  %v2410_v8 = vmax.f32 %v2346_v34, %v7739_v13 }
 0x241   : > { %v8073_v51 = vmax.f32 %v2198_v7, %v2230_v36  ;;  %v1805_v48 = vsel %vm970_vm2, %v1773_v32, %v1789_v44  ;;  %v1821_v46 = vsel %vm970_vm2, %v1789_v44, %v1773_v32  ;;  %v1869_v1 = vsel %vm1035_vm3, %v1837_v25, %v1853_v56  ;;  %v8109_v32 = vld [vmem:[#allocation2 + $0x80] sm:$0xff] }
 0x242   : > { %v8081_v54 = vmax.f32 %v2199_v18, %v2124_v47  ;;  %v1885_v59 = vsel %vm1035_vm3, %v1853_v56, %v1837_v25  ;;  %v1913_v21 = vsel %vm931_vm5, %v1821_v46, -inf  ;;  %v1944_v34 = vmax.f32 %v1752_v38, %v1805_v48 }
 0x243   : > { %v1945_v2 = vmax.f32 %v1753_v52, %v1913_v21  ;;  %v1976_v14 = vsel %vm932_vm4, %v1885_v59, -inf  ;;  %v2061_v23 = vsel %vm1236_vm6, %v2029_v30, %v2045_v15  ;;  %v2077_v47 = vsel %vm1236_vm6, %v2045_v15, %v2029_v30  ;;  %2294 = vst.msk [vmem:[#allocation2 + $0xc0] sm:$0xff] %vm917_vm1, %v8073_v51 }
 0x244   : > { %v2008_v36 = vmax.f32 %v1944_v34, %v1976_v14  ;;  %v2125_v44 = vsel %vm1301_vm9, %v2093_v45, %v2109_v60  ;;  %v2141_v38 = vsel %vm1301_vm9, %v2109_v60, %v2093_v45  ;;  %v2169_v52 = vsel %vm935_vm7, %v2077_v47, -inf  ;;  %2295 = vst.msk [vmem:[#allocation2 + $0xc8] sm:$0xff] %vm917_vm1, %v8081_v54 }
 0x245   : > { %v2009_v61 = vmax.f32 %v1945_v2, %v1869_v1  ;;  %v2232_v56 = vsel %vm936_vm8, %v2141_v38, -inf  ;;  %v2539_v15 = vmax.f32 %v2475_v62, %v8087_v33  ;;  %v2474_v7 = vmax.f32 %v2410_v8, %v7951_v43 }
 0x246   : > { %v2200_v25 = vmax.f32 %v2008_v36, %v2061_v23  ;;  %v2349_v60 = vmax.f32 %v7557_v31, %v7775_v55  ;;  %v2348_v30 = vmax.f32 %v7554_v28, %v7739_v13  ;;  %v1560_v18 = vmax.f32 %v7179_v37, %v7711_v9 }
 0x247   : > { %v2201_v45 = vmax.f32 %v2009_v61, %v2169_v52  ;;  %3540 = vrot.lane.b32.xlu0 %v2539_v15, %s5728_s25  ;;  %v2582_v48 = vrot.slane %v2539_v15, 1  ;;  %v2646_v46 = vrot.slane %v2539_v15, 7  ;;  %v2838_v62 = vrot.slane %v2539_v15, 2  ;;  %v8147_v52 = vld [vmem:[#allocation2 + $0x98] sm:$0xff] }
 0x248   : > { %v8118_v1 = vmax.f32 %v2200_v25, %v2232_v56  ;;  %v2902_v8 = vrot.slane %v2539_v15, 6  ;;  %v2538_v59 = vmax.f32 %v2474_v7, %v8109_v32  ;;  %v2413_v21 = vmax.f32 %v2349_v60, %v7863_v40  ;;  %v8155_v60 = vld [vmem:[#allocation2 + $0x90] sm:$0xff] }
 0x249   : > { %v8122_v31 = vmax.f32 %v2201_v45, %v2125_v44  ;;  %v2412_v28 = vmax.f32 %v2348_v30, %v7901_v27  ;;  %v1625_v13 = vmax.f32 %v1560_v18, %v7841_v10  ;;  %v1559_v37 = vmax.f32 %v7174_v42, %v7713_v35  ;;  %v8157_v30 = vld [vmem:[#allocation2 + $0x108] sm:$0xff] }
 0x24a   : > { %3538 = vrot.lane.b32.xlu1 %v2538_v59, %s5728_s25  ;;  %v2566_v9 = vrot.slane %v2538_v59, 1  ;;  %v2630_v55 = vrot.slane %v2538_v59, 7  ;;  %v2822_v34 = vrot.slane %v2538_v59, 2  ;;  %v2886_v2 = vrot.slane %v2538_v59, 6  ;;  %2296 = vst.msk [vmem:[#allocation2 + $0xd0] sm:$0xff] %vm917_vm1, %v8118_v1 }
 0x24b   : > { %v2477_v14 = vmax.f32 %v2413_v21, %v8087_v33  ;;  %v2476_v23 = vmax.f32 %v2412_v28, %v8109_v32  ;;  %v1690_v47 = vmax.f32 %v1625_v13, %v8034_v24  ;;  %v8135_v36 = vmax.f32 %v1559_v37, %v7855_v4  ;;  %2297 = vst.msk [vmem:[#allocation2 + $0xd8] sm:$0xff] %vm917_vm1, %v8122_v31 }
 0x24c   : > { %v2598_v42 = vsel %vm970_vm2, %v2566_v9, %v2582_v48  ;;  %v2614_v35 = vsel %vm970_vm2, %v2582_v48, %v2566_v9  ;;  %v2662_v44 = vsel %vm1035_vm3, %v2630_v55, %v2646_v46  ;;  %v2678_v38 = vsel %vm1035_vm3, %v2646_v46, %v2630_v55 }
 0x24d   : > { %v2699_v61 = vsel %vm931_vm5, %v2614_v35, -inf  ;;  %v2730_v56 = vmax.f32 %v2538_v59, %v2598_v42  ;;  %v2762_v7 = vsel %vm932_vm4, %v2678_v38, -inf  ;;  %v2854_v25 = vsel %vm1236_vm6, %v2822_v34, %v2838_v62 }
 0x24e   : > { %v2731_v18 = vmax.f32 %v2539_v15, %v2699_v61  ;;  %v2870_v45 = vsel %vm1236_vm6, %v2838_v62, %v2822_v34  ;;  %v2918_v48 = vsel %vm1301_vm9, %v2886_v2, %v2902_v8  ;;  %v2934_v46 = vsel %vm1301_vm9, %v2902_v8, %v2886_v2 }
 0x24f   : > { %v2794_v59 = vmax.f32 %v2730_v56, %v2762_v7  ;;  %v2955_v21 = vsel %vm935_vm7, %v2870_v45, -inf  ;;  %v3018_v28 = vsel %vm936_vm8, %v2934_v46, -inf  ;;  %v2541_v13 = vmax.f32 %v2477_v14, %v8147_v52 }
 0x250   : > { %v2795_v37 = vmax.f32 %v2731_v18, %v2662_v44  ;;  %v2540_v15 = vmax.f32 %v2476_v23, %v8155_v60  ;;  %v8172_v62 = vmax.f32 %v1690_v47, %v8157_v30  ;;  %v1689_v9 = vmax.f32 %v8135_v36, %v8036_v20 }
 0x251   : > { %v2986_v55 = vmax.f32 %v2794_v59, %v2854_v25  ;;  %v2583_v8 = vrot.slane %v2541_v13, 1  ;;  %v2647_v34 = vrot.slane %v2541_v13, 7  ;;  %v2839_v2 = vrot.slane %v2541_v13, 2  ;;  %3544 = vrot.lane.b32.xlu0 %v2541_v13, %s5728_s25 }
 0x252   : > { %v2987_v42 = vmax.f32 %v2795_v37, %v2955_v21  ;;  %v2903_v35 = vrot.slane %v2541_v13, 6  ;;  %v2567_v38 = vrot.slane %v2540_v15, 1  ;;  %v2631_v61 = vrot.slane %v2540_v15, 7  ;;  %3542 = vrot.lane.b32.xlu1 %v2540_v15, %s5728_s25 }
 0x253   : > { %v8178_v14 = vmax.f32 %v2986_v55, %v3018_v28  ;;  %v2823_v23 = vrot.slane %v2540_v15, 2  ;;  %v2887_v47 = vrot.slane %v2540_v15, 6  ;;  %v1790_v44 = vrot.slane %v8172_v62, 1 }
 0x254   : > { %v8181_v56 = vmax.f32 %v2987_v42, %v2918_v48  ;;  %v2599_v36 = vsel %vm970_vm2, %v2567_v38, %v2583_v8  ;;  %v2615_v7 = vsel %vm970_vm2, %v2583_v8, %v2567_v38  ;;  %v2663_v25 = vsel %vm1035_vm3, %v2631_v61, %v2647_v34 }
 0x255   : > { %v2679_v18 = vsel %vm1035_vm3, %v2647_v34, %v2631_v61  ;;  %v2701_v45 = vsel %vm931_vm5, %v2615_v7, -inf  ;;  %v2732_v46 = vmax.f32 %v2540_v15, %v2599_v36  ;;  %v2855_v48 = vsel %vm1236_vm6, %v2823_v23, %v2839_v2  ;;  %3444 = vrot.lane.b32.xlu0 %v8172_v62, %s5727_s24  ;;  %3082 = vst.msk [vmem:[#allocation2 + $0x60] sm:$0xff] %vm917_vm1, %v8178_v14  ;;  %v8205_v15 = vld [vmem:[#allocation2 + $0x100] sm:$0xff] }
 0x256   : > { %v2733_v59 = vmax.f32 %v2541_v13, %v2701_v45  ;;  %v2764_v21 = vsel %vm932_vm4, %v2679_v18, -inf  ;;  %v2871_v28 = vsel %vm1236_vm6, %v2839_v2, %v2823_v23  ;;  %v2919_v37 = vsel %vm1301_vm9, %v2887_v47, %v2903_v35  ;;  %3083 = vst.msk [vmem:[#allocation2 + $0x68] sm:$0xff] %vm917_vm1, %v8181_v56 }
 0x257   : > { %v2796_v55 = vmax.f32 %v2732_v46, %v2764_v21  ;;  %v2935_v8 = vsel %vm1301_vm9, %v2903_v35, %v2887_v47  ;;  %v2957_v13 = vsel %vm935_vm7, %v2871_v28, -inf  ;;  %v1854_v34 = vrot.slane %v8172_v62, 7  ;;  %v1662_v28 = vld [vmem:[#allocation2 + $0x118] sm:$0xff] }
 0x258   : > { %v2797_v42 = vmax.f32 %v2733_v59, %v2663_v25  ;;  %v3020_v2 = vsel %vm936_vm8, %v2935_v8, -inf  ;;  %v2046_v38 = vrot.slane %v8172_v62, 2  ;;  %v2110_v61 = vrot.slane %v8172_v62, 6  ;;  %v1661_v8 = vld [vmem:[#allocation2 + $0x110] sm:$0xff] }
 0x259   : > { %v2988_v23 = vmax.f32 %v2796_v55, %v2855_v48  ;;  %v1754_v36 = vmax.f32 %v1689_v9, %v8205_v15  ;;  %v1564_v7 = vmax.f32 %v7276_v50, %v8007_v57  ;;  %v1563_v35 = vmax.f32 %v7264_v29, %v8014_v49 }
 0x25a   : > { %v2989_v47 = vmax.f32 %v2797_v42, %v2957_v13  ;;  %v1562_v25 = vmax.f32 %v7050_v17, %v7841_v10  ;;  %v1561_v18 = vmax.f32 %v7040_v0, %v7855_v4  ;;  %v1566_v45 = vmax.f32 %v7235_v11, %v8034_v24 }
 0x25b   : > { %v8229_v46 = vmax.f32 %v2988_v23, %v3020_v2  ;;  %v1774_v48 = vrot.slane %v1754_v36, 1  ;;  %v1838_v9 = vrot.slane %v1754_v36, 7  ;;  %v2030_v59 = vrot.slane %v1754_v36, 2  ;;  %3442 = vrot.lane.b32.xlu1 %v1754_v36, %s5727_s24  ;;  %v8261_v23 = vld [vmem:[#allocation2 + $0x128] sm:$0xff] }
 0x25c   : > { %v8232_v50 = vmax.f32 %v2989_v47, %v2919_v37  ;;  %v2094_v29 = vrot.slane %v1754_v36, 6  ;;  %v1629_v21 = vmax.f32 %v1564_v7, %v8034_v24  ;;  %v1628_v17 = vmax.f32 %v1563_v35, %v8036_v20 }
 0x25d   : > { %v1806_v0 = vsel %vm970_vm2, %v1774_v48, %v1790_v44  ;;  %v1822_v11 = vsel %vm970_vm2, %v1790_v44, %v1774_v48  ;;  %v1870_v10 = vsel %vm1035_vm3, %v1838_v9, %v1854_v34  ;;  %v1886_v4 = vsel %vm1035_vm3, %v1854_v34, %v1838_v9  ;;  %3084 = vst.msk [vmem:[#allocation2 + $0x70] sm:$0xff] %vm917_vm1, %v8229_v46 }
 0x25e   : > { %v1915_v24 = vsel %vm931_vm5, %v1822_v11, -inf  ;;  %v1946_v37 = vmax.f32 %v1754_v36, %v1806_v0  ;;  %v1978_v55 = vsel %vm932_vm4, %v1886_v4, -inf  ;;  %v2062_v44 = vsel %vm1236_vm6, %v2030_v59, %v2046_v38  ;;  %3085 = vst.msk [vmem:[#allocation2 + $0x78] sm:$0xff] %vm917_vm1, %v8232_v50  ;;  %v10183_v11 = vld [vmem:[#allocation41_spill] sm:$0xff] }
 0x25f   : > { %v1947_v13 = vmax.f32 %v8172_v62, %v1915_v24  ;;  %v2078_v34 = vsel %vm1236_vm6, %v2046_v38, %v2030_v59  ;;  %v2126_v42 = vsel %vm1301_vm9, %v2094_v29, %v2110_v61  ;;  %v2142_v2 = vsel %vm1301_vm9, %v2110_v61, %v2094_v29  ;;  %v8267_v62 = vld [vmem:[#allocation2 + $0x120] sm:$0xff] }
 0x260   : > { %v2010_v36 = vmax.f32 %v1946_v37, %v1978_v55  ;;  %v2171_v7 = vsel %vm935_vm7, %v2078_v34, -inf  ;;  %v2234_v35 = vsel %vm936_vm8, %v2142_v2, -inf  ;;  %v1694_v47 = vmax.f32 %v1629_v21, %v1662_v28 }
 0x261   : > { %v2011_v48 = vmax.f32 %v1947_v13, %v1870_v10  ;;  %v1693_v38 = vmax.f32 %v1628_v17, %v1661_v8  ;;  %v1627_v9 = vmax.f32 %v1562_v25, %v8007_v57  ;;  %v1626_v59 = vmax.f32 %v1561_v18, %v8014_v49 }
 0x262   : > { %v2202_v0 = vmax.f32 %v2010_v36, %v2062_v44  ;;  %v1759_v61 = vmax.f32 %v1694_v47, %v8261_v23  ;;  %v8273_v29 = vmax.f32 %v1566_v45, %v8157_v30  ;;  %v1565_v4 = vmax.f32 %v10183_v11, %v8036_v20 }
 0x263   : > { %v2203_v24 = vmax.f32 %v2011_v48, %v2171_v7  ;;  %v1758_v21 = vmax.f32 %v1693_v38, %v8267_v62  ;;  %v1692_v37 = vmax.f32 %v1627_v9, %v8157_v30  ;;  %v1691_v17 = vmax.f32 %v1626_v59, %v8205_v15 }
 0x264   : > { %v8280_v10 = vmax.f32 %v2202_v0, %v2234_v35  ;;  %v1792_v57 = vrot.slane %v1759_v61, 1  ;;  %v1856_v49 = vrot.slane %v1759_v61, 7  ;;  %v2048_v25 = vrot.slane %v1759_v61, 2  ;;  %3452 = vrot.lane.b32.xlu0 %v1759_v61, %s5727_s24 }
 0x265   : > { %v8283_v18 = vmax.f32 %v2203_v24, %v2126_v42  ;;  %v2112_v45 = vrot.slane %v1759_v61, 6  ;;  %v1776_v55 = vrot.slane %v1758_v21, 1  ;;  %v1840_v44 = vrot.slane %v1758_v21, 7  ;;  %3450 = vrot.lane.b32.xlu1 %v1758_v21, %s5727_s24 }
 0x266   : > { %v2032_v20 = vrot.slane %v1758_v21, 2  ;;  %v2096_v13 = vrot.slane %v1758_v21, 6  ;;  %v1757_v34 = vmax.f32 %v1692_v37, %v1662_v28  ;;  %v1756_v30 = vmax.f32 %v1691_v17, %v1661_v8  ;;  %2298 = vst.msk [vmem:[#allocation2 + $0xe0] sm:$0xff] %vm917_vm1, %v8280_v10 }
 0x267   : > { %v1808_v2 = vsel %vm970_vm2, %v1776_v55, %v1792_v57  ;;  %v1824_v36 = vsel %vm970_vm2, %v1792_v57, %v1776_v55  ;;  %v1872_v42 = vsel %vm1035_vm3, %v1840_v44, %v1856_v49  ;;  %v1888_v7 = vsel %vm1035_vm3, %v1856_v49, %v1840_v44  ;;  %2299 = vst.msk [vmem:[#allocation2 + $0xe8] sm:$0xff] %vm917_vm1, %v8283_v18 }
 0x268   : > { %v1919_v28 = vsel %vm931_vm5, %v1824_v36, -inf  ;;  %v1950_v8 = vmax.f32 %v1758_v21, %v1808_v2  ;;  %v1982_v35 = vsel %vm932_vm4, %v1888_v7, -inf  ;;  %v2064_v47 = vsel %vm1236_vm6, %v2032_v20, %v2048_v25  ;;  %3448 = vrot.lane.b32.xlu0 %v1757_v34, %s5727_s24 }
 0x269   : > { %v1951_v48 = vmax.f32 %v1759_v61, %v1919_v28  ;;  %v2080_v38 = vsel %vm1236_vm6, %v2048_v25, %v2032_v20  ;;  %v2128_v9 = vsel %vm1301_vm9, %v2096_v13, %v2112_v45  ;;  %v2144_v59 = vsel %vm1301_vm9, %v2112_v45, %v2096_v13  ;;  %3446 = vrot.lane.b32.xlu1 %v1756_v30, %s5727_s24 }
 0x26a   : > { %v2014_v0 = vmax.f32 %v1950_v8, %v1982_v35  ;;  %v2175_v11 = vsel %vm935_vm7, %v2080_v38, -inf  ;;  %v2238_v24 = vsel %vm936_vm8, %v2144_v59, -inf  ;;  %v1791_v21 = vrot.slane %v1757_v34, 1 }
 0x26b   : > { %v2015_v61 = vmax.f32 %v1951_v48, %v1872_v42  ;;  %v1855_v37 = vrot.slane %v1757_v34, 7  ;;  %v2047_v17 = vrot.slane %v1757_v34, 2  ;;  %v2111_v57 = vrot.slane %v1757_v34, 6 }
 0x26c   : > { %v2206_v49 = vmax.f32 %v2014_v0, %v2064_v47  ;;  %v1775_v25 = vrot.slane %v1756_v30, 1  ;;  %v1839_v55 = vrot.slane %v1756_v30, 7  ;;  %v2031_v44 = vrot.slane %v1756_v30, 2 }
 0x26d   : > { %v2207_v20 = vmax.f32 %v2015_v61, %v2175_v11  ;;  %v2095_v45 = vrot.slane %v1756_v30, 6  ;;  %v1696_v13 = vmax.f32 %v8273_v29, %v8261_v23  ;;  %v1630_v2 = vmax.f32 %v1565_v4, %v8205_v15  ;;  %v8333_v4 = vld [vmem:[#allocation2 + $0x138] sm:$0xff] }
 0x26e   : > { %v8319_v36 = vmax.f32 %v2206_v49, %v2238_v24  ;;  %v1807_v7 = vsel %vm970_vm2, %v1775_v25, %v1791_v21  ;;  %v1823_v42 = vsel %vm970_vm2, %v1791_v21, %v1775_v25  ;;  %v1871_v28 = vsel %vm1035_vm3, %v1839_v55, %v1855_v37  ;;  %v10184_v49 = vld [vmem:[#allocation33_spill] sm:$0xff] }
 0x26f   : > { %v8327_v8 = vmax.f32 %v2207_v20, %v2128_v9  ;;  %v1887_v35 = vsel %vm1035_vm3, %v1855_v37, %v1839_v55  ;;  %v1917_v29 = vsel %vm931_vm5, %v1823_v42, -inf  ;;  %v1948_v15 = vmax.f32 %v1756_v30, %v1807_v7  ;;  %v1728_v37 = vld [vmem:[#allocation2 + $0x130] sm:$0xff] }
 0x270   : > { %v1949_v47 = vmax.f32 %v1757_v34, %v1917_v29  ;;  %v1980_v48 = vsel %vm932_vm4, %v1887_v35, -inf  ;;  %v2063_v38 = vsel %vm1236_vm6, %v2031_v44, %v2047_v17  ;;  %v2079_v9 = vsel %vm1236_vm6, %v2047_v17, %v2031_v44  ;;  %2302 = vst.msk [vmem:[#allocation2 + $0x100] sm:$0xff] %vm917_vm1, %v8319_v36  ;;  %v10186_v44 = vld [vmem:[#allocation43_spill] sm:$0xff] }
 0x271   : > { %v2012_v59 = vmax.f32 %v1948_v15, %v1980_v48  ;;  %v2127_v0 = vsel %vm1301_vm9, %v2095_v45, %v2111_v57  ;;  %v2143_v30 = vsel %vm1301_vm9, %v2111_v57, %v2095_v45  ;;  %v2173_v34 = vsel %vm935_vm7, %v2079_v9, -inf  ;;  %2303 = vst.msk [vmem:[#allocation2 + $0x108] sm:$0xff] %vm917_vm1, %v8327_v8  ;;  %v10185_v57 = vld [vmem:[#allocation36_spill] sm:$0xff]  ;;  %v8365_v29 = vld [vmem:[#allocation2 + $0xa8] sm:$0xff] }
 0x272   : > { %v2013_v11 = vmax.f32 %v1949_v47, %v1871_v28  ;;  %v2236_v24 = vsel %vm936_vm8, %v2143_v30, -inf  ;;  %v1761_v21 = vmax.f32 %v1696_v13, %v8333_v4  ;;  %v1695_v61 = vmax.f32 %v1630_v2, %v8267_v62  ;;  %v10187_v47 = vld [vmem:[#allocation42_spill] sm:$0xff] }
 0x273   : > { %v2204_v17 = vmax.f32 %v2012_v59, %v2063_v38  ;;  %v2351_v25 = vmax.f32 %v10184_v49, %v7863_v40  ;;  %v2350_v55 = vmax.f32 %v10185_v57, %v7901_v27  ;;  %v2353_v20 = vmax.f32 %v10186_v44, %v7903_v19  ;;  %v8400_v44 = vld [vmem:[#allocation2 + $0xb8] sm:$0xff] }
 0x274   : > { %v2205_v45 = vmax.f32 %v2013_v11, %v2173_v34  ;;  %v1793_v7 = vrot.slane %v1761_v21, 1  ;;  %v1857_v42 = vrot.slane %v1761_v21, 7  ;;  %v2049_v28 = vrot.slane %v1761_v21, 2  ;;  %3456 = vrot.lane.b32.xlu0 %v1761_v21, %s5727_s24 }
 0x275   : > { %v8362_v13 = vmax.f32 %v2204_v17, %v2236_v24  ;;  %v2113_v62 = vrot.slane %v1761_v21, 6  ;;  %v1760_v2 = vmax.f32 %v1695_v61, %v1728_v37  ;;  %v2415_v35 = vmax.f32 %v2351_v25, %v7903_v19 }
 0x276   : > { %v8367_v40 = vmax.f32 %v2205_v45, %v2127_v0  ;;  %v2414_v27 = vmax.f32 %v2350_v55, %v7951_v43  ;;  %v2417_v15 = vmax.f32 %v2353_v20, %v8087_v33  ;;  %v2352_v48 = vmax.f32 %v10187_v47, %v7951_v43  ;;  %v8398_v55 = vld [vmem:[#allocation2 + $0xa0] sm:$0xff] }
 0x277   : > { %v1777_v38 = vrot.slane %v1760_v2, 1  ;;  %v1841_v9 = vrot.slane %v1760_v2, 7  ;;  %v2033_v59 = vrot.slane %v1760_v2, 2  ;;  %v2097_v30 = vrot.slane %v1760_v2, 6  ;;  %2300 = vst.msk [vmem:[#allocation2 + $0xf0] sm:$0xff] %vm917_vm1, %v8362_v13  ;;  %3454 = vrot.lane.b32.xlu1 %v1760_v2, %s5727_s24  ;;  %s323_s24 = sand.u32 1, %s5716_s10  }
 0x278   : > { %2301 = vst.msk [vmem:[#allocation2 + $0xf8] sm:$0xff] %vm917_vm1, %v8367_v40  ;;  %v2479_v19 = vmax.f32 %v2415_v35, %v8147_v52  ;;  %v2478_v0 = vmax.f32 %v2414_v27, %v8155_v60  ;;  %v2481_v34 = vmax.f32 %v2417_v15, %v8365_v29  ;;  %v8382_v43 = vmax.f32 %v2352_v48, %v8109_v32  ;;  %s4807_s27 = sshll.u32 %s323_s24, 7  ;;  %s9900_s13 = scalar_lea.sflag [#allocation4], %s323_s24 }
 0x279   : > { %v1809_v11 = vsel %vm970_vm2, %v1777_v38, %v1793_v7  ;;  %v1825_v24 = vsel %vm970_vm2, %v1793_v7, %v1777_v38  ;;  %v1873_v61 = vsel %vm1035_vm3, %v1841_v9, %v1857_v42  ;;  %v1889_v37 = vsel %vm1035_vm3, %v1857_v42, %v1841_v9 }
 0x27a   : > { %v1921_v17 = vsel %vm931_vm5, %v1825_v24, -inf  ;;  %v1952_v49 = vmax.f32 %v1760_v2, %v1809_v11  ;;  %v1984_v25 = vsel %vm932_vm4, %v1889_v37, -inf  ;;  %v2065_v57 = vsel %vm1236_vm6, %v2033_v59, %v2049_v28  ;;  %v8408_v2 = vpop.permute.xlu0 %3394 }
 0x27b   : > { %v1953_v20 = vmax.f32 %v1761_v21, %v1921_v17  ;;  %v2081_v45 = vsel %vm1236_vm6, %v2049_v28, %v2033_v59  ;;  %v2129_v7 = vsel %vm1301_vm9, %v2097_v30, %v2113_v62  ;;  %v2145_v42 = vsel %vm1301_vm9, %v2113_v62, %v2097_v30  ;;  %10188 = vst [vmem:[#allocation41_spill] sm:$0xff] %v8408_v2 }
 0x27c   : > { %v2016_v35 = vmax.f32 %v1952_v49, %v1984_v25  ;;  %v2177_v27 = vsel %vm935_vm7, %v2081_v45, -inf  ;;  %v2240_v15 = vsel %vm936_vm8, %v2145_v42, -inf  ;;  %v2543_v21 = vmax.f32 %v2479_v19, %v8365_v29 }
 0x27d   : > { %v2017_v47 = vmax.f32 %v1953_v20, %v1873_v61  ;;  %v2542_v28 = vmax.f32 %v2478_v0, %v8398_v55  ;;  %v8417_v48 = vmax.f32 %v2481_v34, %v8400_v44  ;;  %v2480_v62 = vmax.f32 %v8382_v43, %v8398_v55 }
 0x27e   : > { %v2208_v38 = vmax.f32 %v2016_v35, %v2065_v57  ;;  %v2584_v9 = vrot.slane %v2543_v21, 1  ;;  %v2648_v59 = vrot.slane %v2543_v21, 7  ;;  %v2840_v30 = vrot.slane %v2543_v21, 2  ;;  %3548 = vrot.lane.b32.xlu0 %v2543_v21, %s5728_s25  ;;  %v8434_v45 = vpop.permute.xlu0 %3396 }
 0x27f   : > { %v2209_v11 = vmax.f32 %v2017_v47, %v2177_v27  ;;  %v2904_v24 = vrot.slane %v2543_v21, 6  ;;  %v2568_v37 = vrot.slane %v2542_v28, 1  ;;  %v2632_v17 = vrot.slane %v2542_v28, 7  ;;  %3546 = vrot.lane.b32.xlu1 %v2542_v28, %s5728_s25  ;;  %v8425_v0 = vld [vmem:[#allocation2 + $0xf8] sm:$0xff]  ;;  %10189 = vst [vmem:[#allocation33_spill] sm:$0xff] %v8434_v45  ;;  %v10191_v45 = vld [vmem:[#allocation44_spill] sm:$0xff] }
 0x280   : > { %v8423_v19 = vmax.f32 %v2208_v38, %v2240_v15  ;;  %v2824_v34 = vrot.slane %v2542_v28, 2  ;;  %v2888_v61 = vrot.slane %v2542_v28, 6  ;;  %v2585_v43 = vrot.slane %v8417_v48, 1 }
 0x281   : > { %v2273_v49 = vmax.f32 %v2209_v11, %v2129_v7  ;;  %v2600_v25 = vsel %vm970_vm2, %v2568_v37, %v2584_v9  ;;  %v2616_v57 = vsel %vm970_vm2, %v2584_v9, %v2568_v37  ;;  %v2664_v20 = vsel %vm1035_vm3, %v2632_v17, %v2648_v59 }
 0x282   : > { %2304 = vst.msk [vmem:[#allocation2 + $0x110] sm:$0xff] %vm917_vm1, %v8423_v19  ;;  %v2680_v42 = vsel %vm1035_vm3, %v2648_v59, %v2632_v17  ;;  %v2703_v7 = vsel %vm931_vm5, %v2616_v57, -inf  ;;  %v2734_v35 = vmax.f32 %v2542_v28, %v2600_v25  ;;  %v2856_v27 = vsel %vm1236_vm6, %v2824_v34, %v2840_v30  ;;  %3552 = vrot.lane.b32.xlu0 %v8417_v48, %s5728_s25  ;;  %v8452_v59 = vld [vmem:[#allocation2 + $0xb0] sm:$0xff]  ;;  %v8454_v28 = vld [vmem:[#allocation2 + $0x108] sm:$0xff] }
 0x283   : > { %v2369_v15 = vmax.f32 %v2273_v49, %v8425_v0  ;;  %2305 = vst.msk [vmem:[#allocation2 + $0x118] sm:$0xff] %vm917_vm1, %v2273_v49  ;;  %v2735_v47 = vmax.f32 %v2543_v21, %v2703_v7  ;;  %v2766_v38 = vsel %vm932_vm4, %v2680_v42, -inf  ;;  %v2872_v9 = vsel %vm1236_vm6, %v2840_v30, %v2824_v34 }
 0x284   : > { %v2798_v11 = vmax.f32 %v2734_v35, %v2766_v38  ;;  %v2920_v37 = vsel %vm1301_vm9, %v2888_v61, %v2904_v24  ;;  %v2936_v17 = vsel %vm1301_vm9, %v2904_v24, %v2888_v61  ;;  %v2959_v21 = vsel %vm935_vm7, %v2872_v9, -inf  ;;  %v10190_v38 = vld [vmem:[#allocation37_spill] sm:$0xff] }
 0x285   : > { %v2433_v49 = vmax.f32 %v2369_v15, %v8454_v28  ;;  %v2799_v25 = vmax.f32 %v2735_v47, %v2664_v20  ;;  %v3022_v30 = vsel %vm936_vm8, %v2936_v17, -inf  ;;  %v2649_v34 = vrot.slane %v8417_v48, 7  ;;  %v8472_v20 = vpop.permute.xlu0 %3398 }
 0x286   : > { %v2990_v57 = vmax.f32 %v2798_v11, %v2856_v27  ;;  %v2841_v42 = vrot.slane %v8417_v48, 2  ;;  %v2905_v7 = vrot.slane %v8417_v48, 6  ;;  %v2544_v35 = vmax.f32 %v2480_v62, %v8452_v59  ;;  %10192 = vst [vmem:[#allocation36_spill] sm:$0xff] %v8472_v20 }
 0x287   : > { %v2497_v24 = vmax.f32 %v2433_v49, %v8261_v23  ;;  %v2991_v61 = vmax.f32 %v2799_v25, %v2959_v21  ;;  %v2562_v9 = vrot.slane %v10190_v38, 1  ;;  %v2578_v15 = vrot.slane %v10191_v45, 1 }
 0x288   : > { %v8474_v47 = vmax.f32 %v2990_v57, %v3022_v30  ;;  %v2569_v17 = vrot.slane %v2544_v35, 1  ;;  %v2633_v2 = vrot.slane %v2544_v35, 7  ;;  %v2825_v27 = vrot.slane %v2544_v35, 2  ;;  %3550 = vrot.lane.b32.xlu1 %v2544_v35, %s5728_s25 }
 0x289   : > { %v8478_v11 = vmax.f32 %v2497_v24, %v8333_v4  ;;  %v8480_v62 = vmax.f32 %v2991_v61, %v2920_v37  ;;  %v2889_v23 = vrot.slane %v2544_v35, 6  ;;  %v2610_v21 = vsel %vm970_vm2, %v2578_v15, %v2562_v9  ;;  %v8494_v4 = vpop.permute.xlu1 %3402  ;;  %v8516_v20 = vpop.permute.xlu0 %3400 }
 0x28a   : > { %10193 = vst [vmem:[#allocation43_spill] sm:$0xff] %v8474_v47  ;;  %v2601_v49 = vsel %vm970_vm2, %v2569_v17, %v2585_v43  ;;  %v2617_v25 = vsel %vm970_vm2, %v2585_v43, %v2569_v17  ;;  %v2665_v30 = vsel %vm1035_vm3, %v2633_v2, %v2649_v34  ;;  %v2681_v57 = vsel %vm1035_vm3, %v2649_v34, %v2633_v2 }
 0x28b   : > { %10194 = vst [vmem:[#allocation42_spill] sm:$0xff] %v8478_v11  ;;  %3086 = vst.msk [vmem:[#allocation2 + $0x80] sm:$0xff] %vm917_vm1, %v8474_v47  ;;  %v2705_v37 = vsel %vm931_vm5, %v2617_v25, -inf  ;;  %v2736_v24 = vmax.f32 %v2544_v35, %v2601_v49  ;;  %v2768_v61 = vsel %vm932_vm4, %v2681_v57, -inf  ;;  %v2857_v43 = vsel %vm1236_vm6, %v2825_v27, %v2841_v42 }
 0x28c   : > { %10195 = vst [vmem:[#allocation37_spill] sm:$0xff] %v8494_v4  ;;  %3087 = vst.msk [vmem:[#allocation2 + $0x88] sm:$0xff] %vm917_vm1, %v8480_v62  ;;  %v2737_v2 = vmax.f32 %v8417_v48, %v2705_v37  ;;  %v2873_v34 = vsel %vm1236_vm6, %v2841_v42, %v2825_v27  ;;  %v2921_v17 = vsel %vm1301_vm9, %v2889_v23, %v2905_v7  ;;  %v2626_v4 = vrot.slane %v10190_v38, 7 }
 0x28d   : > { %v2937_v35 = vsel %vm1301_vm9, %v2905_v7, %v2889_v23  ;;  %v2800_v49 = vmax.f32 %v2736_v24, %v2768_v61  ;;  %v2961_v25 = vsel %vm935_vm7, %v2873_v34, -inf  ;;  %10196 = vst [vmem:[#allocation44_spill] sm:$0xff] %v8516_v20  ;;  %v2642_v42 = vrot.slane %v10191_v45, 7  ;;  %v8530_v20 = vpop.permute.xlu1 %3406 }
 0x28e   : > { %v3024_v57 = vsel %vm936_vm8, %v2937_v35, -inf  ;;  %v2801_v48 = vmax.f32 %v2737_v2, %v2665_v30  ;;  %v2691_v27 = vsel %vm931_vm5, %v2610_v21, -inf  ;;  %v2818_v37 = vrot.slane %v10190_v38, 2  ;;  %10197 = vst [vmem:[#allocation45_spill] sm:$0xff] %v8530_v20 }
 0x28f   : > { %v2992_v7 = vmax.f32 %v2800_v49, %v2857_v43  ;;  %v2723_v23 = vmax.f32 %v10191_v45, %v2691_v27  ;;  %v2834_v24 = vrot.slane %v10191_v45, 2  ;;  %v2882_v61 = vrot.slane %v10190_v38, 6 }
 0x290   : > { %v2993_v34 = vmax.f32 %v2801_v48, %v2961_v25  ;;  %v2658_v35 = vsel %vm1035_vm3, %v2626_v4, %v2642_v42  ;;  %v2898_v30 = vrot.slane %v10191_v45, 6  ;;  %v2594_v2 = vsel %vm970_vm2, %v2562_v9, %v2578_v15 }
 0x291   : > { %v8532_v21 = vmax.f32 %v2992_v7, %v3024_v57  ;;  %v2787_v43 = vmax.f32 %v2723_v23, %v2658_v35  ;;  %v2866_v49 = vsel %vm1236_vm6, %v2834_v24, %v2818_v37  ;;  %v2674_v27 = vsel %vm1035_vm3, %v2642_v42, %v2626_v4  ;;  %v8549_v57 = vpop.permute.xlu0 %3404 }
 0x292   : > { %v8538_v25 = vmax.f32 %v2993_v34, %v2921_v17  ;;  %v2947_v48 = vsel %vm935_vm7, %v2866_v49, -inf  ;;  %v2722_v45 = vmax.f32 %v10190_v38, %v2594_v2  ;;  %v2754_v9 = vsel %vm932_vm4, %v2674_v27, -inf  ;;  %10200 = vst [vmem:[#allocation48_spill] sm:$0xff] %v8549_v57  ;;  %v3107_v17 = vld [vmem:[#allocation2 + $0x8] sm:$0xff]  ;;  %v3171_v2 = vld [vmem:[#allocation2 + $0x18] sm:$0xff] }
 0x293   : > { %10198 = vst [vmem:[#allocation46_spill] sm:$0xff] %v8532_v21  ;;  %v2979_v47 = vmax.f32 %v2787_v43, %v2947_v48  ;;  %v2930_v15 = vsel %vm1301_vm9, %v2898_v30, %v2882_v61  ;;  %3088 = vst.msk [vmem:[#allocation2 + $0x90] sm:$0xff] %vm917_vm1, %v8532_v21  ;;  %v2914_v4 = vsel %vm1301_vm9, %v2882_v61, %v2898_v30  ;;  %v8565_v43 = vld [vmem:[#allocation2 + $0xc8] sm:$0xff]  ;;  %v8577_v49 = vld [vmem:[#allocation2 + $0x38] sm:$0xff] }
 0x294   : > { %10199 = vst [vmem:[#allocation47_spill] sm:$0xff] %v8538_v25  ;;  %v2786_v42 = vmax.f32 %v2722_v45, %v2754_v9  ;;  %v2850_v38 = vsel %vm1236_vm6, %v2818_v37, %v2834_v24  ;;  %3089 = vst.msk [vmem:[#allocation2 + $0x98] sm:$0xff] %vm917_vm1, %v8538_v25  ;;  %v2355_v23 = vmax.f32 %v7848_v58, %v8087_v33  ;;  %v3010_v30 = vsel %vm936_vm8, %v2930_v15, -inf  ;;  %v3106_v33 = vld [vmem:[#allocation2] sm:$0xff]  ;;  %v8579_v48 = vld [vmem:[#allocation2 + $0xd8] sm:$0xff] }
 0x295   : > { %v3043_v7 = vmax.f32 %v2979_v47, %v2914_v4  ;;  %v2354_v34 = vmax.f32 %v7843_v39, %v8109_v32  ;;  %v2357_v35 = vmax.f32 %v7927_v3, %v8147_v52  ;;  %v2356_v37 = vmax.f32 %v7924_v53, %v8155_v60  ;;  %v8569_v47 = vpop.permute.xlu1 %3410  ;;  %v8574_v32 = vld [vmem:[#allocation2 + $0xc0] sm:$0xff]  ;;  %v3170_v9 = vld [vmem:[#allocation2 + $0x10] sm:$0xff] }
 0x296   : > { %v2978_v61 = vmax.f32 %v2786_v42, %v2850_v38  ;;  %10201 = vst [vmem:[#allocation49_spill] sm:$0xff] %v8569_v47  ;;  %v2419_v39 = vmax.f32 %v2355_v23, %v8147_v52  ;;  %v8589_v42 = vld [vmem:[#allocation2 + $0x48] sm:$0xff] }
 0x297   : > { %3075 = vst.msk [vmem:[#allocation2 + $0x28] sm:$0xff] %vm917_vm1, %v3043_v7  ;;  %v3139_v58 = vmax.f32 %v3043_v7, %v3107_v17  ;;  %v2418_v3 = vmax.f32 %v2354_v34, %v8155_v60  ;;  %v2421_v24 = vmax.f32 %v2357_v35, %v8365_v29  ;;  %v2420_v53 = vmax.f32 %v2356_v37, %v8398_v55  ;;  %v8585_v60 = vld [vmem:[#allocation2 + $0xd0] sm:$0xff]  ;;  %v8587_v17 = vpop.permute.xlu0 %3408 }
 0x298   : > { %v3042_v27 = vmax.f32 %v2978_v61, %v3010_v30  ;;  %v2483_v15 = vmax.f32 %v2419_v39, %v8400_v44  ;;  %10202 = vst [vmem:[#allocation50_spill] sm:$0xff] %v8587_v17  ;;  %v8594_v34 = vld [vmem:[#allocation2 + $0x30] sm:$0xff]  ;;  %v8632_v17 = vld [vmem:[#allocation2 + $0x58] sm:$0xff] }
 0x299   : > { %v3203_v45 = vmax.f32 %v3139_v58, %v3171_v2  ;;  %v2482_v4 = vmax.f32 %v2418_v3, %v8452_v59  ;;  %v2485_v52 = vmax.f32 %v2421_v24, %v8565_v43  ;;  %v2484_v7 = vmax.f32 %v2420_v53, %v8574_v32  ;;  %v8610_v3 = vpop.permute.xlu1 %3414 }
 0x29a   : > { %3074 = vst.msk [vmem:[#allocation2 + $0x20] sm:$0xff] %vm917_vm1, %v3042_v27  ;;  %v3138_v38 = vmax.f32 %v3042_v27, %v3106_v33  ;;  %v8597_v35 = vmax.f32 %v2483_v15, %v8565_v43  ;;  %v3141_v58 = vmax.f32 %v7867_v5, %v3171_v2  ;;  %v3140_v33 = vmax.f32 %v7859_v12, %v3170_v9  ;;  %v8613_v27 = vld [vmem:[#allocation2 + $0x40] sm:$0xff] }
 0x29b   : > { %v3267_v23 = vmax.f32 %v3203_v45, %v8577_v49  ;;  %v8600_v61 = vmax.f32 %v2482_v4, %v8574_v32  ;;  %v8603_v30 = vmax.f32 %v2485_v52, %v8579_v48  ;;  %v8608_v39 = vmax.f32 %v2484_v7, %v8585_v60  ;;  %10203 = vst [vmem:[#allocation51_spill] sm:$0xff] %v8610_v3 }
 0x29c   : > { %v3202_v37 = vmax.f32 %v3138_v38, %v3170_v9  ;;  %v2586_v53 = vrot.slane %v8597_v35, 1  ;;  %v2650_v45 = vrot.slane %v8597_v35, 7  ;;  %v2842_v15 = vrot.slane %v8597_v35, 2 }
 0x29d   : > { %v3331_v24 = vmax.f32 %v3267_v23, %v8589_v42  ;;  %v2906_v12 = vrot.slane %v8597_v35, 6  ;;  %v2570_v2 = vrot.slane %v8600_v61, 1  ;;  %v2634_v9 = vrot.slane %v8600_v61, 7  ;;  %v8655_v11 = vpop.permute.xlu1 %3418 }
 0x29e   : > { %v3266_v4 = vmax.f32 %v3202_v37, %v8594_v34  ;;  %v8619_v5 = vld [vmem:[#allocation2 + $0x28] sm:$0xff]  ;;  %v2826_v38 = vrot.slane %v8600_v61, 2  ;;  %v2890_v7 = vrot.slane %v8600_v61, 6  ;;  %v2587_v23 = vrot.slane %v8603_v30, 1  ;;  %v8629_v37 = vpop.permute.xlu0 %3412  ;;  %10205 = vst [vmem:[#allocation53_spill] sm:$0xff] %v8655_v11 }
 0x29f   : > { %3652 = vrot.lane.b32.xlu0 %v3331_v24, %s5729_s26  ;;  %v3205_v52 = vmax.f32 %v3141_v58, %v8619_v5  ;;  %10204 = vst [vmem:[#allocation52_spill] sm:$0xff] %v8629_v37  ;;  %v2602_v47 = vsel %vm970_vm2, %v2570_v2, %v2586_v53  ;;  %v2618_v24 = vsel %vm970_vm2, %v2586_v53, %v2570_v2 }
 0x2a0   : > { %v3330_v3 = vmax.f32 %v3266_v4, %v8613_v27  ;;  %v2666_v58 = vsel %vm1035_vm3, %v2634_v9, %v2650_v45  ;;  %v2682_v37 = vsel %vm1035_vm3, %v2650_v45, %v2634_v9  ;;  %v2707_v4 = vsel %vm931_vm5, %v2618_v24, -inf  ;;  %v8658_v9 = vld [vmem:[#allocation2 + $0x50] sm:$0xff] }
 0x2a1   : > { %v3269_v20 = vmax.f32 %v3205_v52, %v8589_v42  ;;  %v8641_v57 = vld [vmem:[#allocation2 + $0x20] sm:$0xff]  ;;  %v2738_v21 = vmax.f32 %v8600_v61, %v2602_v47  ;;  %v2739_v53 = vmax.f32 %v8597_v35, %v2707_v4  ;;  %v2770_v2 = vsel %vm932_vm4, %v2682_v37, -inf }
 0x2a2   : > { %3650 = vrot.lane.b32.xlu1 %v3330_v3, %s5729_s26  ;;  %v3204_v25 = vmax.f32 %v3140_v33, %v8641_v57  ;;  %v2858_v52 = vsel %vm1236_vm6, %v2826_v38, %v2842_v15  ;;  %v2874_v47 = vsel %vm1236_vm6, %v2842_v15, %v2826_v38  ;;  %v2922_v33 = vsel %vm1301_vm9, %v2890_v7, %v2906_v12 }
 0x2a3   : > { %v3333_v45 = vmax.f32 %v3269_v20, %v8632_v17  ;;  %v2802_v24 = vmax.f32 %v2738_v21, %v2770_v2  ;;  %v2803_v4 = vmax.f32 %v2739_v53, %v2666_v58  ;;  %v2938_v37 = vsel %vm1301_vm9, %v2906_v12, %v2890_v7  ;;  %v8674_v2 = vpop.permute.xlu0 %3416 }
 0x2a4   : > { %v3268_v3 = vmax.f32 %v3204_v25, %v8613_v27  ;;  %v2963_v11 = vsel %vm935_vm7, %v2874_v47, -inf  ;;  %v3026_v21 = vsel %vm936_vm8, %v2938_v37, -inf  ;;  %v2651_v15 = vrot.slane %v8603_v30, 7  ;;  %v8693_v37 = vpop.permute.xlu1 %3422 }
 0x2a5   : > { %3656 = vrot.lane.b32.xlu0 %v3333_v45, %s5729_s26  ;;  %v2994_v20 = vmax.f32 %v2802_v24, %v2858_v52  ;;  %v2843_v38 = vrot.slane %v8603_v30, 2  ;;  %v2995_v58 = vmax.f32 %v2803_v4, %v2963_v11  ;;  %v2907_v12 = vrot.slane %v8603_v30, 6  ;;  %10206 = vst [vmem:[#allocation54_spill] sm:$0xff] %v8693_v37 }
 0x2a6   : > { %v3332_v25 = vmax.f32 %v3268_v3, %v8658_v9  ;;  %v2571_v7 = vrot.slane %v8608_v39, 1  ;;  %v2635_v52 = vrot.slane %v8608_v39, 7  ;;  %v2827_v45 = vrot.slane %v8608_v39, 2 }
 0x2a7   : > { %v8679_v53 = vmax.f32 %v2994_v20, %v3026_v21  ;;  %v2891_v24 = vrot.slane %v8608_v39, 6  ;;  %v8685_v47 = vmax.f32 %v2995_v58, %v2922_v33  ;;  %v3143_v4 = vmax.f32 %v7978_v26, %v8619_v5 }
 0x2a8   : > { %3654 = vrot.lane.b32.xlu1 %v3332_v25, %s5729_s26  ;;  %v2603_v3 = vsel %vm970_vm2, %v2571_v7, %v2587_v23  ;;  %v2619_v11 = vsel %vm970_vm2, %v2587_v23, %v2571_v7  ;;  %v2683_v20 = vsel %vm1035_vm3, %v2651_v15, %v2635_v52  ;;  %v2875_v5 = vsel %vm1236_vm6, %v2843_v38, %v2827_v45 }
 0x2a9   : > { %3556 = vrot.lane.b32.xlu0 %v8597_v35, %s5728_s25  ;;  %v2709_v33 = vsel %vm931_vm5, %v2619_v11, -inf  ;;  %v2740_v21 = vmax.f32 %v8608_v39, %v2603_v3  ;;  %3090 = vst.msk [vmem:[#allocation2 + $0xa0] sm:$0xff] %vm917_vm1, %v8679_v53  ;;  %v2772_v26 = vsel %vm932_vm4, %v2683_v20, -inf  ;;  %v3145_v35 = vmax.f32 %v8031_v41, %v8577_v49  ;;  %3091 = vst.msk [vmem:[#allocation2 + $0xa8] sm:$0xff] %vm917_vm1, %v8685_v47  ;;  %v8719_v11 = vpop.permute.xlu0 %3420 }
 0x2aa   : > { %v2741_v23 = vmax.f32 %v8603_v30, %v2709_v33  ;;  %v2667_v25 = vsel %vm1035_vm3, %v2635_v52, %v2651_v15  ;;  %v2939_v7 = vsel %vm1301_vm9, %v2907_v12, %v2891_v24  ;;  %v3144_v3 = vmax.f32 %v8028_v16, %v8594_v34 }
 0x2ab   : > { %v2804_v58 = vmax.f32 %v2740_v21, %v2772_v26  ;;  %v2859_v41 = vsel %vm1236_vm6, %v2827_v45, %v2843_v38  ;;  %v3207_v33 = vmax.f32 %v3143_v4, %v8577_v49  ;;  %v3142_v15 = vmax.f32 %v7975_v22, %v8641_v57  ;;  %v8732_v21 = vld [vmem:[#allocation2 + $0x68] sm:$0xff]  ;;  %v8740_v57 = vpop.permute.xlu1 %3522  ;;  %v8746_v4 = vld [vmem:[#allocation2 + $0x60] sm:$0xff] }
 0x2ac   : > { %3554 = vrot.lane.b32.xlu1 %v8600_v61, %s5728_s25  ;;  %v2805_v20 = vmax.f32 %v2741_v23, %v2667_v25  ;;  %v2965_v16 = vsel %vm935_vm7, %v2875_v5, -inf  ;;  %v3209_v61 = vmax.f32 %v3145_v35, %v8589_v42  ;;  %v3208_v23 = vmax.f32 %v3144_v3, %v8613_v27 }
 0x2ad   : > { %3560 = vrot.lane.b32.xlu0 %v8603_v30, %s5728_s25  ;;  %v2996_v52 = vmax.f32 %v2804_v58, %v2859_v41  ;;  %v3028_v49 = vsel %vm936_vm8, %v2939_v7, -inf  ;;  %v3271_v38 = vmax.f32 %v3207_v33, %v8632_v17  ;;  %v3206_v22 = vmax.f32 %v3142_v15, %v8594_v34  ;;  %v8776_v41 = vld [vmem:[#allocation2 + $0xe0] sm:$0xff] }
 0x2ae   : > { %v2997_v26 = vmax.f32 %v2805_v20, %v2965_v16  ;;  %v2923_v30 = vsel %vm1301_vm9, %v2891_v24, %v2907_v12  ;;  %v2359_v5 = vmax.f32 %v8081_v54, %v8365_v29  ;;  %v2358_v35 = vmax.f32 %v8073_v51, %v8398_v55  ;;  %v8759_v24 = vld [vmem:[#allocation2 + $0x78] sm:$0xff]  ;;  %v8769_v55 = vpop.permute.xlu0 %3424  ;;  %v8774_v20 = vld [vmem:[#allocation2 + $0xe8] sm:$0xff] }
 0x2af   : > { %v8744_v45 = vmax.f32 %v2996_v52, %v3028_v49  ;;  %v3335_v34 = vmax.f32 %v3271_v38, %v8732_v21  ;;  %v3270_v58 = vmax.f32 %v3206_v22, %v8658_v9  ;;  %v3273_v12 = vmax.f32 %v3209_v61, %v8732_v21  ;;  %10207 = vst [vmem:[#allocation55_spill] sm:$0xff] %v8769_v55  ;;  %v8801_v22 = vld [vmem:[#allocation2 + $0xf0] sm:$0xff] }
 0x2b0   : > { %v8752_v25 = vmax.f32 %v2997_v26, %v2923_v30  ;;  %3558 = vrot.lane.b32.xlu1 %v8608_v39, %s5728_s25  ;;  %v2423_v7 = vmax.f32 %v2359_v5, %v8400_v44  ;;  %v2422_v54 = vmax.f32 %v2358_v35, %v8452_v59  ;;  %v2361_v51 = vmax.f32 %v8122_v31, %v8400_v44  ;;  %v8782_v31 = vld [vmem:[#allocation2 + $0x70] sm:$0xff] }
 0x2b1   : > { %v2360_v29 = vmax.f32 %v8118_v1, %v8452_v59  ;;  %3092 = vst.msk [vmem:[#allocation2 + $0xb0] sm:$0xff] %vm917_vm1, %v8744_v45  ;;  %3660 = vrot.lane.b32.xlu0 %v3335_v34, %s5729_s26  ;;  %v3334_v39 = vmax.f32 %v3270_v58, %v8746_v4  ;;  %v3272_v3 = vmax.f32 %v3208_v23, %v8746_v4 }
 0x2b2   : > { %3093 = vst.msk [vmem:[#allocation2 + $0xb8] sm:$0xff] %vm917_vm1, %v8752_v25  ;;  %v2363_v1 = vmax.f32 %v8283_v18, %v8565_v43  ;;  %v2487_v44 = vmax.f32 %v2423_v7, %v8579_v48  ;;  %v2486_v59 = vmax.f32 %v2422_v54, %v8585_v60  ;;  %v2425_v33 = vmax.f32 %v2361_v51, %v8565_v43  ;;  %v8793_v18 = vpop.permute.xlu1 %3524  ;;  %v8811_v58 = vpop.permute.xlu0 %3528 }
 0x2b3   : > { %v2424_v15 = vmax.f32 %v2360_v29, %v8574_v32  ;;  %v3337_v16 = vmax.f32 %v3273_v12, %v8759_v24  ;;  %v2362_v61 = vmax.f32 %v8280_v10, %v8574_v32  ;;  %v3336_v38 = vmax.f32 %v3272_v3, %v8782_v31 }
 0x2b4   : > { %3658 = vrot.lane.b32.xlu1 %v3334_v39, %s5729_s26  ;;  %v2427_v52 = vmax.f32 %v2363_v1, %v8579_v48  ;;  %v2551_v23 = vmax.f32 %v2487_v44, %v8774_v20  ;;  %v2550_v26 = vmax.f32 %v2486_v59, %v8776_v41  ;;  %v2489_v49 = vmax.f32 %v2425_v33, %v8774_v20 }
 0x2b5   : > { %v2488_v43 = vmax.f32 %v2424_v15, %v8776_v41  ;;  %3664 = vrot.lane.b32.xlu0 %v3337_v16, %s5729_s26  ;;  %v8805_v10 = vmax.f32 %v2362_v61, %v8585_v60 }
 0x2b6   : > { %v2491_v30 = vmax.f32 %v2427_v52, %v8425_v0  ;;  %v2588_v32 = vrot.slane %v2551_v23, 1  ;;  %v2652_v5 = vrot.slane %v2551_v23, 7  ;;  %v2844_v12 = vrot.slane %v2551_v23, 2  ;;  %v8826_v16 = vpop.permute.xlu1 %3526 }
 0x2b7   : > { %v2572_v7 = vrot.slane %v2550_v26, 1  ;;  %v2636_v54 = vrot.slane %v2550_v26, 7  ;;  %v2828_v51 = vrot.slane %v2550_v26, 2  ;;  %v2908_v29 = vrot.slane %v2551_v23, 6 }
 0x2b8   : > { %3662 = vrot.lane.b32.xlu1 %v3336_v38, %s5729_s26  ;;  %v2892_v39 = vrot.slane %v2550_v26, 6  ;;  %v2553_v3 = vmax.f32 %v2489_v49, %v8425_v0  ;;  %v2552_v1 = vmax.f32 %v2488_v43, %v8801_v22  ;;  %v8824_v15 = vmax.f32 %v2491_v30, %v8454_v28 }
 0x2b9   : > { %3564 = vrot.lane.b32.xlu0 %v2551_v23, %s5728_s25  ;;  %v2604_v44 = vsel %vm970_vm2, %v2572_v7, %v2588_v32  ;;  %v2620_v59 = vsel %vm970_vm2, %v2588_v32, %v2572_v7  ;;  %v2684_v33 = vsel %vm1035_vm3, %v2652_v5, %v2636_v54  ;;  %v2490_v49 = vmax.f32 %v8805_v10, %v8801_v22 }
 0x2ba   : > { %v2711_v0 = vsel %vm931_vm5, %v2620_v59, -inf  ;;  %v2742_v52 = vmax.f32 %v2550_v26, %v2604_v44  ;;  %v2774_v61 = vsel %vm932_vm4, %v2684_v33, -inf  ;;  %v2668_v43 = vsel %vm1035_vm3, %v2636_v54, %v2652_v5  ;;  %v8845_v33 = vpop.permute.xlu0 %3428 }
 0x2bb   : > { %v2743_v38 = vmax.f32 %v2551_v23, %v2711_v0  ;;  %v2860_v30 = vsel %vm1236_vm6, %v2828_v51, %v2844_v12  ;;  %v2876_v32 = vsel %vm1236_vm6, %v2844_v12, %v2828_v51  ;;  %v2924_v44 = vsel %vm1301_vm9, %v2892_v39, %v2908_v29  ;;  %10208 = vst [vmem:[#allocation56_spill] sm:$0xff] %v8845_v33 }
 0x2bc   : > { %3562 = vrot.lane.b32.xlu1 %v2550_v26, %s5728_s25  ;;  %v2806_v7 = vmax.f32 %v2742_v52, %v2774_v61  ;;  %v2940_v59 = vsel %vm1301_vm9, %v2908_v29, %v2892_v39  ;;  %v2589_v10 = vrot.slane %v2553_v3, 1  ;;  %v2967_v23 = vsel %vm935_vm7, %v2876_v32, -inf }
 0x2bd   : > { %v2807_v5 = vmax.f32 %v2743_v38, %v2668_v43  ;;  %v2653_v54 = vrot.slane %v2553_v3, 7  ;;  %v2845_v0 = vrot.slane %v2553_v3, 2  ;;  %3568 = vrot.lane.b32.xlu0 %v2553_v3, %s5728_s25  ;;  %v2573_v26 = vrot.slane %v2552_v1, 1  ;;  %v8853_v43 = vpop.permute.xlu1 %3426 }
 0x2be   : > { %v2998_v12 = vmax.f32 %v2806_v7, %v2860_v30  ;;  %v2637_v51 = vrot.slane %v2552_v1, 7  ;;  %v2829_v52 = vrot.slane %v2552_v1, 2  ;;  %v3030_v34 = vsel %vm936_vm8, %v2940_v59, -inf  ;;  %10209 = vst [vmem:[#allocation57_spill] sm:$0xff] %v8853_v43  ;;  %v9003_v43 = vld [vmem:[#allocation2 + $0x80] sm:$0xff] }
 0x2bf   : > { %v2999_v61 = vmax.f32 %v2807_v5, %v2967_v23  ;;  %v2909_v29 = vrot.slane %v2553_v3, 6  ;;  %v2893_v39 = vrot.slane %v2552_v1, 6  ;;  %v2605_v32 = vsel %vm970_vm2, %v2573_v26, %v2589_v10 }
 0x2c0   : > { %3566 = vrot.lane.b32.xlu1 %v2552_v1, %s5728_s25  ;;  %v8855_v38 = vmax.f32 %v2998_v12, %v3030_v34  ;;  %v2621_v30 = vsel %vm970_vm2, %v2589_v10, %v2573_v26  ;;  %v2590_v7 = vrot.slane %v8824_v15, 1  ;;  %v2685_v59 = vsel %vm1035_vm3, %v2653_v54, %v2637_v51  ;;  %v8877_v26 = vpop.permute.xlu0 %3432 }
 0x2c1   : > { %v8862_v5 = vmax.f32 %v2999_v61, %v2924_v44  ;;  %v2713_v23 = vsel %vm931_vm5, %v2621_v30, -inf  ;;  %v2744_v35 = vmax.f32 %v2552_v1, %v2605_v32  ;;  %3572 = vrot.lane.b32.xlu0 %v8824_v15, %s5728_s25  ;;  %v2776_v12 = vsel %vm932_vm4, %v2685_v59, -inf  ;;  %10210 = vst [vmem:[#allocation58_spill] sm:$0xff] %v8877_v26 }
 0x2c2   : > { %v2745_v34 = vmax.f32 %v2553_v3, %v2713_v23  ;;  %v2877_v10 = vsel %vm1236_vm6, %v2845_v0, %v2829_v52  ;;  %v2654_v44 = vrot.slane %v8824_v15, 7  ;;  %3094 = vst.msk [vmem:[#allocation2 + $0xc0] sm:$0xff] %vm917_vm1, %v8855_v38  ;;  %v2669_v1 = vsel %vm1035_vm3, %v2637_v51, %v2653_v54 }
 0x2c3   : > { %v2808_v61 = vmax.f32 %v2744_v35, %v2776_v12  ;;  %v2861_v3 = vsel %vm1236_vm6, %v2829_v52, %v2845_v0  ;;  %v2941_v32 = vsel %vm1301_vm9, %v2909_v29, %v2893_v39  ;;  %3095 = vst.msk [vmem:[#allocation2 + $0xc8] sm:$0xff] %vm917_vm1, %v8862_v5  ;;  %v2925_v59 = vsel %vm1301_vm9, %v2893_v39, %v2909_v29  ;;  %v8893_v35 = vld [vmem:[#allocation2 + $0x100] sm:$0xff] }
 0x2c4   : > { %v2809_v30 = vmax.f32 %v2745_v34, %v2669_v1  ;;  %v2969_v23 = vsel %vm935_vm7, %v2877_v10, -inf  ;;  %v3032_v54 = vsel %vm936_vm8, %v2941_v32, -inf  ;;  %v2554_v0 = vmax.f32 %v2490_v49, %v8893_v35  ;;  %v8904_v34 = vpop.permute.xlu1 %3430 }
 0x2c5   : > { %v3000_v51 = vmax.f32 %v2808_v61, %v2861_v3  ;;  %v10211_v52 = vmax.f32 %v8367_v40, %v8579_v48  ;;  %v10212_v29 = vmax.f32 %v8362_v13, %v8585_v60  ;;  %10213 = vst [vmem:[#allocation59_spill] sm:$0xff] %v8904_v34  ;;  %v2846_v1 = vrot.slane %v8824_v15, 2 }
 0x2c6   : > { %v3001_v10 = vmax.f32 %v2809_v30, %v2969_v23  ;;  %v2910_v32 = vrot.slane %v8824_v15, 6  ;;  %v3147_v49 = vmax.f32 %v8181_v56, %v8589_v42  ;;  %v2574_v3 = vrot.slane %v2554_v0, 1  ;;  %3570 = vrot.lane.b32.xlu1 %v2554_v0, %s5728_s25  ;;  %v8917_v23 = vpop.permute.xlu0 %3532 }
 0x2c7   : > { %v2429_v12 = vmax.f32 %v10211_v52, %v8774_v20  ;;  %v2428_v39 = vmax.f32 %v10212_v29, %v8776_v41  ;;  %v8910_v61 = vmax.f32 %v3000_v51, %v3032_v54  ;;  %v2638_v40 = vrot.slane %v2554_v0, 7  ;;  %v8927_v54 = vld [vmem:[#allocation2 + $0x118] sm:$0xff] }
 0x2c8   : > { %v2830_v48 = vrot.slane %v2554_v0, 2  ;;  %v8913_v52 = vmax.f32 %v3001_v10, %v2925_v59  ;;  %v2894_v13 = vrot.slane %v2554_v0, 6  ;;  %v2606_v29 = vsel %vm970_vm2, %v2574_v3, %v2590_v7 }
 0x2c9   : > { %v2493_v60 = vmax.f32 %v2429_v12, %v8454_v28  ;;  %v2492_v30 = vmax.f32 %v2428_v39, %v8893_v35  ;;  %v2622_v56 = vsel %vm970_vm2, %v2590_v7, %v2574_v3  ;;  %v2670_v42 = vsel %vm1035_vm3, %v2638_v40, %v2654_v44  ;;  %3096 = vst.msk [vmem:[#allocation2 + $0xd0] sm:$0xff] %vm917_vm1, %v8910_v61  ;;  %v8939_v39 = vld [vmem:[#allocation2 + $0x110] sm:$0xff] }
 0x2ca   : > { %v2686_v59 = vsel %vm1035_vm3, %v2654_v44, %v2638_v40  ;;  %v2715_v28 = vsel %vm931_vm5, %v2622_v56, -inf  ;;  %v2746_v51 = vmax.f32 %v2554_v0, %v2606_v29  ;;  %v2862_v7 = vsel %vm1236_vm6, %v2830_v48, %v2846_v1  ;;  %3097 = vst.msk [vmem:[#allocation2 + $0xd8] sm:$0xff] %vm917_vm1, %v8913_v52  ;;  %v8948_v40 = vpop.permute.xlu1 %3530 }
 0x2cb   : > { %v2778_v12 = vsel %vm932_vm4, %v2686_v59, -inf  ;;  %v2747_v44 = vmax.f32 %v8824_v15, %v2715_v28  ;;  %v2878_v10 = vsel %vm1236_vm6, %v2846_v1, %v2830_v48  ;;  %v2926_v3 = vsel %vm1301_vm9, %v2894_v13, %v2910_v32 }
 0x2cc   : > { %v2942_v0 = vsel %vm1301_vm9, %v2910_v32, %v2894_v13  ;;  %v2810_v29 = vmax.f32 %v2746_v51, %v2778_v12  ;;  %v2971_v56 = vsel %vm935_vm7, %v2878_v10, -inf  ;;  %v2557_v15 = vmax.f32 %v2493_v60, %v8927_v54  ;;  %v8960_v12 = vpop.permute.xlu0 %3536 }
 0x2cd   : > { %v3034_v59 = vsel %vm936_vm8, %v2942_v0, -inf  ;;  %v2811_v28 = vmax.f32 %v2747_v44, %v2670_v42  ;;  %v2556_v1 = vmax.f32 %v2492_v30, %v8939_v39  ;;  %v3211_v48 = vmax.f32 %v3147_v49, %v8632_v17 }
 0x2ce   : > { %v3146_v26 = vmax.f32 %v8178_v14, %v8613_v27  ;;  %v3002_v32 = vmax.f32 %v2810_v29, %v2862_v7  ;;  %v2591_v13 = vrot.slane %v2557_v15, 1  ;;  %v2655_v34 = vrot.slane %v2557_v15, 7  ;;  %3576 = vrot.lane.b32.xlu0 %v2557_v15, %s5728_s25 }
 0x2cf   : > { %v2847_v51 = vrot.slane %v2557_v15, 2  ;;  %v3003_v10 = vmax.f32 %v2811_v28, %v2971_v56  ;;  %v2911_v0 = vrot.slane %v2557_v15, 6  ;;  %v2575_v33 = vrot.slane %v2556_v1, 1  ;;  %3574 = vrot.lane.b32.xlu1 %v2556_v1, %s5728_s25  ;;  %v8974_v56 = vld [vmem:[#allocation2 + $0x88] sm:$0xff]  ;;  %v8976_v28 = vpop.permute.xlu1 %3534 }
 0x2d0   : > { %v2639_v60 = vrot.slane %v2556_v1, 7  ;;  %v8963_v30 = vmax.f32 %v3002_v32, %v3034_v59  ;;  %v2831_v49 = vrot.slane %v2556_v1, 2  ;;  %v2895_v42 = vrot.slane %v2556_v1, 6 }
 0x2d1   : > { %v3275_v14 = vmax.f32 %v3211_v48, %v8759_v24  ;;  %v8966_v27 = vmax.f32 %v3003_v10, %v2926_v3  ;;  %v2607_v7 = vsel %vm970_vm2, %v2575_v33, %v2591_v13  ;;  %v2623_v44 = vsel %vm970_vm2, %v2591_v13, %v2575_v33 }
 0x2d2   : > { %v2671_v29 = vsel %vm1035_vm3, %v2639_v60, %v2655_v34  ;;  %v2687_v59 = vsel %vm1035_vm3, %v2655_v34, %v2639_v60  ;;  %v2717_v3 = vsel %vm931_vm5, %v2623_v44, -inf  ;;  %v2748_v48 = vmax.f32 %v2556_v1, %v2607_v7  ;;  %3098 = vst.msk [vmem:[#allocation2 + $0xe0] sm:$0xff] %vm917_vm1, %v8963_v30  ;;  %v8997_v44 = vpop.permute.xlu0 %3436 }
 0x2d3   : > { %v2863_v32 = vsel %vm1236_vm6, %v2831_v49, %v2847_v51  ;;  %v2749_v33 = vmax.f32 %v2557_v15, %v2717_v3  ;;  %v2780_v13 = vsel %vm932_vm4, %v2687_v59, -inf  ;;  %v2879_v10 = vsel %vm1236_vm6, %v2847_v51, %v2831_v49  ;;  %3099 = vst.msk [vmem:[#allocation2 + $0xe8] sm:$0xff] %vm917_vm1, %v8966_v27  ;;  %10214 = vst [vmem:[#allocation60_spill] sm:$0xff] %v8997_v44  ;;  %v2399_v3 = vld [vmem:[#allocation2 + $0xf8] sm:$0xff] }
 0x2d4   : > { %v2927_v34 = vsel %vm1301_vm9, %v2895_v42, %v2911_v0  ;;  %v2812_v1 = vmax.f32 %v2748_v48, %v2780_v13  ;;  %v2943_v60 = vsel %vm1301_vm9, %v2911_v0, %v2895_v42  ;;  %v3339_v7 = vmax.f32 %v3275_v14, %v8974_v56 }
 0x2d5   : > { %v2813_v15 = vmax.f32 %v2749_v33, %v2671_v29  ;;  %v3210_v59 = vmax.f32 %v3146_v26, %v8658_v9  ;;  %v2973_v51 = vsel %vm935_vm7, %v2879_v10, -inf  ;;  %v2367_v48 = vmax.f32 %v8327_v8, %v8774_v20  ;;  %v9012_v29 = vpop.permute.xlu1 %3434  ;;  %v9022_v20 = vld [vmem:[#allocation2 + $0x128] sm:$0xff] }
 0x2d6   : > { %v3004_v49 = vmax.f32 %v2812_v1, %v2863_v32  ;;  %3668 = vrot.lane.b32.xlu0 %v3339_v7, %s5729_s26  ;;  %v2366_v0 = vmax.f32 %v8319_v36, %v8776_v41  ;;  %v3036_v14 = vsel %vm936_vm8, %v2943_v60, -inf  ;;  %10215 = vst [vmem:[#allocation61_spill] sm:$0xff] %v9012_v29  ;;  %v3149_v10 = vmax.f32 %v8232_v50, %v8632_v17  ;;  %v9024_v41 = vld [vmem:[#allocation2 + $0x120] sm:$0xff]  ;;  %v9033_v50 = vpop.permute.xlu0 %3440 }
 0x2d7   : > { %v3005_v42 = vmax.f32 %v2813_v15, %v2973_v51  ;;  %v3274_v26 = vmax.f32 %v3210_v59, %v8782_v31  ;;  %v2431_v32 = vmax.f32 %v2367_v48, %v2399_v3  ;;  %v3148_v1 = vmax.f32 %v8229_v46, %v8658_v9  ;;  %10216 = vst [vmem:[#allocation62_spill] sm:$0xff] %v9033_v50  ;;  %v9046_v59 = vld [vmem:[#allocation2 + $0x98] sm:$0xff]  ;;  %v9049_v51 = vld [vmem:[#allocation2 + $0x90] sm:$0xff] }
 0x2d8   : > { %v9014_v33 = vmax.f32 %v3004_v49, %v3036_v14  ;;  %v2430_v13 = vmax.f32 %v2366_v0, %v8801_v22  ;;  %v3213_v15 = vmax.f32 %v3149_v10, %v8732_v21  ;;  %v2368_v46 = vmax.f32 %v8423_v19, %v8801_v22  ;;  %v10218_v10 = vld [vmem:[#allocation42_spill] sm:$0xff] }
 0x2d9   : > { %v9019_v8 = vmax.f32 %v3005_v42, %v2927_v34  ;;  %v3338_v36 = vmax.f32 %v3274_v26, %v9003_v43  ;;  %v2495_v60 = vmax.f32 %v2431_v32, %v8927_v54  ;;  %v3212_v17 = vmax.f32 %v3148_v1, %v8746_v4  ;;  %v9052_v48 = vpop.permute.xlu1 %3438 }
 0x2da   : > { %v2494_v7 = vmax.f32 %v2430_v13, %v8939_v39  ;;  %3100 = vst.msk [vmem:[#allocation2 + $0xf0] sm:$0xff] %vm917_vm1, %v9014_v33  ;;  %v3277_v39 = vmax.f32 %v3213_v15, %v8974_v56  ;;  %v3151_v34 = vmax.f32 %v8480_v62, %v8732_v21  ;;  %v2432_v49 = vmax.f32 %v2368_v46, %v8893_v35  ;;  %v9060_v1 = vpop.permute.xlu0 %3540 }
 0x2db   : > { %3666 = vrot.lane.b32.xlu1 %v3338_v36, %s5729_s26  ;;  %3101 = vst.msk [vmem:[#allocation2 + $0xf8] sm:$0xff] %vm917_vm1, %v9019_v8  ;;  %v2559_v9 = vmax.f32 %v2495_v60, %v9022_v20  ;;  %v3276_v3 = vmax.f32 %v3212_v17, %v9003_v43  ;;  %10217 = vst [vmem:[#allocation63_spill] sm:$0xff] %v9052_v48  ;;  %v2593_v36 = vrot.slane %v10218_v10, 1  ;;  %v9068_v17 = vld [vmem:[#allocation2 + $0xa8] sm:$0xff]  ;;  %v9077_v48 = vld [vmem:[#allocation2 + $0x130] sm:$0xff] }
 0x2dc   : > { %v2558_v54 = vmax.f32 %v2494_v7, %v9024_v41  ;;  %v3341_v21 = vmax.f32 %v3277_v39, %v9046_v59  ;;  %v3215_v35 = vmax.f32 %v3151_v34, %v8759_v24  ;;  %v2496_v46 = vmax.f32 %v2432_v49, %v9024_v41 }
 0x2dd   : > { %v2592_v19 = vrot.slane %v2559_v9, 1  ;;  %v2656_v22 = vrot.slane %v2559_v9, 7  ;;  %v2848_v0 = vrot.slane %v2559_v9, 2  ;;  %v2912_v42 = vrot.slane %v2559_v9, 6  ;;  %3580 = vrot.lane.b32.xlu0 %v2559_v9, %s5728_s25 }
 0x2de   : > { %v2576_v14 = vrot.slane %v2558_v54, 1  ;;  %v2640_v26 = vrot.slane %v2558_v54, 7  ;;  %v2832_v32 = vrot.slane %v2558_v54, 2  ;;  %v2896_v62 = vrot.slane %v2558_v54, 6 }
 0x2df   : > { %3578 = vrot.lane.b32.xlu1 %v2558_v54, %s5728_s25  ;;  %v3340_v13 = vmax.f32 %v3276_v3, %v9049_v51  ;;  %v3279_v50 = vmax.f32 %v3215_v35, %v9046_v59 }
 0x2e0   : > { %v2608_v60 = vsel %vm970_vm2, %v2576_v14, %v2592_v19  ;;  %v2624_v7 = vsel %vm970_vm2, %v2592_v19, %v2576_v14  ;;  %v2688_v15 = vsel %vm1035_vm3, %v2656_v22, %v2640_v26  ;;  %v2880_v14 = vsel %vm1236_vm6, %v2848_v0, %v2832_v32 }
 0x2e1   : > { %v2719_v39 = vsel %vm931_vm5, %v2624_v7, -inf  ;;  %v2750_v34 = vmax.f32 %v2558_v54, %v2608_v60  ;;  %v2782_v3 = vsel %vm932_vm4, %v2688_v15, -inf  ;;  %3672 = vrot.lane.b32.xlu0 %v3341_v21, %s5729_s26  ;;  %v2944_v49 = vsel %vm1301_vm9, %v2912_v42, %v2896_v62  ;;  %v9085_v60 = vpop.permute.xlu1 %3538 }
 0x2e2   : > { %v2751_v19 = vmax.f32 %v2559_v9, %v2719_v39  ;;  %v2657_v54 = vrot.slane %v10218_v10, 7  ;;  %v2672_v21 = vsel %vm1035_vm3, %v2640_v26, %v2656_v22  ;;  %v3343_v35 = vmax.f32 %v3279_v50, %v9068_v17  ;;  %v10219_v50 = vld [vmem:[#allocation43_spill] sm:$0xff] }
 0x2e3   : > { %3670 = vrot.lane.b32.xlu1 %v3340_v13, %s5729_s26  ;;  %v2814_v7 = vmax.f32 %v2750_v34, %v2782_v3  ;;  %v2849_v9 = vrot.slane %v10218_v10, 2  ;;  %v2864_v39 = vsel %vm1236_vm6, %v2832_v32, %v2848_v0  ;;  %v2928_v44 = vsel %vm1301_vm9, %v2896_v62, %v2912_v42  ;;  %v9103_v34 = vpop.permute.xlu0 %3544 }
 0x2e4   : > { %v2815_v15 = vmax.f32 %v2751_v19, %v2672_v21  ;;  %v2560_v13 = vmax.f32 %v2496_v46, %v9077_v48  ;;  %v2975_v29 = vsel %vm935_vm7, %v2880_v14, -inf  ;;  %v3038_v22 = vsel %vm936_vm8, %v2944_v49, -inf  ;;  %v10220_v14 = vld [vmem:[#allocation47_spill] sm:$0xff] }
 0x2e5   : > { %v3006_v55 = vmax.f32 %v2814_v7, %v2864_v39  ;;  %3676 = vrot.lane.b32.xlu0 %v3343_v35, %s5729_s26  ;;  %v3150_v26 = vmax.f32 %v10219_v50, %v8746_v4  ;;  %v2913_v19 = vrot.slane %v10218_v10, 6  ;;  %v3153_v49 = vmax.f32 %v10220_v14, %v8759_v24  ;;  %v9117_v7 = vpop.permute.xlu1 %3542 }
 0x2e6   : > { %v3007_v0 = vmax.f32 %v2815_v15, %v2975_v29  ;;  %v2577_v32 = vrot.slane %v2560_v13, 1  ;;  %v2641_v3 = vrot.slane %v2560_v13, 7  ;;  %v2833_v42 = vrot.slane %v2560_v13, 2 }
 0x2e7   : > { %3582 = vrot.lane.b32.xlu1 %v2560_v13, %s5728_s25  ;;  %v9106_v62 = vmax.f32 %v3006_v55, %v3038_v22  ;;  %v2897_v46 = vrot.slane %v2560_v13, 6  ;;  %v3217_v24 = vmax.f32 %v3153_v49, %v8974_v56  ;;  %v9133_v22 = vld [vmem:[#allocation2 + $0xb8] sm:$0xff]  ;;  %v3310_v49 = vld [vmem:[#allocation2 + $0xa0] sm:$0xff] }
 0x2e8   : > { %v9111_v21 = vmax.f32 %v3007_v0, %v2928_v44  ;;  %v2609_v4 = vsel %vm970_vm2, %v2577_v32, %v2593_v36  ;;  %v2625_v29 = vsel %vm970_vm2, %v2593_v36, %v2577_v32  ;;  %v2689_v55 = vsel %vm1035_vm3, %v2657_v54, %v2641_v3 }
 0x2e9   : > { %v2721_v35 = vsel %vm931_vm5, %v2625_v29, -inf  ;;  %v2752_v15 = vmax.f32 %v2560_v13, %v2609_v4  ;;  %3102 = vst.msk [vmem:[#allocation2 + $0x100] sm:$0xff] %vm917_vm1, %v9106_v62  ;;  %v2784_v36 = vsel %vm932_vm4, %v2689_v55, -inf  ;;  %v2881_v39 = vsel %vm1236_vm6, %v2849_v9, %v2833_v42  ;;  %v9141_v4 = vpop.permute.xlu0 %3444 }
 0x2ea   : > { %3103 = vst.msk [vmem:[#allocation2 + $0x108] sm:$0xff] %vm917_vm1, %v9111_v21  ;;  %v2753_v44 = vmax.f32 %v10218_v10, %v2721_v35  ;;  %v3214_v13 = vmax.f32 %v3150_v26, %v8782_v31  ;;  %v2673_v50 = vsel %vm1035_vm3, %v2641_v3, %v2657_v54  ;;  %v2945_v32 = vsel %vm1301_vm9, %v2913_v19, %v2897_v46 }
 0x2eb   : > { %v2816_v0 = vmax.f32 %v2752_v15, %v2784_v36  ;;  %v3281_v14 = vmax.f32 %v3217_v24, %v9068_v17  ;;  %v2865_v55 = vsel %vm1236_vm6, %v2833_v42, %v2849_v9  ;;  %v2977_v26 = vsel %vm935_vm7, %v2881_v39, -inf  ;;  %v9155_v9 = vpop.permute.xlu1 %3442 }
 0x2ec   : > { %v2817_v29 = vmax.f32 %v2753_v44, %v2673_v50  ;;  %v3278_v35 = vmax.f32 %v3214_v13, %v9049_v51  ;;  %v3155_v3 = vmax.f32 %v8685_v47, %v8974_v56  ;;  %v3040_v24 = vsel %vm936_vm8, %v2945_v32, -inf  ;;  %v10221_v44 = vld [vmem:[#allocation46_spill] sm:$0xff]  ;;  %v3315_v13 = vld [vmem:[#allocation2 + $0xc8] sm:$0xff] }
 0x2ed   : > { %v3008_v37 = vmax.f32 %v2816_v0, %v2865_v55  ;;  %v3345_v54 = vmax.f32 %v3281_v14, %v9133_v22  ;;  %v3152_v50 = vmax.f32 %v10221_v44, %v8782_v31  ;;  %v2929_v6 = vsel %vm1301_vm9, %v2897_v46, %v2913_v19  ;;  %v3312_v46 = vld [vmem:[#allocation2 + $0xb0] sm:$0xff] }
 0x2ee   : > { %v3009_v15 = vmax.f32 %v2817_v29, %v2977_v26  ;;  %v3342_v36 = vmax.f32 %v3278_v35, %v3310_v49  ;;  %v3219_v39 = vmax.f32 %v3155_v3, %v9046_v59  ;;  %v3157_v47 = vmax.f32 %v8752_v25, %v9046_v59  ;;  %v9177_v59 = vpop.permute.xlu0 %3452 }
 0x2ef   : > { %v9159_v42 = vmax.f32 %v3008_v37, %v3040_v24  ;;  %3680 = vrot.lane.b32.xlu0 %v3345_v54, %s5729_s26  ;;  %v3216_v31 = vmax.f32 %v3152_v50, %v9003_v43  ;;  %v3154_v0 = vmax.f32 %v8679_v53, %v9003_v43  ;;  %v3159_v25 = vmax.f32 %v8862_v5, %v9068_v17  ;;  %v3317_v43 = vld [vmem:[#allocation2 + $0xd8] sm:$0xff]  ;;  %v9184_v26 = vpop.permute.xlu1 %3450  ;;  %v3314_v5 = vld [vmem:[#allocation2 + $0xc0] sm:$0xff] }
 0x2f0   : > { %v9165_v56 = vmax.f32 %v3009_v15, %v2929_v6  ;;  %3674 = vrot.lane.b32.xlu1 %v3342_v36, %s5729_s26  ;;  %v3283_v37 = vmax.f32 %v3219_v39, %v9133_v22  ;;  %v3221_v19 = vmax.f32 %v3157_v47, %v9068_v17  ;;  %v3156_v35 = vmax.f32 %v8744_v45, %v9049_v51  ;;  %v3319_v6 = vld [vmem:[#allocation2 + $0xe8] sm:$0xff]  ;;  %v3316_v47 = vld [vmem:[#allocation2 + $0xd0] sm:$0xff] }
 0x2f1   : > { %3104 = vst.msk [vmem:[#allocation2 + $0x110] sm:$0xff] %vm917_vm1, %v9159_v42  ;;  %v3280_v32 = vmax.f32 %v3216_v31, %v3310_v49  ;;  %v3218_v55 = vmax.f32 %v3154_v0, %v9049_v51  ;;  %v3223_v17 = vmax.f32 %v3159_v25, %v9133_v22  ;;  %v3158_v15 = vmax.f32 %v8855_v38, %v3310_v49 }
 0x2f2   : > { %3105 = vst.msk [vmem:[#allocation2 + $0x118] sm:$0xff] %vm917_vm1, %v9165_v56  ;;  %v3347_v14 = vmax.f32 %v3283_v37, %v3315_v13  ;;  %v3285_v29 = vmax.f32 %v3221_v19, %v3315_v13  ;;  %v3220_v3 = vmax.f32 %v3156_v35, %v3310_v49  ;;  %v3161_v44 = vmax.f32 %v8913_v52, %v9133_v22  ;;  %v9193_v51 = vpop.permute.xlu0 %3448  ;;  %v9200_v22 = vld [vmem:[#allocation2 + $0xf8] sm:$0xff] }
 0x2f3   : > { %v3344_v53 = vmax.f32 %v3280_v32, %v3312_v46  ;;  %v3282_v54 = vmax.f32 %v3218_v55, %v3312_v46  ;;  %v3287_v36 = vmax.f32 %v3223_v17, %v3317_v43  ;;  %v3163_v45 = vmax.f32 %v8966_v27, %v3315_v13  ;;  %v9197_v38 = vpop.permute.xlu1 %3446 }
 0x2f4   : > { %3684 = vrot.lane.b32.xlu0 %v3347_v14, %s5729_s26  ;;  %v3349_v24 = vmax.f32 %v3285_v29, %v3317_v43  ;;  %v3284_v39 = vmax.f32 %v3220_v3, %v3314_v5  ;;  %v3225_v31 = vmax.f32 %v3161_v44, %v3315_v13  ;;  %v3222_v0 = vmax.f32 %v3158_v15, %v3312_v46  ;;  %v3318_v13 = vld [vmem:[#allocation2 + $0xe0] sm:$0xff]  ;;  %v3320_v15 = vld [vmem:[#allocation2 + $0xf0] sm:$0xff] }
 0x2f5   : > { %3678 = vrot.lane.b32.xlu1 %v3344_v53, %s5729_s26  ;;  %v3346_v50 = vmax.f32 %v3282_v54, %v3314_v5  ;;  %v3351_v49 = vmax.f32 %v3287_v36, %v3319_v6  ;;  %v3227_v19 = vmax.f32 %v3163_v45, %v3317_v43  ;;  %v3165_v52 = vmax.f32 %v9019_v8, %v3317_v43  ;;  %v3323_v54 = vld [vmem:[#allocation2 + $0x108] sm:$0xff] }
 0x2f6   : > { %v3289_v37 = vmax.f32 %v3225_v31, %v3319_v6  ;;  %v3348_v27 = vmax.f32 %v3284_v39, %v3316_v47  ;;  %v3286_v25 = vmax.f32 %v3222_v0, %v3316_v47  ;;  %v3160_v32 = vmax.f32 %v8910_v61, %v3312_v46  ;;  %v9205_v29 = vpop.permute.xlu0 %3456  ;;  %v3322_v31 = vld [vmem:[#allocation2 + $0x100] sm:$0xff]  ;;  %v3883_v0 = vld [vmem:[%s9948_s5 + $0x10] sm:$0xff] }
 0x2f7   : > { %v3162_v14 = vmax.f32 %v8963_v30, %v3314_v5  ;;  %v3291_v8 = vmax.f32 %v3227_v19, %v9200_v22  ;;  %v3229_v43 = vmax.f32 %v3165_v52, %v3319_v6  ;;  %v3167_v35 = vmax.f32 %v9111_v21, %v3319_v6  ;;  %v9212_v3 = vpop.permute.xlu1 %3454  ;;  %v3881_v21 = vld [vmem:[%s9948_s5] sm:$0xff] }
 0x2f8   : > { %3688 = vrot.lane.b32.xlu0 %v3349_v24, %s5729_s26  ;;  %v3224_v53 = vmax.f32 %v3160_v32, %v3314_v5  ;;  %v3353_v55 = vmax.f32 %v3289_v37, %v9200_v22  ;;  %v3350_v17 = vmax.f32 %v3286_v25, %v3318_v13  ;;  %v3164_v30 = vmax.f32 %v9014_v33, %v3316_v47  ;;  %v3882_v33 = vld [vmem:[%s9948_s5 + $0x8] sm:$0xff] }
 0x2f9   : > { %3682 = vrot.lane.b32.xlu1 %v3346_v50, %s5729_s26  ;;  %v3226_v46 = vmax.f32 %v3162_v14, %v3316_v47  ;;  %v3355_v5 = vmax.f32 %v3291_v8, %v3323_v54  ;;  %v3293_v24 = vmax.f32 %v3229_v43, %v3323_v54  ;;  %v3231_v36 = vmax.f32 %v3167_v35, %v9200_v22  ;;  %v3325_v50 = vld [vmem:[#allocation2 + $0x118] sm:$0xff]  ;;  %v3885_v43 = vld [vmem:[%s9948_s5 + $0x20] sm:$0xff] }
 0x2fa   : > { %v3288_v61 = vmax.f32 %v3224_v53, %v3318_v13  ;;  %v9217_v44 = vpop.permute.xlu0 %3548  ;;  %v3228_v39 = vmax.f32 %v3164_v30, %v3318_v13  ;;  %v3166_v47 = vmax.f32 %v9106_v62, %v3318_v13  ;;  %v5290_v19 = vpack.c.bf16 %v3882_v33, %v3881_v21 }
 0x2fb   : > { %v3290_v6 = vmax.f32 %v3226_v46, %v3320_v15  ;;  %v9234_v37 = vpop.permute.xlu1 %3546  ;;  %v3357_v52 = vmax.f32 %v3293_v24, %v3325_v50  ;;  %v3168_v62 = vmax.f32 %v9159_v42, %v3320_v15  ;;  %v5730_v25 = vmov 0.0|0.0   ;;  %v3886_v42 = vld [vmem:[%s9948_s5 + $0x28] sm:$0xff]  ;;  %v3887_v24 = vld [vmem:[%s9948_s5 + $0x30] sm:$0xff] }
 0x2fc   : > { %3692 = vrot.lane.b32.xlu0 %v3351_v49, %s5729_s26  ;;  %v3352_v45 = vmax.f32 %v3288_v61, %v3320_v15  ;;  %v3884_v49 = vld [vmem:[%s9948_s5 + $0x18] sm:$0xff]  ;;  %5289 = vmatprep.subr.bf16.mxu0 %v5730_v25  ;;  %v3292_v14 = vmax.f32 %v3228_v39, %v3322_v31  ;;  %v3230_v13 = vmax.f32 %v3166_v47, %v3320_v15 }
 0x2fd   : > { %3686 = vrot.lane.b32.xlu1 %v3348_v27, %s5729_s26  ;;  %v3295_v27 = vmax.f32 %v3231_v36, %v3325_v50  ;;  %v3354_v32 = vmax.f32 %v3290_v6, %v3322_v31  ;;  %5291 = vmatpush3.bf16.msra.mxu0 %v5290_v19  ;;  %v5293_v53 = vpack.c.bf16 %v3884_v49, %v3883_v0  ;;  %v3888_v36 = vld [vmem:[%s9948_s5 + $0x38] sm:$0xff]  ;;  %v3889_v50 = vld [vmem:[%s9948_s5 + $0x40] sm:$0xff]  ;;  %v3890_v6 = vld [vmem:[%s9948_s5 + $0x48] sm:$0xff] }
 0x2fe   : > { %v9239_v8 = vpop.permute.xlu0 %3552  ;;  %5292 = vmatprep.subr.bf16.mxu0 %v5730_v25  ;;  %v3169_v30 = vmax.f32 %v9165_v56, %v9200_v22  ;;  %v5302_v47 = vpack.c.bf16 %v3890_v6, %v3889_v50  ;;  %v3891_v0 = vld [vmem:[%s9948_s5 + $0x50] sm:$0xff]  ;;  %v3892_v49 = vld [vmem:[%s9948_s5 + $0x58] sm:$0xff]  ;;  %v10225_v6 = vld [vmem:[#allocation10_spill] sm:$0xff] }
 0x2ff   : > { %v3359_v35 = vmax.f32 %v3295_v27, %v9022_v20  ;;  %v9252_v15 = vpop.permute.xlu1 %3550  ;;  %v10224_v50 = vld [vmem:[#allocation33_spill] sm:$0xff] }
 0x300   : > { %3696 = vrot.lane.b32.xlu0 %v3353_v55, %s5729_s26  ;;  %v3324_v55 = vld [vmem:[#allocation2 + $0x110] sm:$0xff]  ;;  %v3233_v33 = vmax.f32 %v3169_v30, %v3323_v54 }
 0x301   : > { %3690 = vrot.lane.b32.xlu1 %v3350_v17, %s5729_s26  ;;  %v3232_v17 = vmax.f32 %v3168_v62, %v3322_v31  ;;  %v3356_v61 = vmax.f32 %v3292_v14, %v3324_v55  ;;  %v3294_v46 = vmax.f32 %v3230_v13, %v3324_v55  ;;  %5294 = vmatpush3.bf16.msra.mxu0 %v5293_v53  ;;  %v3893_v62 = vld [vmem:[%s9948_s5 + $0x60] sm:$0xff]  ;;  %v3895_v13 = vld [vmem:[%s9948_s5 + $0x70] sm:$0xff]  ;;  %v3896_v53 = vld [vmem:[%s9948_s5 + $0x78] sm:$0xff]  ;;  %v5732_v55 = vmov 0.0  }
 0x302   : > { %5295 = vmatprep.subr.bf16.mxu0 %v5730_v25  ;;  %v3297_v54 = vmax.f32 %v3233_v33, %v9022_v20  ;;  %v5305_v20 = vpack.c.bf16 %v3892_v49, %v3891_v0  ;;  %5227 = vmatprep.mubr.msk.f32.mxu0 %vm5731_vm10, %v5732_v55  ;;  %v10223_v33 = vld [vmem:[#allocation8_spill] sm:$0xff]  ;;  %v10227_v49 = vld [vmem:[#allocation7_spill] sm:$0xff] }
 0x303   : > { %v3358_v56 = vmax.f32 %v3294_v46, %v9024_v41  ;;  %v3296_v22 = vmax.f32 %v3232_v17, %v9024_v41  ;;  %v10226_v0 = vld [vmem:[#allocation36_spill] sm:$0xff] }
 0x304   : > { %3700 = vrot.lane.b32.xlu0 %v3355_v5, %s5729_s26  ;;  %v5296_v5 = vpack.c.bf16 %v3886_v42, %v3885_v43  ;;  %v5311_v42 = vpack.c.bf16 %v3896_v53, %v3895_v13 }
 0x305   : > { %3694 = vrot.lane.b32.xlu1 %v3352_v45, %s5729_s26  ;;  %v5299_v45 = vpack.c.bf16 %v3888_v36, %v3887_v24  ;;  %v3360_v41 = vmax.f32 %v3296_v22, %v9077_v48  ;;  %v10222_v22 = vld [vmem:[#allocation41_spill] sm:$0xff] }
 0x306   : > { %5297 = vmatpush3.bf16.msra.mxu0 %v5296_v5 }
 0x307   : > { %5298 = vmatprep.subr.bf16.mxu0 %v5730_v25 }
 0x308   : > { %3704 = vrot.lane.b32.xlu0 %v3357_v52, %s5729_s26 }
 0x309   : > { %3698 = vrot.lane.b32.xlu1 %v3354_v32, %s5729_s26  ;;  %v3894_v32 = vld [vmem:[%s9948_s5 + $0x68] sm:$0xff] }
 0x30a   : > { %5300 = vmatpush3.bf16.msra.mxu0 %v5299_v45  ;;  %v5308_v14 = vpack.c.bf16 %v3894_v32, %v3893_v62  ;;  %v3746_v45 = vsel %vm917_vm1, %v10223_v33, %v10222_v22  ;;  %v10230_v22 = vld [vmem:[#allocation44_spill] sm:$0xff]  ;;  %v10231_v33 = vld [vmem:[#allocation9_spill] sm:$0xff] }
 0x30b   : > { %5301 = vmatprep.subr.bf16.mxu0 %v5730_v25 }
 0x30c   : > { %3708 = vrot.lane.b32.xlu0 %v3359_v35, %s5729_s26 }
 0x30d   : > { %3702 = vrot.lane.b32.xlu1 %v3356_v61, %s5729_s26 }
 0x30e   : > { %5303 = vmatpush3.bf16.msra.mxu0 %v5302_v47  ;;  %v3778_v47 = vsel %vm483_vm0, %v3746_v45, %v8740_v57 }
 0x30f   : > { %5304 = vmatprep.subr.bf16.mxu0 %v5730_v25 }
 0x310   : > { %3584 = vrot.lane.b32.xlu0 %v10218_v10, %s5728_s25  ;;  %v3329_v10 = vld [vmem:[#allocation2 + $0x138] sm:$0xff] }
 0x311   : > { %v9263_v21 = vpop.permute.xlu0 %3652  ;;  %3706 = vrot.lane.b32.xlu1 %v3358_v56, %s5729_s26  ;;  %v3361_v19 = vmax.f32 %v3297_v54, %v3329_v10 }
 0x312   : > { %5306 = vmatpush3.bf16.msra.mxu0 %v5305_v20 }
 0x313   : > { %5307 = vmatprep.subr.bf16.mxu0 %v5730_v25 }
 0x314   : > { %v3651_v39 = vpop.permute.xlu1 %3650 }
 0x315   : > { %3710 = vrot.lane.b32.xlu1 %v3360_v41, %s5729_s26  ;;  %v3747_v41 = vsel %vm917_vm1, %v10225_v6, %v10224_v50  ;;  %v9342_v62 = vsel %vm3810_vm11, %v3778_v47, %v3651_v39 }
 0x316   : > { %5309 = vmatpush3.bf16.msra.mxu0 %v5308_v14  ;;  %v3779_v10 = vsel %vm483_vm0, %v3747_v41, %v8793_v18 }
 0x317   : > { %v3657_v31 = vpop.permute.xlu0 %3656  ;;  %5310 = vmatprep.subr.bf16.mxu0 %v5730_v25  ;;  %v9339_v20 = vsel %vm3810_vm11, %v3779_v10, %v9263_v21  ;;  %v10228_v21 = vld [vmem:[#allocation37_spill] sm:$0xff] }
 0x318   : > { %v3843_v18 = vadd.f32 %v9339_v20, %v9342_v62 }
 0x319   : > { %3712 = vrot.lane.b32.xlu1 %v3361_v19, %s5729_s26  ;;  %v3748_v19 = vsel %vm917_vm1, %v10227_v49, %v10226_v0  ;;  %v10232_v49 = vld [vmem:[#allocation48_spill] sm:$0xff]  ;;  %s9785_s26 = scalar_lea.vmem [#allocation3], %s4807_s27  ;;  %s5668_s27 = scalar_lea.vmem %s5667_s23, 4096 }
 0x31a   : > { %v3655_v48 = vpop.permute.xlu1 %3654  ;;  %5312 = vmatpush3.bf16.msra.mxu0 %v5311_v42  ;;  %v3780_v32 = vsel %vm483_vm0, %v3748_v19, %v8826_v16  ;;  %v10229_v42 = vld [vmem:[#allocation14_spill] sm:$0xff]  ;;  %v3749_v16 = vsel %vm917_vm1, %v10231_v33, %v10230_v22  ;;  %v10233_v19 = vld [vmem:[#allocation16_spill] sm:$0xff]  ;;  %s4741_s29 = sshll.u32 %s9785_s26, 4  ;;  %s9894_s29 = int_to_ptr.vmem [resolvable:$true] %s4741_s29 }
 0x31b   : > { %v9287_v52 = vpop.permute.xlu0 %3556  ;;  %5313 = vmatprep.subr.bf16.mxu0 %v5730_v25  ;;  %v9349_v57 = vsel %vm3810_vm11, %v3780_v32, %v3655_v48  ;;  %v3750_v39 = vsel %vm917_vm1, %v10229_v42, %v10228_v21  ;;  %v3781_v45 = vsel %vm483_vm0, %v3749_v16, %v8811_v58  ;;  %v3751_v58 = vsel %vm917_vm1, %v10233_v19, %v10232_v49  ;;  %v10235_v21 = vld [vmem:[#allocation13_spill] sm:$0xff]  ;;  %s5662_s21 = scalar_lea.vmem %s9894_s29, 2048  ;;  %p5669_p0 = scmp.lt.s32.totalorder %s9894_s29, %s5667_s23 }
 0x31c   : > { %v3844_v53 = vadd.f32 %v3843_v18, %v9349_v57  ;;  %v3782_v48 = vsel %vm483_vm0, %v3750_v39, %v8948_v40  ;;  %v9369_v6 = vsel %vm3810_vm11, %v3781_v45, %v3657_v31  ;;  %v3783_v40 = vsel %vm483_vm0, %v3751_v58, %v8917_v23  ;;  %v10234_v18 = vld [vmem:[#allocation45_spill] sm:$0xff]  ;;  %v10237_v45 = vld [vmem:[#allocation26_spill] sm:$0xff]  ;;  %p5663_p11 = scmp.ne.s32.totalorder %s9894_s29, %s5662_s21  ;;  %p5670_p1 = scmp.lt.s32.totalorder %s5668_s27, %s5662_s21 }
 0x31d   : > { %v3752_v31 = vsel %vm917_vm1, %v10235_v21, %v10234_v18  ;;  %v10236_v16 = vld [vmem:[#allocation49_spill] sm:$0xff] }
 0x31e   : > { %v9291_v27 = vpop.permute.xlu1 %3554  ;;  %v3845_v47 = vadd.f32 %v3844_v53, %v9369_v6  ;;  %v3784_v53 = vsel %vm483_vm0, %v3752_v31, %v8976_v28  ;;  %v10240_v31 = vld [vmem:[#allocation51_spill] sm:$0xff]  ;;  %p5664_p12 = pnand %p5663_p11, %p5823_p5  ;;  %p5671_p2 = por %p5670_p1, %p5669_p0 }
 0x31f   : > { %v9308_v43 = vpop.permute.xlu0 %3560 }
 0x320   : > { %p5665_p13 = pneg %p5664_p12 }
 0x322   : > { %v9311_v35 = vpop.permute.xlu1 %3558  ;;  %p5672_p3 = pnand %p5671_p2, %p5665_p13 }
 0x323   : > { %v3661_v17 = vpop.permute.xlu0 %3660 }
 0x326   : > { %v3659_v61 = vpop.permute.xlu1 %3658 }
 0x327   : > { %v3665_v46 = vpop.permute.xlu0 %3664  ;;  %v9372_v41 = vsel %vm3810_vm11, %v3782_v48, %v3659_v61  ;;  %v9385_v61 = vsel %vm3810_vm11, %v3783_v40, %v3661_v17  ;;  %v3754_v48 = vsel %vm917_vm1, %v10237_v45, %v10236_v16  ;;  %v10238_v17 = vld [vmem:[#allocation50_spill] sm:$0xff]  ;;  %v10243_v16 = vld [vmem:[#allocation28_spill] sm:$0xff] }
 0x328   : > { %v3846_v0 = vadd.f32 %v3845_v47, %v9372_v41  ;;  %v10239_v47 = vld [vmem:[#allocation15_spill] sm:$0xff] }
 0x329   : > { %v3753_v49 = vsel %vm917_vm1, %v10239_v47, %v10238_v17 }
 0x32a   : > { %v3663_v30 = vpop.permute.xlu1 %3662  ;;  %v3847_v42 = vadd.f32 %v3846_v0, %v9385_v61  ;;  %v3785_v28 = vsel %vm483_vm0, %v3753_v49, %v8960_v12  ;;  %v10242_v12 = vld [vmem:[#allocation52_spill] sm:$0xff] }
 0x32b   : > { %v9314_v5 = vpop.permute.xlu0 %3564  ;;  %v9391_v39 = vsel %vm3810_vm11, %v3784_v53, %v3663_v30  ;;  %v3786_v30 = vsel %vm483_vm0, %v3754_v48, %v9085_v60  ;;  %v9409_v0 = vsel %vm3810_vm11, %v3785_v28, %v3665_v46  ;;  %v10241_v53 = vld [vmem:[#allocation17_spill] sm:$0xff]  ;;  %v3755_v60 = vsel %vm917_vm1, %v10243_v16, %v10242_v12  ;;  %v10244_v28 = vld [vmem:[#allocation27_spill] sm:$0xff] }
 0x32c   : > { %v3848_v23 = vadd.f32 %v3847_v42, %v9391_v39  ;;  %v3756_v42 = vsel %vm917_vm1, %v10241_v53, %v10240_v31  ;;  %v3787_v46 = vsel %vm483_vm0, %v3755_v60, %v9060_v1  ;;  %v3757_v1 = vsel %vm917_vm1, %v10244_v28, %v8674_v2  ;;  %v10247_v12 = vld [vmem:[#allocation11_spill] sm:$0xff] }
 0x32d   : > { %v3759_v2 = vsel %vm917_vm1, %v10247_v12, %v8719_v11 }
 0x32e   : > { %v9316_v24 = vpop.permute.xlu1 %3562  ;;  %v3849_v40 = vadd.f32 %v3848_v23, %v9409_v0  ;;  %v3791_v16 = vsel %vm483_vm0, %v3759_v2, %v9217_v44 }
 0x32f   : > { %v9318_v36 = vpop.permute.xlu0 %3568 }
 0x332   : > { %v9320_v56 = vpop.permute.xlu1 %3566 }
 0x333   : > { %v9328_v54 = vpop.permute.xlu0 %3572 }
 0x338   : > { %v9346_v14 = vpop.permute.xlu1 %3570 }
 0x340   : > { %v9353_v13 = vpop.permute.xlu0 %3576 }
 0x341   : > { %v9366_v50 = vpop.permute.xlu1 %3574 }
 0x348   : > { %v3669_v10 = vpop.permute.xlu0 %3668 }
 0x349   : > { %v9427_v45 = vsel %vm3810_vm11, %v3787_v46, %v3669_v10  ;;  %v10246_v10 = vld [vmem:[#allocation31_spill] sm:$0xff]  ;;  %v10248_v46 = vld [vmem:[#allocation54_spill] sm:$0xff] }
 0x34d   : > { %v3667_v32 = vpop.permute.xlu1 %3666 }
 0x34e   : > { %v9412_v19 = vsel %vm3810_vm11, %v3786_v30, %v3667_v32  ;;  %v3788_v32 = vsel %vm483_vm0, %v3756_v42, %v9117_v7  ;;  %v3789_v7 = vsel %vm483_vm0, %v3757_v1, %v9103_v34  ;;  %v10245_v30 = vld [vmem:[#allocation53_spill] sm:$0xff]  ;;  %v10250_v1 = vld [vmem:[#allocation55_spill] sm:$0xff] }
 0x34f   : > { %v9393_v22 = vpop.permute.xlu0 %3580  ;;  %v3850_v21 = vadd.f32 %v3849_v40, %v9412_v19  ;;  %v3758_v40 = vsel %vm917_vm1, %v10246_v10, %v10245_v30 }
 0x351   : > { %v9395_v33 = vpop.permute.xlu1 %3578  ;;  %v3851_v17 = vadd.f32 %v3850_v21, %v9427_v45  ;;  %v3790_v21 = vsel %vm483_vm0, %v3758_v40, %v9234_v37  ;;  %v10252_v40 = vld [vmem:[#allocation57_spill] sm:$0xff] }
 0x353   : > { %v3673_v58 = vpop.permute.xlu0 %3672 }
 0x355   : > { %v3671_v18 = vpop.permute.xlu1 %3670 }
 0x356   : > { %v9430_v23 = vsel %vm3810_vm11, %v3788_v32, %v3671_v18  ;;  %v9445_v18 = vsel %vm3810_vm11, %v3789_v7, %v3673_v58  ;;  %v10249_v32 = vld [vmem:[#allocation29_spill] sm:$0xff]  ;;  %v10251_v7 = vld [vmem:[#allocation32_spill] sm:$0xff] }
 0x357   : > { %v3677_v48 = vpop.permute.xlu0 %3676  ;;  %v3852_v49 = vadd.f32 %v3851_v17, %v9430_v23  ;;  %v3760_v17 = vsel %vm917_vm1, %v10249_v32, %v10248_v46  ;;  %v3761_v44 = vsel %vm917_vm1, %v10251_v7, %v10250_v1  ;;  %v10255_v46 = vld [vmem:[#allocation35_spill] sm:$0xff] }
 0x358   : > { %v9460_v60 = vsel %vm3810_vm11, %v3791_v16, %v3677_v48  ;;  %v3792_v11 = vsel %vm483_vm0, %v3760_v17, %v9252_v15  ;;  %v3793_v48 = vsel %vm483_vm0, %v3761_v44, %v9239_v8  ;;  %v10256_v17 = vld [vmem:[#allocation59_spill] sm:$0xff] }
 0x359   : > { %v9433_v47 = vpop.permute.xlu1 %3582  ;;  %v3853_v53 = vadd.f32 %v3852_v49, %v9445_v18 }
 0x361   : > { %v3681_v31 = vpop.permute.xlu0 %3680 }
 0x362   : > { %v3675_v42 = vpop.permute.xlu1 %3674 }
 0x363   : > { %v9454_v34 = vsel %vm3810_vm11, %v3790_v21, %v3675_v42  ;;  %v10253_v21 = vld [vmem:[#allocation6_spill] sm:$0xff]  ;;  %v9481_v42 = vsel %vm3810_vm11, %v3793_v48, %v3681_v31 }
 0x364   : > { %v3854_v58 = vadd.f32 %v3853_v53, %v9454_v34  ;;  %v3762_v53 = vsel %vm917_vm1, %v10253_v21, %v10252_v40  ;;  %v10259_v40 = vld [vmem:[#allocation34_spill] sm:$0xff] }
 0x365   : > { %v3794_v12 = vsel %vm483_vm0, %v3762_v53, %v9291_v27 }
 0x366   : > { %v3855_v37 = vadd.f32 %v3854_v58, %v9460_v60  ;;  %v3685_v49 = vpop.permute.xlu0 %3684  ;;  %v10254_v58 = vld [vmem:[#allocation56_spill] sm:$0xff] }
 0x367   : > { %v3679_v28 = vpop.permute.xlu1 %3678  ;;  %v3763_v8 = vsel %vm917_vm1, %v10255_v46, %v10254_v58 }
 0x368   : > { %v9472_v30 = vsel %vm3810_vm11, %v3792_v11, %v3679_v28  ;;  %v3795_v32 = vsel %vm483_vm0, %v3763_v8, %v9287_v52  ;;  %v10257_v11 = vld [vmem:[#allocation12_spill] sm:$0xff] }
 0x369   : > { %v3856_v10 = vadd.f32 %v3855_v37, %v9472_v30  ;;  %v3764_v28 = vsel %vm917_vm1, %v10257_v11, %v10256_v17  ;;  %v9499_v27 = vsel %vm3810_vm11, %v3795_v32, %v3685_v49  ;;  %v10263_v17 = vld [vmem:[#allocation18_spill] sm:$0xff] }
 0x36a   : > { %v3689_v15 = vpop.permute.xlu0 %3688  ;;  %v3796_v7 = vsel %vm483_vm0, %v3764_v28, %v9311_v35 }
 0x36b   : > { %v3857_v2 = vadd.f32 %v3856_v10, %v9481_v42  ;;  %v3683_v16 = vpop.permute.xlu1 %3682  ;;  %v10258_v10 = vld [vmem:[#allocation58_spill] sm:$0xff] }
 0x36c   : > { %v9490_v37 = vsel %vm3810_vm11, %v3794_v12, %v3683_v16  ;;  %v3765_v52 = vsel %vm917_vm1, %v10259_v40, %v10258_v10  ;;  %v10260_v12 = vld [vmem:[#allocation61_spill] sm:$0xff] }
 0x36d   : > { %v3858_v31 = vadd.f32 %v3857_v2, %v9490_v37  ;;  %v3797_v53 = vsel %vm483_vm0, %v3765_v52, %v9308_v43  ;;  %v10261_v2 = vld [vmem:[#allocation39_spill] sm:$0xff] }
 0x36e   : > { %v3693_v1 = vpop.permute.xlu0 %3692  ;;  %v3766_v16 = vsel %vm917_vm1, %v10261_v2, %v10260_v12  ;;  %v9517_v35 = vsel %vm3810_vm11, %v3797_v53, %v3689_v15  ;;  %v10267_v12 = vld [vmem:[#allocation30_spill] sm:$0xff] }
 0x36f   : > { %v3859_v44 = vadd.f32 %v3858_v31, %v9499_v27  ;;  %v3687_v48 = vpop.permute.xlu1 %3686  ;;  %v3798_v46 = vsel %vm483_vm0, %v3766_v16, %v9316_v24  ;;  %v10262_v31 = vld [vmem:[#allocation60_spill] sm:$0xff] }
 0x370   : > { %v9508_v21 = vsel %vm3810_vm11, %v3796_v7, %v3687_v48  ;;  %v3767_v43 = vsel %vm917_vm1, %v10263_v17, %v10262_v31  ;;  %v10264_v7 = vld [vmem:[#allocation63_spill] sm:$0xff] }
 0x371   : > { %v3860_v49 = vadd.f32 %v3859_v44, %v9508_v21  ;;  %v3799_v28 = vsel %vm483_vm0, %v3767_v43, %v9314_v5  ;;  %v10265_v44 = vld [vmem:[#allocation38_spill] sm:$0xff] }
 0x372   : > { %v3697_v58 = vpop.permute.xlu0 %3696  ;;  %v3768_v48 = vsel %vm917_vm1, %v10265_v44, %v10264_v7  ;;  %v9535_v24 = vsel %vm3810_vm11, %v3799_v28, %v3693_v1  ;;  %v10269_v43 = vld [vmem:[#allocation22_spill] sm:$0xff]  ;;  %v10270_v7 = vld [vmem:[#allocation19_spill] sm:$0xff] }
 0x373   : > { %v3861_v8 = vadd.f32 %v3860_v49, %v9517_v35  ;;  %v3691_v32 = vpop.permute.xlu1 %3690  ;;  %v3800_v40 = vsel %vm483_vm0, %v3768_v48, %v9320_v56  ;;  %v10266_v49 = vld [vmem:[#allocation62_spill] sm:$0xff]  ;;  %v3771_v28 = vsel %vm917_vm1, %v10269_v43, %v9141_v4 }
 0x374   : > { %v9526_v11 = vsel %vm3810_vm11, %v3798_v46, %v3691_v32  ;;  %v3769_v5 = vsel %vm917_vm1, %v10267_v12, %v10266_v49  ;;  %v10268_v46 = vld [vmem:[#allocation20_spill] sm:$0xff] }
 0x375   : > { %v3862_v15 = vadd.f32 %v3861_v8, %v9526_v11  ;;  %v3801_v16 = vsel %vm483_vm0, %v3769_v5, %v9318_v36  ;;  %v3770_v8 = vsel %vm917_vm1, %v10268_v46, %v9155_v9  ;;  %v3803_v9 = vsel %vm483_vm0, %v3771_v28, %v9328_v54  ;;  %v10273_v46 = vld [vmem:[#allocation40_spill] sm:$0xff] }
 0x376   : > { %v3701_v10 = vpop.permute.xlu0 %3700  ;;  %v9553_v56 = vsel %vm3810_vm11, %v3801_v16, %v3697_v58  ;;  %v3802_v32 = vsel %vm483_vm0, %v3770_v8, %v9346_v14  ;;  %v3772_v14 = vsel %vm917_vm1, %v10270_v7, %v9197_v38 }
 0x377   : > { %v3863_v52 = vadd.f32 %v3862_v15, %v9535_v24  ;;  %v3695_v53 = vpop.permute.xlu1 %3694  ;;  %v9571_v44 = vsel %vm3810_vm11, %v3803_v9, %v3701_v10  ;;  %v3804_v48 = vsel %vm483_vm0, %v3772_v14, %v9366_v50  ;;  %v10272_v10 = vld [vmem:[#allocation24_spill] sm:$0xff] }
 0x378   : > { %v9544_v2 = vsel %vm3810_vm11, %v3800_v40, %v3695_v53  ;;  %v3774_v12 = vsel %vm917_vm1, %v10272_v10, %v9184_v26 }
 0x379   : > { %v3864_v1 = vadd.f32 %v3863_v52, %v9544_v2  ;;  %v10271_v52 = vld [vmem:[#allocation21_spill] sm:$0xff]  ;;  %v3806_v16 = vsel %vm483_vm0, %v3774_v12, %v9395_v33  ;;  %v3976_v12 = vld [vmem:[%s9950_s7 + $0x8] sm:$0xff] }
 0x37a   : > { %v3705_v36 = vpop.permute.xlu0 %3704  ;;  %v3773_v53 = vsel %vm917_vm1, %v10271_v52, %v9193_v51 }
 0x37b   : > { %v3865_v31 = vadd.f32 %v3864_v1, %v9553_v56  ;;  %v3699_v17 = vpop.permute.xlu1 %3698  ;;  %v3805_v49 = vsel %vm483_vm0, %v3773_v53, %v9353_v13  ;;  %v3775_v13 = vsel %vm917_vm1, %v10273_v46, %v9177_v59 }
 0x37c   : > { %v9562_v15 = vsel %vm3810_vm11, %v3802_v32, %v3699_v17  ;;  %v9589_v50 = vsel %vm3810_vm11, %v3805_v49, %v3705_v36  ;;  %v3807_v26 = vsel %vm483_vm0, %v3775_v13, %v9393_v22  ;;  %v10275_v22 = vld [vmem:[#allocation25_spill] sm:$0xff] }
 0x37d   : > { %v3866_v58 = vadd.f32 %v3865_v31, %v9562_v15  ;;  %v10274_v31 = vld [vmem:[#allocation23_spill] sm:$0xff] }
 0x37e   : > { %v3709_v5 = vpop.permute.xlu0 %3708  ;;  %v3776_v17 = vsel %vm917_vm1, %v10274_v31, %v9212_v3 }
 0x37f   : > { %v3867_v4 = vadd.f32 %v3866_v58, %v9571_v44  ;;  %v3703_v40 = vpop.permute.xlu1 %3702  ;;  %v9607_v33 = vsel %vm3810_vm11, %v3807_v26, %v3709_v5  ;;  %v3808_v43 = vsel %vm483_vm0, %v3776_v17, %v9433_v47  ;;  %v3777_v58 = vsel %vm917_vm1, %v10275_v22, %v9205_v29  ;;  %v3975_v29 = vld [vmem:[%s9950_s7] sm:$0xff]  ;;  %v3977_v5 = vld [vmem:[%s9950_s7 + $0x10] sm:$0xff]  ;;  %v5389_v22 = vld [vmem:[%s9946_s3 + $0x18] sm:$0xff]  }
 0x380   : > { %v9580_v54 = vsel %vm3810_vm11, %v3804_v48, %v3703_v40 }
 0x381   : > { %v3868_v38 = vadd.f32 %v3867_v4, %v9580_v54 }
 0x382   : > { %v3585_v36 = vpop.permute.xlu0 %3584 }
 0x383   : > { %v3869_v51 = vadd.f32 %v3868_v38, %v9589_v50  ;;  %v3707_v1 = vpop.permute.xlu1 %3706  ;;  %v3809_v7 = vsel %vm483_vm0, %v3777_v58, %v3585_v36  ;;  %v5388_v36 = vld [vmem:[%s9946_s3 + $0x10] sm:$0xff]   ;;  %v5390_v58 = vld [vmem:[%s9946_s3 + $0x20] sm:$0xff]  }
 0x384   : > { %v9598_v8 = vsel %vm3810_vm11, %v3806_v16, %v3707_v1  ;;  %v5314_v16 = vpack.c.bf16 %v3976_v12, %v3975_v29 }
 0x385   : > { %v3870_v32 = vadd.f32 %v3869_v51, %v9598_v8  ;;  %v3978_v51 = vld [vmem:[%s9950_s7 + $0x18] sm:$0xff] }
 0x386   : > { %v5317_v1 = vpack.c.bf16 %v3978_v51, %v3977_v5 }
 0x387   : > { %v3871_v59 = vadd.f32 %v3870_v32, %v9607_v33  ;;  %v3711_v28 = vpop.permute.xlu1 %3710 }
 0x388   : > { %v9613_v9 = vsel %vm3810_vm11, %v3808_v43, %v3711_v28  ;;  %v5387_v28 = vld [vmem:[%s9946_s3 + $0x8] sm:$0xff]  }
 0x389   : > { %v3872_v3 = vadd.f32 %v3871_v59, %v9613_v9 }
 0x38b   : > { %v3713_v14 = vpop.permute.xlu1 %3712 }
 0x38c   : > { %v9621_v48 = vsel %vm3810_vm11, %v3809_v7, %v3713_v14  ;;  %v5391_v7 = vld [vmem:[%s9946_s3 + $0x28] sm:$0xff]   ;;  %v5393_v14 = vld [vmem:[%s9946_s3 + $0x38] sm:$0xff]  }
 0x38d   : > { %v3873_v47 = vadd.f32 %v3872_v3, %v9621_v48  ;;  %v5392_v3 = vld [vmem:[%s9946_s3 + $0x30] sm:$0xff]  }
 0x38f   : > { %v3874_v4 = vrot.slane %v3873_v47, 4 }
 0x391   : > { %v3875_v40 = vadd.f32 %v3874_v4, %v3873_v47  ;;  %v3979_v47 = vld [vmem:[%s9951_s8] sm:$0x1] }
 0x393   : > { %v3876_v52 = vrot.slane %v3875_v40, 2 }
 0x395   : > { %v3877_v53 = vadd.f32 %v3876_v52, %v3875_v40 }
 0x397   : > { %v3878_v49 = vrot.slane %v3877_v53, 1 }
 0x399   : > { %v3879_v38 = vadd.f32 %v3878_v49, %v3877_v53 }
 0x39b   : > { %v3880_v10 = vmul.f32 0.00390625, %v3879_v38 }
 0x39d   : > { %5228 = vmatmul.mubr.f32.vlgmr.msra.gmra.mrb[32].mxu0 %v3880_v10  ;;  %v4061_v10 = vsub.s32 0, %v5939_v63 }
 0x39e   : > { %5238 = vmatprep.mubr.msk.f32.mxu0 %vm5731_vm10, %v5732_v55  ;;  %5315 = vmatpush3.bf16.msra.mxu0 %v5314_v16  ;;  %v3897_v55 = vld [vmem:[%s9949_s6] sm:$0x1] }
 0x39f   : > { %5316 = vmatprep.subr.bf16.mxu0 %v5730_v25  ;;  %v5386_v25 = vld [vmem:[%s9946_s3] sm:$0xff]  }
 0x3a0   : > { %5241 = vmatprep.subr.bf16.mxu1 %v5386_v25 }
 0x3a1   : > { %5242 = vmatpush3.bf16.msra.mxu1 %v5386_v25 }
 0x3a2   : > { %5318 = vmatpush3.bf16.msra.mxu0 %v5317_v1  ;;  %5243 = vmatprep.subr.bf16.mxu1 %v5387_v28 }
 0x3a5   : > { %5244 = vmatpush3.bf16.msra.mxu1 %v5387_v28 }
 0x3a6   : > { %5245 = vmatprep.subr.bf16.mxu1 %v5388_v36 }
 0x3a9   : > { %5246 = vmatpush3.bf16.msra.mxu1 %v5388_v36 }
 0x3aa   : > { %5247 = vmatprep.subr.bf16.mxu1 %v5389_v22 }
 0x3ad   : > { %5248 = vmatpush3.bf16.msra.mxu1 %v5389_v22 }
 0x3ae   : > { %5249 = vmatprep.subr.bf16.mxu1 %v5390_v58 }
 0x3b1   : > { %5250 = vmatpush3.bf16.msra.mxu1 %v5390_v58 }
 0x3b2   : > { %5251 = vmatprep.subr.bf16.mxu1 %v5391_v7 }
 0x3b5   : > { %5252 = vmatpush3.bf16.msra.mxu1 %v5391_v7 }
 0x3b6   : > { %5253 = vmatprep.subr.bf16.mxu1 %v5392_v3 }
 0x3b9   : > { %5254 = vmatpush3.bf16.msra.mxu1 %v5392_v3 }
 0x3ba   : > { %5255 = vmatprep.subr.bf16.mxu1 %v5393_v14 }
 0x3bd   : > { %5256 = vmatpush3.bf16.msra.mxu1 %v5393_v14 }
 0x470   : > { %v3964_v46 = vpop.f32.mrb[32].mxu0 }
 0x471   : > { %v3965_v13 = vadd.f32 %v3964_v46, %v3897_v55  ;;  %v5229_v26 = vpop.f32.mrb[33].mxu0 }
 0x473   : > { %v4879_v32 = vmul.f32 -1.442695, %v3965_v13 }
 0x475   : > { %5522 = vpow2.f32 %v4879_v32 }
 0x47f   : > { %v5523_v31 = vpop.eup %5522 }
 0x480   : > { %v3971_v17 = vadd.f32 1.0, %v5523_v31 }
 0x482   : > { %5524 = vrcp.f32 %v3971_v17 }
 0x48c   : > { %v5525_v43 = vpop.eup %5524 }
 0x48d   : > { %v3974_v59 = vmul.f32 %v5525_v43, %v3965_v13 }
 0x48f   : > { %5239 = vmatmul.mubr.msk.f32.vlgmr.msra.gmra.mrb[34].mxu0 %vm917_vm1, %v3974_v59 }
 0x562   : > { %v4049_v4 = vpop.f32.mrb[34].mxu0 }
 0x563   : > { %v4050_v40 = vadd.f32 %v4049_v4, %v3979_v47  ;;  %v5240_v52 = vpop.f32.mrb[35].mxu0 }
 0x565   : > { %v4881_v53 = vmul.f32 -1.442695, %v4050_v40 }
 0x567   : > { %5526 = vpow2.f32 %v4881_v53 }
 0x571   : > { %v5527_v49 = vpop.eup %5526 }
 0x572   : > { %v4056_v38 = vadd.f32 1.0, %v5527_v49 }
 0x574   : > { %5528 = vrcp.f32 %v4056_v38 }
 0x57e   : > { %v5529_v29 = vpop.eup %5528 }
 0x57f   : > { %v4062_v12 = vrot.slane %v5529_v29, %v4061_v10 }
 0x581   : > { %v4065_v5 = vmul.f32 %v4062_v12, %v9349_v57  ;;  %v4066_v16 = vmul.f32 %v4062_v12, %v9369_v6  ;;  %v4067_v51 = vmul.f32 %v4062_v12, %v9372_v41  ;;  %v4068_v1 = vmul.f32 %v4062_v12, %v9385_v61 }
 0x582   : > { %v4063_v55 = vmul.f32 %v4062_v12, %v9342_v62  ;;  %v4064_v46 = vmul.f32 %v4062_v12, %v9339_v20  ;;  %v4069_v63 = vmul.f32 %v4062_v12, %v9391_v39  ;;  %v4070_v57 = vmul.f32 %v4062_v12, %v9409_v0 }
 0x583   : > { %v4096_v13 = vpack.c.bf16 %v4066_v16, %v4065_v5  ;;  %v4097_v32 = vpack.c.bf16 %v4068_v1, %v4067_v51  ;;  %v4071_v6 = vmul.f32 %v4062_v12, %v9412_v19  ;;  %v4072_v41 = vmul.f32 %v4062_v12, %v9427_v45 }
 0x584   : > { %v4095_v26 = vpack.c.bf16 %v4064_v46, %v4063_v55  ;;  %v4098_v31 = vpack.c.bf16 %v4070_v57, %v4069_v63  ;;  %v4073_v20 = vmul.f32 %v4062_v12, %v9430_v23  ;;  %v4074_v62 = vmul.f32 %v4062_v12, %v9445_v18 }
 0x585   : > { %v4099_v61 = vpack.c.bf16 %v4072_v41, %v4071_v6  ;;  %v4075_v17 = vmul.f32 %v4062_v12, %v9454_v34  ;;  %v4076_v43 = vmul.f32 %v4062_v12, %v9460_v60  ;;  %v4077_v0 = vmul.f32 %v4062_v12, %v9472_v30 }
 0x586   : > { %5257 = vmatprep.mubr.bf16.mxu1 %v4095_v26  ;;  %v4100_v59 = vpack.c.bf16 %v4074_v62, %v4073_v20  ;;  %v4078_v19 = vmul.f32 %v4062_v12, %v9481_v42  ;;  %v4079_v45 = vmul.f32 %v4062_v12, %v9490_v37  ;;  %v4080_v25 = vmul.f32 %v4062_v12, %v9499_v27 }
 0x587   : > { %5258 = vmatmul.mubr.bf16.vlgmr.msra.gmra.mrb[0].mxu1 %v4096_v13  ;;  %v4101_v39 = vpack.c.bf16 %v4076_v43, %v4075_v17  ;;  %v4081_v18 = vmul.f32 %v4062_v12, %v9508_v21  ;;  %v4082_v34 = vmul.f32 %v4062_v12, %v9517_v35  ;;  %v4083_v60 = vmul.f32 %v4062_v12, %v9526_v11 }
 0x588   : > { %5261 = vmatprep.mubr.bf16.mxu1 %v4097_v32  ;;  %v4102_v28 = vpack.c.bf16 %v4078_v19, %v4077_v0  ;;  %v4103_v23 = vpack.c.bf16 %v4080_v25, %v4079_v45  ;;  %v4084_v36 = vmul.f32 %v4062_v12, %v9535_v24  ;;  %v4085_v42 = vmul.f32 %v4062_v12, %v9544_v2 }
 0x589   : > { %v4104_v22 = vpack.c.bf16 %v4082_v34, %v4081_v18  ;;  %v4086_v37 = vmul.f32 %v4062_v12, %v9553_v56  ;;  %v4087_v27 = vmul.f32 %v4062_v12, %v9562_v15  ;;  %v4088_v58 = vmul.f32 %v4062_v12, %v9571_v44 }
 0x58a   : > { %v4105_v30 = vpack.c.bf16 %v4084_v36, %v4083_v60  ;;  %v4089_v35 = vmul.f32 %v4062_v12, %v9580_v54  ;;  %v4090_v11 = vmul.f32 %v4062_v12, %v9589_v50  ;;  %v4091_v24 = vmul.f32 %v4062_v12, %v9598_v8  ;;  %v9706_v54 = vld [vmem:[%s9947_s4] ss:$0 sm:$0xff] }
 0x58b   : > { %v4106_v7 = vpack.c.bf16 %v4086_v37, %v4085_v42  ;;  %v4107_v21 = vpack.c.bf16 %v4088_v58, %v4087_v27  ;;  %v4092_v3 = vmul.f32 %v4062_v12, %v9607_v33  ;;  %v4093_v56 = vmul.f32 %v4062_v12, %v9613_v9 }
 0x58c   : > { %v4108_v14 = vpack.c.bf16 %v4090_v11, %v4089_v35  ;;  %v4094_v15 = vmul.f32 %v4062_v12, %v9621_v48 }
 0x58d   : > { %v4109_v2 = vpack.c.bf16 %v4092_v3, %v4091_v24 }
 0x58e   : > { %v4110_v44 = vpack.c.bf16 %v4094_v15, %v4093_v56 }
 0x58f   : > { %5262 = vmatmul.mubr.bf16.gmra.mrb[4].mxu1 %v4098_v31 }
 0x590   : > { %5265 = vmatprep.mubr.bf16.mxu1 %v4099_v61 }
 0x597   : > { %5266 = vmatmul.mubr.bf16.gmra.mrb[8].mxu1 %v4100_v59 }
 0x598   : > { %5269 = vmatprep.mubr.bf16.mxu1 %v4101_v39 }
 0x59f   : > { %5270 = vmatmul.mubr.bf16.gmra.mrb[12].mxu1 %v4102_v28 }
 0x5a0   : > { %5273 = vmatprep.mubr.bf16.mxu1 %v4103_v23 }
 0x5a7   : > { %5274 = vmatmul.mubr.bf16.gmra.mrb[16].mxu1 %v4104_v22 }
 0x5a8   : > { %5277 = vmatprep.mubr.bf16.mxu1 %v4105_v30 }
 0x5af   : > { %5278 = vmatmul.mubr.bf16.gmra.mrb[20].mxu1 %v4106_v7 }
 0x5b0   : > { %5281 = vmatprep.mubr.bf16.mxu1 %v4107_v21 }
 0x5b7   : > { %5282 = vmatmul.mubr.bf16.gmra.mrb[24].mxu1 %v4108_v14 }
 0x5b8   : > { %5285 = vmatprep.mubr.bf16.mxu1 %v4109_v2 }
 0x5bf   : > { %5286 = vmatmul.mubr.bf16.gmra.mrb[28].mxu1 %v4110_v44 }
 0x65a   : > { %v5259_v50 = vpop.f32.mrb[0].mxu1 }
 0x65b   : > { %v9709_v8 = vadd.f32 %v5259_v50, %v9706_v54  ;;  %v4216_v33 = vpop.f32.mrb[1].mxu1 }
 0x65c   : > { %v9712_v47 = vadd.f32 %v9706_v54, %v4216_v33  ;;  %v5260_v4 = vpop.f32.mrb[2].mxu1 }
 0x65d   : > { %v4893_v9 = vmul.f32 -1.442695, %v9709_v8  ;;  %v9716_v48 = vadd.f32 %v5260_v4, %v9706_v54  ;;  %v4219_v40 = vpop.f32.mrb[3].mxu1 }
 0x65e   : > { %v4891_v52 = vmul.f32 -1.442695, %v9712_v47  ;;  %v9720_v53 = vadd.f32 %v9706_v54, %v4219_v40 }
 0x65f   : > { %5530 = vpow2.f32 %v4893_v9  ;;  %v4894_v49 = vmul.f32 -1.442695, %v9716_v48 }
 0x660   : > { %5532 = vpow2.f32 %v4891_v52  ;;  %v4892_v38 = vmul.f32 -1.442695, %v9720_v53 }
 0x661   : > { %5534 = vpow2.f32 %v4894_v49 }
 0x662   : > { %5536 = vpow2.f32 %v4892_v38  ;;  %v5263_v10 = vpop.f32.mrb[4].mxu1 }
 0x663   : > { %v9725_v29 = vadd.f32 %v5263_v10, %v9706_v54  ;;  %v4232_v12 = vpop.f32.mrb[5].mxu1 }
 0x664   : > { %v9728_v5 = vadd.f32 %v9706_v54, %v4232_v12  ;;  %v5264_v16 = vpop.f32.mrb[6].mxu1 }
 0x665   : > { %v4897_v51 = vmul.f32 -1.442695, %v9725_v29  ;;  %v9732_v1 = vadd.f32 %v5264_v16, %v9706_v54  ;;  %v4235_v55 = vpop.f32.mrb[7].mxu1 }
 0x666   : > { %v4895_v46 = vmul.f32 -1.442695, %v9728_v5  ;;  %v9736_v13 = vadd.f32 %v9706_v54, %v4235_v55 }
 0x667   : > { %5538 = vpow2.f32 %v4897_v51  ;;  %v4898_v26 = vmul.f32 -1.442695, %v9732_v1 }
 0x668   : > { %5540 = vpow2.f32 %v4895_v46  ;;  %v4896_v32 = vmul.f32 -1.442695, %v9736_v13 }
 0x669   : > { %v5531_v63 = vpop.eup %5530  ;;  %5542 = vpow2.f32 %v4898_v26 }
 0x66a   : > { %v5533_v57 = vpop.eup %5532  ;;  %v4441_v6 = vadd.f32 1.0, %v5531_v63  ;;  %5544 = vpow2.f32 %v4896_v32  ;;  %v5267_v41 = vpop.f32.mrb[8].mxu1 }
 0x66b   : > { %v5535_v31 = vpop.eup %5534  ;;  %v4439_v61 = vadd.f32 1.0, %v5533_v57  ;;  %v9741_v20 = vadd.f32 %v5267_v41, %v9706_v54  ;;  %v4248_v62 = vpop.f32.mrb[9].mxu1 }
 0x66c   : > { %v5537_v17 = vpop.eup %5536  ;;  %5546 = vrcp.f32 %v4441_v6  ;;  %v4442_v43 = vadd.f32 1.0, %v5535_v31  ;;  %v9744_v59 = vadd.f32 %v9706_v54, %v4248_v62  ;;  %v5268_v39 = vpop.f32.mrb[10].mxu1 }
 0x66d   : > { %5548 = vrcp.f32 %v4439_v61  ;;  %v4440_v0 = vadd.f32 1.0, %v5537_v17  ;;  %v4901_v19 = vmul.f32 -1.442695, %v9741_v20  ;;  %v9748_v45 = vadd.f32 %v5268_v39, %v9706_v54  ;;  %v4251_v25 = vpop.f32.mrb[11].mxu1 }
 0x66e   : > { %5550 = vrcp.f32 %v4442_v43  ;;  %v4899_v28 = vmul.f32 -1.442695, %v9744_v59  ;;  %v9752_v23 = vadd.f32 %v9706_v54, %v4251_v25 }
 0x66f   : > { %5552 = vrcp.f32 %v4440_v0  ;;  %v4902_v18 = vmul.f32 -1.442695, %v9748_v45 }
 0x670   : > { %5554 = vpow2.f32 %v4901_v19  ;;  %v4900_v34 = vmul.f32 -1.442695, %v9752_v23 }
 0x671   : > { %v5539_v60 = vpop.eup %5538  ;;  %5556 = vpow2.f32 %v4899_v28 }
 0x672   : > { %v5541_v36 = vpop.eup %5540  ;;  %v4445_v22 = vadd.f32 1.0, %v5539_v60  ;;  %5558 = vpow2.f32 %v4902_v18  ;;  %v5271_v30 = vpop.f32.mrb[12].mxu1 }
 0x673   : > { %v5543_v42 = vpop.eup %5542  ;;  %v4443_v37 = vadd.f32 1.0, %v5541_v36  ;;  %5560 = vpow2.f32 %v4900_v34  ;;  %v9757_v27 = vadd.f32 %v5271_v30, %v9706_v54  ;;  %v4264_v58 = vpop.f32.mrb[13].mxu1 }
 0x674   : > { %v5545_v7 = vpop.eup %5544  ;;  %5562 = vrcp.f32 %v4445_v22  ;;  %v4446_v21 = vadd.f32 1.0, %v5543_v42  ;;  %v9761_v35 = vadd.f32 %v9706_v54, %v4264_v58  ;;  %v5272_v11 = vpop.f32.mrb[14].mxu1 }
 0x675   : > { %5564 = vrcp.f32 %v4443_v37  ;;  %v4444_v24 = vadd.f32 1.0, %v5545_v7  ;;  %v4905_v3 = vmul.f32 -1.442695, %v9757_v27  ;;  %v9765_v14 = vadd.f32 %v5272_v11, %v9706_v54  ;;  %v4267_v2 = vpop.f32.mrb[15].mxu1 }
 0x676   : > { %v5547_v56 = vpop.eup %5546  ;;  %5566 = vrcp.f32 %v4446_v21  ;;  %v4903_v15 = vmul.f32 -1.442695, %v9761_v35  ;;  %v9769_v44 = vadd.f32 %v9706_v54, %v4267_v2 }
 0x677   : > { %v5549_v50 = vpop.eup %5548  ;;  %5568 = vrcp.f32 %v4444_v24  ;;  %v4906_v33 = vmul.f32 -1.442695, %v9765_v14  ;;  %v4537_v52 = vmul.f32 %v5547_v56, %v9709_v8 }
 0x678   : > { %v5551_v4 = vpop.eup %5550  ;;  %5570 = vpow2.f32 %v4905_v3  ;;  %v4904_v9 = vmul.f32 -1.442695, %v9769_v44  ;;  %v4535_v10 = vmul.f32 %v5549_v50, %v9712_v47 }
 0x679   : > { %v5553_v40 = vpop.eup %5552  ;;  %v4538_v49 = vmul.f32 %v5551_v4, %v9716_v48  ;;  %5572 = vpow2.f32 %v4903_v15 }
 0x67a   : > { %v5555_v38 = vpop.eup %5554  ;;  %v4536_v12 = vmul.f32 %v5553_v40, %v9720_v53  ;;  %5574 = vpow2.f32 %v4906_v33  ;;  %v5275_v16 = vpop.f32.mrb[16].mxu1 }
 0x67b   : > { %v5557_v51 = vpop.eup %5556  ;;  %v5002_v55 = vpack.c.bf16 %v4538_v49, %v4537_v52  ;;  %v4449_v46 = vadd.f32 1.0, %v5555_v38  ;;  %5576 = vpow2.f32 %v4904_v9  ;;  %v9780_v26 = vadd.f32 %v5275_v16, %v9706_v54  ;;  %v4280_v32 = vpop.f32.mrb[17].mxu1 }
 0x67c   : > { %v5559_v63 = vpop.eup %5558  ;;  %v4997_v8 = vpack.c.bf16 %v4536_v12, %v4535_v10  ;;  %v4447_v57 = vadd.f32 1.0, %v5557_v51  ;;  %v9783_v48 = vadd.f32 %v9706_v54, %v4280_v32  ;;  %v5276_v6 = vpop.f32.mrb[18].mxu1 }
 0x67d   : > { %v5561_v47 = vpop.eup %5560  ;;  %5074 = vst [vmem:[%s9785_s26 + $0x8] sm:$0xff] %v5002_v55   ;;  %5578 = vrcp.f32 %v4449_v46  ;;  %v4450_v53 = vadd.f32 1.0, %v5559_v63  ;;  %v4909_v41 = vmul.f32 -1.442695, %v9780_v26  ;;  %v9790_v31 = vadd.f32 %v5276_v6, %v9706_v54  ;;  %v4283_v61 = vpop.f32.mrb[19].mxu1 }
 0x67e   : > { %v5563_v62 = vpop.eup %5562  ;;  %4998 = vst [vmem:[%s9785_s26] sm:$0xff] %v4997_v8   ;;  %5580 = vrcp.f32 %v4447_v57  ;;  %v4448_v17 = vadd.f32 1.0, %v5561_v47  ;;  %v4907_v43 = vmul.f32 -1.442695, %v9783_v48  ;;  %v9795_v39 = vadd.f32 %v9706_v54, %v4283_v61 }
 0x67f   : > { %v5565_v0 = vpop.eup %5564  ;;  %5582 = vrcp.f32 %v4450_v53  ;;  %v4910_v19 = vmul.f32 -1.442695, %v9790_v31  ;;  %v4541_v34 = vmul.f32 %v5563_v62, %v9725_v29 }
 0x680   : > { %v5567_v25 = vpop.eup %5566  ;;  %5584 = vrcp.f32 %v4448_v17  ;;  %v4908_v28 = vmul.f32 -1.442695, %v9795_v39  ;;  %v4539_v22 = vmul.f32 %v5565_v0, %v9728_v5 }
 0x681   : > { %v5569_v18 = vpop.eup %5568  ;;  %v4542_v60 = vmul.f32 %v5567_v25, %v9732_v1  ;;  %5586 = vpow2.f32 %v4909_v41 }
 0x682   : > { %v5571_v36 = vpop.eup %5570  ;;  %v4540_v30 = vmul.f32 %v5569_v18, %v9736_v13  ;;  %5588 = vpow2.f32 %v4907_v43  ;;  %v5279_v42 = vpop.f32.mrb[20].mxu1 }
 0x683   : > { %v5573_v37 = vpop.eup %5572  ;;  %v5012_v58 = vpack.c.bf16 %v4542_v60, %v4541_v34  ;;  %v4453_v7 = vadd.f32 1.0, %v5571_v36  ;;  %5590 = vpow2.f32 %v4910_v19  ;;  %v9804_v21 = vadd.f32 %v5279_v42, %v9706_v54  ;;  %v4296_v29 = vpop.f32.mrb[21].mxu1 }
 0x684   : > { %v5575_v11 = vpop.eup %5574  ;;  %v5007_v1 = vpack.c.bf16 %v4540_v30, %v4539_v22  ;;  %v4451_v24 = vadd.f32 1.0, %v5573_v37  ;;  %5592 = vpow2.f32 %v4908_v28  ;;  %v9807_v5 = vadd.f32 %v9706_v54, %v4296_v29  ;;  %v5280_v13 = vpop.f32.mrb[22].mxu1 }
 0x685   : > { %v5577_v3 = vpop.eup %5576  ;;  %5076 = vst [vmem:[%s9785_s26 + $0x18] sm:$0xff] %v5012_v58   ;;  %5594 = vrcp.f32 %v4453_v7  ;;  %v4454_v2 = vadd.f32 1.0, %v5575_v11  ;;  %v4913_v56 = vmul.f32 -1.442695, %v9804_v21  ;;  %v9812_v15 = vadd.f32 %v5280_v13, %v9706_v54  ;;  %v4299_v50 = vpop.f32.mrb[23].mxu1 }
 0x686   : > { %5075 = vst [vmem:[%s9785_s26 + $0x10] sm:$0xff] %v5007_v1   ;;  %5596 = vrcp.f32 %v4451_v24  ;;  %v4452_v33 = vadd.f32 1.0, %v5577_v3  ;;  %v4911_v4 = vmul.f32 -1.442695, %v9807_v5  ;;  %v9817_v9 = vadd.f32 %v9706_v54, %v4299_v50 }
 0x687   : > { %v5579_v40 = vpop.eup %5578  ;;  %5598 = vrcp.f32 %v4454_v2  ;;  %v4914_v52 = vmul.f32 -1.442695, %v9812_v15 }
 0x688   : > { %v5581_v49 = vpop.eup %5580  ;;  %5600 = vrcp.f32 %v4452_v33  ;;  %v4912_v38 = vmul.f32 -1.442695, %v9817_v9  ;;  %v4545_v16 = vmul.f32 %v5579_v40, %v9741_v20 }
 0x689   : > { %v5583_v10 = vpop.eup %5582  ;;  %5602 = vpow2.f32 %v4913_v56  ;;  %v4543_v32 = vmul.f32 %v5581_v49, %v9744_v59 }
 0x68a   : > { %v5585_v12 = vpop.eup %5584  ;;  %v4546_v51 = vmul.f32 %v5583_v10, %v9748_v45  ;;  %5604 = vpow2.f32 %v4911_v4  ;;  %v5283_v55 = vpop.f32.mrb[24].mxu1 }
 0x68b   : > { %v5587_v46 = vpop.eup %5586  ;;  %v4544_v63 = vmul.f32 %v5585_v12, %v9752_v23  ;;  %5606 = vpow2.f32 %v4914_v52  ;;  %v9826_v8 = vadd.f32 %v5283_v55, %v9706_v54  ;;  %v4312_v57 = vpop.f32.mrb[25].mxu1 }
 0x68c   : > { %v5589_v6 = vpop.eup %5588  ;;  %v5022_v47 = vpack.c.bf16 %v4546_v51, %v4545_v16  ;;  %v4457_v53 = vadd.f32 1.0, %v5587_v46  ;;  %5608 = vpow2.f32 %v4912_v38  ;;  %v9829_v20 = vadd.f32 %v9706_v54, %v4312_v57  ;;  %v5284_v45 = vpop.f32.mrb[26].mxu1 }
 0x68d   : > { %v5591_v41 = vpop.eup %5590  ;;  %v5017_v61 = vpack.c.bf16 %v4544_v63, %v4543_v32  ;;  %v4455_v59 = vadd.f32 1.0, %v5589_v6  ;;  %v9832_v23 = vadd.f32 %v5284_v45, %v9706_v54  ;;  %v4315_v62 = vpop.f32.mrb[27].mxu1  ;;  %v4917_v0 = vmul.f32 -1.442695, %v9826_v8 }
 0x68e   : > { %v5593_v17 = vpop.eup %5592  ;;  %5078 = vst [vmem:[%s9785_s26 + $0x28] sm:$0xff] %v5022_v47   ;;  %5610 = vrcp.f32 %v4457_v53  ;;  %v4458_v43 = vadd.f32 1.0, %v5591_v41  ;;  %v9837_v19 = vadd.f32 %v9706_v54, %v4315_v62  ;;  %v4915_v18 = vmul.f32 -1.442695, %v9829_v20 }
 0x68f   : > { %v5595_v25 = vpop.eup %5594  ;;  %5077 = vst [vmem:[%s9785_s26 + $0x20] sm:$0xff] %v5017_v61   ;;  %5612 = vrcp.f32 %v4455_v59  ;;  %v4456_v28 = vadd.f32 1.0, %v5593_v17  ;;  %v4918_v60 = vmul.f32 -1.442695, %v9832_v23 }
 0x690   : > { %v5597_v34 = vpop.eup %5596  ;;  %5614 = vrcp.f32 %v4458_v43  ;;  %v4916_v22 = vmul.f32 -1.442695, %v9837_v19  ;;  %v4549_v42 = vmul.f32 %v5595_v25, %v9757_v27 }
 0x691   : > { %v5599_v36 = vpop.eup %5598  ;;  %5616 = vrcp.f32 %v4456_v28  ;;  %v4547_v29 = vmul.f32 %v5597_v34, %v9761_v35 }
 0x692   : > { %v5601_v30 = vpop.eup %5600  ;;  %v4550_v37 = vmul.f32 %v5599_v36, %v9765_v14  ;;  %5618 = vpow2.f32 %v4917_v0  ;;  %v5287_v58 = vpop.f32.mrb[28].mxu1 }
 0x693   : > { %v5603_v7 = vpop.eup %5602  ;;  %v4548_v11 = vmul.f32 %v5601_v30, %v9769_v44  ;;  %5620 = vpow2.f32 %v4915_v18  ;;  %v9848_v1 = vadd.f32 %v5287_v58, %v9706_v54  ;;  %v4328_v24 = vpop.f32.mrb[29].mxu1 }
 0x694   : > { %v5605_v13 = vpop.eup %5604  ;;  %v5032_v3 = vpack.c.bf16 %v4550_v37, %v4549_v42  ;;  %v4461_v2 = vadd.f32 1.0, %v5603_v7  ;;  %5622 = vpow2.f32 %v4918_v60  ;;  %v9851_v27 = vadd.f32 %v9706_v54, %v4328_v24  ;;  %v5288_v14 = vpop.f32.mrb[30].mxu1 }
 0x695   : > { %v5607_v56 = vpop.eup %5606  ;;  %v5027_v50 = vpack.c.bf16 %v4548_v11, %v4547_v29  ;;  %v4459_v35 = vadd.f32 1.0, %v5605_v13  ;;  %5624 = vpow2.f32 %v4916_v22  ;;  %v4331_v44 = vpop.f32.mrb[31].mxu1  ;;  %v4921_v40 = vmul.f32 -1.442695, %v9848_v1 }
 0x696   : > { %v5609_v33 = vpop.eup %5608  ;;  %5080 = vst [vmem:[%s9785_s26 + $0x38] sm:$0xff] %v5032_v3   ;;  %5626 = vrcp.f32 %v4461_v2  ;;  %v4462_v4 = vadd.f32 1.0, %v5607_v56  ;;  %v9856_v52 = vadd.f32 %v5288_v14, %v9706_v54  ;;  %v4919_v38 = vmul.f32 -1.442695, %v9851_v27 }
 0x697   : > { %5079 = vst [vmem:[%s9785_s26 + $0x30] sm:$0xff] %v5027_v50   ;;  %5628 = vrcp.f32 %v4459_v35  ;;  %v4460_v49 = vadd.f32 1.0, %v5609_v33  ;;  %v9861_v10 = vadd.f32 %v9706_v54, %v4331_v44 }
 0x698   : > { %v5611_v12 = vpop.eup %5610  ;;  %5630 = vrcp.f32 %v4462_v4  ;;  %v4922_v16 = vmul.f32 -1.442695, %v9856_v52 }
 0x699   : > { %v5613_v51 = vpop.eup %5612  ;;  %5632 = vrcp.f32 %v4460_v49  ;;  %v4920_v55 = vmul.f32 -1.442695, %v9861_v10  ;;  %v4553_v63 = vmul.f32 %v5611_v12, %v9780_v26 }
 0x69a   : > { %v5615_v46 = vpop.eup %5614  ;;  %5634 = vpow2.f32 %v4921_v40  ;;  %v4551_v54 = vmul.f32 %v5613_v51, %v9783_v48 }
 0x69b   : > { %v5617_v32 = vpop.eup %5616  ;;  %v4554_v57 = vmul.f32 %v5615_v46, %v9790_v31  ;;  %5636 = vpow2.f32 %v4919_v38 }
 0x69c   : > { %v5619_v6 = vpop.eup %5618  ;;  %v4552_v47 = vmul.f32 %v5617_v32, %v9795_v39  ;;  %5638 = vpow2.f32 %v4922_v16 }
 0x69d   : > { %v5621_v53 = vpop.eup %5620  ;;  %v5042_v45 = vpack.c.bf16 %v4554_v57, %v4553_v63  ;;  %v4465_v41 = vadd.f32 1.0, %v5619_v6  ;;  %5640 = vpow2.f32 %v4920_v55 }
 0x69e   : > { %v5623_v61 = vpop.eup %5622  ;;  %v5037_v59 = vpack.c.bf16 %v4552_v47, %v4551_v54  ;;  %v4463_v62 = vadd.f32 1.0, %v5621_v53 }
 0x69f   : > { %v5625_v17 = vpop.eup %5624  ;;  %5082 = vst [vmem:[%s9785_s26 + $0x48] sm:$0xff] %v5042_v45   ;;  %5642 = vrcp.f32 %v4465_v41  ;;  %v4466_v26 = vadd.f32 1.0, %v5623_v61 }
 0x6a0   : > { %v5627_v31 = vpop.eup %5626  ;;  %5081 = vst [vmem:[%s9785_s26 + $0x40] sm:$0xff] %v5037_v59   ;;  %5644 = vrcp.f32 %v4463_v62  ;;  %v4464_v43 = vadd.f32 1.0, %v5625_v17 }
 0x6a1   : > { %v5629_v0 = vpop.eup %5628  ;;  %5646 = vrcp.f32 %v4466_v26  ;;  %v4557_v25 = vmul.f32 %v5627_v31, %v9804_v21 }
 0x6a2   : > { %v5631_v48 = vpop.eup %5630  ;;  %5648 = vrcp.f32 %v4464_v43  ;;  %v4555_v34 = vmul.f32 %v5629_v0, %v9807_v5 }
 0x6a3   : > { %v5633_v39 = vpop.eup %5632  ;;  %v4558_v28 = vmul.f32 %v5631_v48, %v9812_v15 }
 0x6a4   : > { %v5635_v18 = vpop.eup %5634  ;;  %v4556_v60 = vmul.f32 %v5633_v39, %v9817_v9 }
 0x6a5   : > { %v5637_v36 = vpop.eup %5636  ;;  %v5052_v22 = vpack.c.bf16 %v4558_v28, %v4557_v25  ;;  %v4469_v30 = vadd.f32 1.0, %v5635_v18 }
 0x6a6   : > { %v5639_v42 = vpop.eup %5638  ;;  %v5047_v37 = vpack.c.bf16 %v4556_v60, %v4555_v34  ;;  %v4467_v58 = vadd.f32 1.0, %v5637_v36 }
 0x6a7   : > { %v5641_v7 = vpop.eup %5640  ;;  %5084 = vst [vmem:[%s9785_s26 + $0x58] sm:$0xff] %v5052_v22   ;;  %5650 = vrcp.f32 %v4469_v30  ;;  %v4470_v29 = vadd.f32 1.0, %v5639_v42 }
 0x6a8   : > { %5083 = vst [vmem:[%s9785_s26 + $0x50] sm:$0xff] %v5047_v37   ;;  %5652 = vrcp.f32 %v4467_v58  ;;  %v4468_v21 = vadd.f32 1.0, %v5641_v7 }
 0x6a9   : > { %v5643_v15 = vpop.eup %5642  ;;  %5654 = vrcp.f32 %v4470_v29 }
 0x6aa   : > { %v5645_v5 = vpop.eup %5644  ;;  %5656 = vrcp.f32 %v4468_v21  ;;  %v4561_v24 = vmul.f32 %v5643_v15, %v9826_v8 }
 0x6ab   : > { %v5647_v9 = vpop.eup %5646  ;;  %v4559_v3 = vmul.f32 %v5645_v5, %v9829_v20 }
 0x6ac   : > { %v5649_v11 = vpop.eup %5648  ;;  %v4562_v13 = vmul.f32 %v5647_v9, %v9832_v23 }
 0x6ad   : > { %v4560_v2 = vmul.f32 %v5649_v11, %v9837_v19 }
 0x6ae   : > { %v5062_v14 = vpack.c.bf16 %v4562_v13, %v4561_v24 }
 0x6af   : > { %v5057_v56 = vpack.c.bf16 %v4560_v2, %v4559_v3 }
 0x6b0   : > { %5086 = vst [vmem:[%s9785_s26 + $0x68] sm:$0xff] %v5062_v14  }
 0x6b1   : > { %v5651_v50 = vpop.eup %5650  ;;  %5085 = vst [vmem:[%s9785_s26 + $0x60] sm:$0xff] %v5057_v56  }
 0x6b2   : > { %v5653_v35 = vpop.eup %5652  ;;  %v4565_v8 = vmul.f32 %v5651_v50, %v9848_v1 }
 0x6b3   : > { %v5655_v44 = vpop.eup %5654  ;;  %v4563_v20 = vmul.f32 %v5653_v35, %v9851_v27 }
 0x6b4   : > { %v5657_v33 = vpop.eup %5656  ;;  %v4566_v23 = vmul.f32 %v5655_v44, %v9856_v52 }
 0x6b5   : > { %v4564_v19 = vmul.f32 %v5657_v33, %v9861_v10 }
 0x6b6   : > { %v5072_v4 = vpack.c.bf16 %v4566_v23, %v4565_v8 }
 0x6b7   : > { %v5067_v40 = vpack.c.bf16 %v4564_v19, %v4563_v20 }
 0x6b8   : > { %5088 = vst [vmem:[%s9785_s26 + $0x78] sm:$0xff] %v5072_v4  }
 0x6b9   : > { %5087 = vst [vmem:[%s9785_s26 + $0x70] sm:$0xff] %v5067_v40  }
 0x6ba   : > { %5675 = shalt.err (!%p5672_p3)
}
 0x6bb   : > { %s5676_s24 = scalar_lea.hbm %s9892_s17, 2048  ;;  %s5680_s14 = scalar_lea.hbm %s9952_s9, 4096 }
 0x6bc   : > { %p5677_p4 = scmp.ne.s32.totalorder %s9892_s17, %s5676_s24  ;;  %p5681_p9 = scmp.lt.u32.totalorder %s9892_s17, %s9952_s9 }
 0x6bd   : > { %p5682_p10 = scmp.lt.u32.totalorder %s5680_s14, %s5676_s24  ;;  %p5684_p12 = scmp.lt.u32.totalorder %s5676_s24, %s9892_s17 }
 0x6be   : > { %p5678_p7 = pnand %p5677_p4, %p5823_p5 }
 0x6bf   : > { %p5683_p11 = por %p5682_p10, %p5681_p9 }
 0x6c0   : > { %p5679_p8 = pneg %p5678_p7 }
 0x6c1   : > { %p5685_p13 = por %p5684_p12, %p5683_p11 }
 0x6c3   : > { %p5686_p0 = pnand %p5685_p13, %p5679_p8 }
 0x6c5   : > { %5689 = shalt.err (!%p5686_p0)
}
 0x6c6   : > { %s5734_s21 = smov 4  }
 0x6c7   : > { %5319 = dma.vmem_to_hbm [thread:$0]  (%p5823_p5), %s9894_s29, 2048, %s9892_s17, %s9900_s13, %s5728_s25, %s5728_s25, %s5734_s21  }
 0x6c8 PF: > { %p5325_p1 = scmp.ge.s32.totalorder %s5724_s12, 2  ;;  %s4756_s23 = sand.u32 1, %s5712_s30  }
 0x6c9   : > { %s4757_s27 = scalar_lea.sflag [#allocation4], %s4756_s23 }
 0x6ca   : > { %p5322_p2 = pnand %p5325_p1, %p5827_p6 }
 0x6cc   : > { %5707 = dma.done.wait (!%p5322_p2), %s4757_s27, 2048  }
 0x6cd   : > { %5709 = vsyncadd (!%p5322_p2), %s4757_s27, 4294965248  ;;  %p19_p3 = scmp.ge.s32.totalorder %s5810_s15, 4   ;;  %s10276_s30 = smov %s5716_s10 }
 0x6ce   : > { %s10277_s10 = smov %s5720_s11  ;;  %s10278_s11 = smov %s5821_s18 }
 0x6cf   : > { %s10279_s12 = smov %s5810_s15  ;;  %21 = sbr.rel (!%p19_p3) target bundleno = 3 (0x3), region = 96 }
 0x6d6   :  { %4762 = vsyncpa [#allocation4], 1 }
 0x6d7   :  { %4764 = vsyncpa [#allocation4 + $0x1], 1 }

</bundles_post_ra>
